<compile_context>
chip_gen: v5e
topology: v5e:2x2
jax: 0.10.0
libtpu: 0.0.40
codegen_flags: <defaults>
</compile_context>

<pallas_src>
import functools
import math

import jax
import jax.numpy as jnp
import numpy as np
from jax import lax
from jax.experimental import pallas as pl
from jax.experimental.pallas import tpu as pltpu

EPS = 1e-6


def _pick_seq_tile(n):
    """Query-tile size: 128 if it divides n, else the full (small) sequence, else
    the largest multiple of 8 dividing n."""
    if n % 128 == 0:
        return 128
    if n <= 128:
        return n
    for t in range(120, 7, -8):
        if n % t == 0:
            return t
    return n


def _pick_mlp_tile(mlp):
    if mlp <= 512:
        return mlp
    for t in (512, 384, 256, 128):
        if mlp % t == 0:
            return t
    for t in range(512, 0, -1):
        if mlp % t == 0:
            return t
    return mlp


def _layernorm(x, gamma, beta, d):
    # matches the custom torch LayerNorm: unbiased std (/(d-1)), eps added to std.
    mean = jnp.mean(x, axis=-1, keepdims=True)
    var = jnp.sum((x - mean) ** 2, axis=-1, keepdims=True) * (1.0 / (d - 1))
    inv = pl.reciprocal(jnp.sqrt(var) + EPS, approx=True)       # EUP slot, ~free
    return gamma * ((x - mean) * inv) + beta


def _erf(x):
    # Abramowitz & Stegun 7.1.26 polynomial, |error| < 1.5e-7.  Uses only
    # exp/mul/div/select so it lowers cleanly inside Mosaic.
    p = 0.3275911
    a1, a2, a3, a4, a5 = 0.254829592, -0.284496736, 1.421413741, -1.453152027, 1.061405429
    ax = jnp.abs(x)
    t = 1.0 / (1.0 + p * ax)
    poly = ((((a5 * t + a4) * t + a3) * t + a2) * t + a1) * t
    y = 1.0 - poly * jnp.exp(-ax * ax)
    return jnp.where(x >= 0, y, -y)


def _gelu_exact(x):
    return 0.5 * x * (1.0 + _erf(x * (1.0 / math.sqrt(2.0))))


def transformer_layer_kernel(x_ref, g1_ref, b1_ref,
                             wq_ref, wk_ref, wv_ref, wo_ref,
                             g2_ref, b2_ref,
                             w1_ref, bf1_ref, w2_ref, bf2_ref,
                             o_ref,
                             k_sc, v_sc,
                             *, num_heads, tile_n, mlp_tile):
    t = pl.program_id(1)
    N, D = x_ref.shape                       # full sequence for this batch element
    H = num_heads
    hd = D // H
    bf16, f32 = jnp.bfloat16, jnp.float32

    g1 = g1_ref[...]
    b1 = b1_ref[...]

    # ---- once per batch element: K / V for the WHOLE sequence into VMEM scratch ----
    # Fused (N, D) @ (D, D) GEMMs; heads split afterwards with static lane slices.
    @pl.when(t == 0)
    def _():
        hf = _layernorm(x_ref[...], g1, b1, D).astype(bf16)                 # (N, D)
        kf = jnp.dot(hf, wk_ref[...], preferred_element_type=f32).astype(bf16)
        vf = jnp.dot(hf, wv_ref[...], preferred_element_type=f32).astype(bf16)
        for h in range(H):
            k_sc[h] = kf[:, h * hd:(h + 1) * hd]                            # (N, hd)
            v_sc[h] = vf[:, h * hd:(h + 1) * hd]

    # ---- attention branch for this query tile: y = x + W_o(MHSA(LN1(x))) ----
    row0 = pl.multiple_of(t * tile_n, tile_n)
    xt = x_ref[pl.ds(row0, tile_n), :]                                      # (TQ, D)
    hq = _layernorm(xt, g1, b1, D).astype(bf16)
    # Wq is pre-scaled by 1/sqrt(hd) host-side -> no (TQ, N) scale multiply later.
    qf = jnp.dot(hq, wq_ref[...], preferred_element_type=f32).astype(bf16)  # (TQ, D)

    heads = []
    for h in range(H):
        qh = qf[:, h * hd:(h + 1) * hd]                                     # (TQ, hd)
        # q . k^T without an explicit transpose (contract last dims).
        s = lax.dot_general(qh, k_sc[h], (((1,), (1,)), ((), ())),
                            preferred_element_type=f32)                     # (TQ, N)
        s = s - jnp.max(s, axis=-1, keepdims=True)                          # stable softmax
        p = jnp.exp(s)
        l = jnp.sum(p, axis=-1, keepdims=True)                              # (TQ, 1)
        av = jnp.dot(p.astype(bf16), v_sc[h], preferred_element_type=f32)   # (TQ, hd)
        # normalize AFTER the PV matmul: (TQ, hd) * (TQ, 1), not (TQ, N).
        heads.append(av * pl.reciprocal(l, approx=True))

    # merge heads once (lane concat) and do ONE full-depth output projection.
    a_cat = jnp.concatenate(heads, axis=-1).astype(bf16)                    # (TQ, D)
    attn = jnp.dot(a_cat, wo_ref[...], preferred_element_type=f32)          # (TQ, D)
    y = xt + attn

    # ---- FFN branch: out = y + fc2(gelu(fc1(LN2(y)))), hidden dim streamed ----
    h2 = _layernorm(y, g2_ref[...], b2_ref[...], D).astype(bf16)
    mlp = w1_ref.shape[1]
    nchunks = mlp // mlp_tile

    def ffn_chunk(c0, ff_acc):
        f = jnp.dot(h2, w1_ref[:, pl.ds(c0, mlp_tile)],
                    preferred_element_type=f32) + bf1_ref[:, pl.ds(c0, mlp_tile)]
        f = _gelu_exact(f).astype(bf16)                                     # exact erf GELU
        return ff_acc + jnp.dot(f, w2_ref[pl.ds(c0, mlp_tile), :],
                                preferred_element_type=f32)

    ff = jnp.zeros((tile_n, D), f32)
    if nchunks <= 8:
        for c in range(nchunks):
            ff = ffn_chunk(c * mlp_tile, ff)
    else:
        ff = lax.fori_loop(
            0, nchunks,
            lambda c, acc: ffn_chunk(pl.multiple_of(c * mlp_tile, mlp_tile), acc),
            ff, unroll=2)

    o_ref[...] = (y + ff + bf2_ref[...]).astype(o_ref.dtype)


def transformer_encoder_layer(x, params, num_heads):
    B, N, D = x.shape
    assert D % num_heads == 0
    H = num_heads
    hd = D // H
    mlp = params["w1"].shape[1]
    bf16 = jnp.bfloat16

    tile_n = _pick_seq_tile(N)
    n_tiles = N // tile_n
    mlp_tile = _pick_mlp_tile(mlp)

    # Host-side weight prep (once per call): fold softmax scale into Wq, cast to bf16.
    scale = 1.0 / math.sqrt(hd)
    wq_b = (params["wq"] * scale).astype(bf16)
    wk_b = params["wk"].astype(bf16)
    wv_b = params["wv"].astype(bf16)
    wo_b = params["wo"].astype(bf16)
    w1_b = params["w1"].astype(bf16)
    w2_b = params["w2"].astype(bf16)

    # ---- cost estimate (per full call) ----
    flops = B * (8 * N * D * D + 4 * N * N * D + 4 * N * D * mlp)
    transcendentals = B * (H * N * N + N * mlp)
    bytes_accessed = (2 * B * N * D) * 4 + (4 * D * D + 2 * D * mlp) * 2 + (6 * D + mlp) * 4
    cost = pl.CostEstimate(flops=flops, transcendentals=transcendentals,
                           bytes_accessed=bytes_accessed)

    # ---- chip-aware VMEM ceiling (v5e/v6e: 128 MiB physical, v7x: 64 MiB) ----
    try:
        vmem_cap = int(pltpu.get_tpu_info().vmem_capacity_bytes)
    except Exception:
        vmem_cap = 64 * 1024 * 1024            # conservative: safe on every generation
    vmem_ceiling = min(int(0.85 * vmem_cap), 110 * 1024 * 1024)

    def vmem_needed(weight_buf_count):
        wbytes = (4 * D * D + 2 * D * mlp) * 2 + (5 * D + mlp) * 4   # bf16 weights, f32 biases
        xbytes = 2 * N * D * 4                                       # double-buffered full x
        tile_io = 2 * (tile_n * D * 4) * 2                           # tiled output (+slack)
        kv = 2 * H * N * hd * 2                                      # K/V bf16 scratch
        inter = (3 * N * D * 4 + 4 * tile_n * N * 4 +
                 3 * tile_n * mlp_tile * 4 + 8 * tile_n * D * 4)
        return weight_buf_count * wbytes + xbytes + tile_io + kv + inter

    kernel = functools.partial(transformer_layer_kernel, num_heads=H,
                               tile_n=tile_n, mlp_tile=mlp_tile)
    args = (x, params["g1"], params["b1"], wq_b, wk_b, wv_b, wo_b,
            params["g2"], params["b2"], w1_b, params["bf1"], w2_b, params["bf2"])

    def run(single_buffer_weights):
        buf_count = 1 if single_buffer_weights else 2
        vmem_limit = max(32 * 1024 * 1024, int(1.3 * vmem_needed(buf_count)))
        vmem_limit = min(vmem_limit, vmem_ceiling)

        def wspec(shape):
            zeros = (0,) * len(shape)
            if single_buffer_weights:
                return pl.BlockSpec(shape, lambda b, t, _z=zeros: _z,
                                    pipeline_mode=pl.Buffered(1))
            return pl.BlockSpec(shape, lambda b, t, _z=zeros: _z)

        # full-sequence x view (default double-buffered: its block index varies with b)
        x_spec = pl.BlockSpec((pl.Squeezed(), N, D), lambda b, t: (b, 0, 0))
        out_spec = pl.BlockSpec((pl.Squeezed(), tile_n, D), lambda b, t: (b, t, 0))

        in_specs = [
            x_spec,
            wspec((1, D)), wspec((1, D)),                           # gamma1, beta1
            wspec((D, D)), wspec((D, D)), wspec((D, D)), wspec((D, D)),  # Wq, Wk, Wv, Wo
            wspec((1, D)), wspec((1, D)),                           # gamma2, beta2
            wspec((D, mlp)), wspec((1, mlp)),                       # fc1 weight / bias
            wspec((mlp, D)), wspec((1, D)),                         # fc2 weight / bias
        ]

        out = pl.pallas_call(
            kernel,
            out_shape=jax.ShapeDtypeStruct((B, N, D), x.dtype),
            grid_spec=pltpu.PrefetchScalarGridSpec(
                num_scalar_prefetch=0,
                grid=(B, n_tiles),
                in_specs=in_specs,
                out_specs=out_spec,
                scratch_shapes=[
                    pltpu.VMEM((H, N, hd), bf16),    # K  (per batch element)
                    pltpu.VMEM((H, N, hd), bf16),    # V  (per batch element)
                ],
            ),
            compiler_params=pltpu.CompilerParams(
                dimension_semantics=("parallel", "arbitrary"),
                vmem_limit_bytes=vmem_limit),
            cost_estimate=cost,
        )(*args)
        return jax.block_until_ready(out)

    # Prefer single-buffered grid-invariant weights; fall back to default
    # double-buffering (with a recomputed VMEM limit) if this build rejects it.
    try:
        return run(True)
    except Exception:
        return run(False)


# ------------------------- pure-JAX f32 reference (for checking) -------------------------
def reference_forward(x, params, num_heads):
    B, N, D = x.shape
    hd = D // num_heads

    def ln(y, g, b):
        mean = jnp.mean(y, axis=-1, keepdims=True)
        var = jnp.sum((y - mean) ** 2, axis=-1, keepdims=True) / (D - 1)
        return g * (y - mean) / (jnp.sqrt(var) + EPS) + b

    h = ln(x, params["g1"], params["b1"])
    q = (h @ params["wq"]).reshape(B, N, num_heads, hd).transpose(0, 2, 1, 3)
    k = (h @ params["wk"]).reshape(B, N, num_heads, hd).transpose(0, 2, 1, 3)
    v = (h @ params["wv"]).reshape(B, N, num_heads, hd).transpose(0, 2, 1, 3)
    s = jnp.einsum("bhnd,bhmd->bhnm", q, k) / math.sqrt(hd)
    p = jax.nn.softmax(s, axis=-1)
    a = jnp.einsum("bhnm,bhmd->bhnd", p, v).transpose(0, 2, 1, 3).reshape(B, N, D)
    x = x + a @ params["wo"]

    h2 = ln(x, params["g2"], params["b2"])
    f = jax.nn.gelu(h2 @ params["w1"] + params["bf1"], approximate=False)
    return x + f @ params["w2"] + params["bf2"]


def init_params(key, D, num_heads, mlp):
    ks = jax.random.split(key, 8)
    s_d = 1.0 / math.sqrt(D)
    s_m = 1.0 / math.sqrt(mlp)
    return {
        "g1": jnp.ones((1, D), jnp.float32),
        "b1": jnp.zeros((1, D), jnp.float32),
        "wq": jax.random.normal(ks[0], (D, D), jnp.float32) * s_d,
        "wk": jax.random.normal(ks[1], (D, D), jnp.float32) * s_d,
        "wv": jax.random.normal(ks[2], (D, D), jnp.float32) * s_d,
        "wo": jax.random.normal(ks[3], (D, D), jnp.float32) * s_d,
        "g2": jnp.ones((1, D), jnp.float32),
        "b2": jnp.zeros((1, D), jnp.float32),
        "w1": jax.random.normal(ks[4], (D, mlp), jnp.float32) * s_d,
        "bf1": jax.random.normal(ks[5], (1, mlp), jnp.float32) * 0.01,
        "w2": jax.random.normal(ks[6], (mlp, D), jnp.float32) * s_m,
        "bf2": jax.random.normal(ks[7], (1, D), jnp.float32) * 0.01,
    }


if __name__ == "__main__":
    B, N, D = 2, 8, 32          # batch, seq, embed
    num_heads, mlp_dim = 4, 64

    key = jax.random.PRNGKey(0)
    kx, kp = jax.random.split(key)
    x = jax.random.normal(kx, (B, N, D), jnp.float32)
    params = init_params(kp, D, num_heads, mlp_dim)

    out = transformer_encoder_layer(x, params, num_heads)
    out = jax.block_until_ready(out)

    ref = jax.block_until_ready(reference_forward(x, params, num_heads))
    # bf16 MXU compute (f32 accumulation) vs f32 reference -> bf16-level tolerance.
    np.testing.assert_allclose(np.asarray(out), np.asarray(ref), rtol=2e-2, atol=2e-2)

    print("KERNEL_OK")
</pallas_src>

<mosaic_0001>
module attributes {stable_mosaic.version = 11 : i64} {
  func.func @transformer_layer_kernel(%arg0: i32, %arg1: i32, %arg2: memref<1x8x32xf32, #tpu.memory_space<vmem>>, %arg3: memref<1x32xf32, #tpu.memory_space<vmem>>, %arg4: memref<1x32xf32, #tpu.memory_space<vmem>>, %arg5: memref<32x32xbf16, #tpu.memory_space<vmem>>, %arg6: memref<32x32xbf16, #tpu.memory_space<vmem>>, %arg7: memref<32x32xbf16, #tpu.memory_space<vmem>>, %arg8: memref<32x32xbf16, #tpu.memory_space<vmem>>, %arg9: memref<1x32xf32, #tpu.memory_space<vmem>>, %arg10: memref<1x32xf32, #tpu.memory_space<vmem>>, %arg11: memref<32x64xbf16, #tpu.memory_space<vmem>>, %arg12: memref<1x64xf32, #tpu.memory_space<vmem>>, %arg13: memref<64x32xbf16, #tpu.memory_space<vmem>>, %arg14: memref<1x32xf32, #tpu.memory_space<vmem>>, %arg15: memref<1x8x32xf32, #tpu.memory_space<vmem>>, %arg16: memref<4x8x8xbf16, #tpu.memory_space<vmem>>, %arg17: memref<4x8x8xbf16, #tpu.memory_space<vmem>>) attributes {dimension_semantics = [#tpu.dimension_semantics<parallel>, #tpu.dimension_semantics<arbitrary>], iteration_bounds = array<i64: 2, 1>, scalar_prefetch = 0 : i64, scratch_operands = 2 : i64, tpu.core_type = #tpu.core_type<tc>, window_params = [{transform_indices = @transform_0, window_bounds = array<i64: 1, 8, 32>}, {pipeline_mode = #tpu.pipeline_mode<synchronous>, transform_indices = @transform_1, window_bounds = array<i64: 1, 32>}, {pipeline_mode = #tpu.pipeline_mode<synchronous>, transform_indices = @transform_2, window_bounds = array<i64: 1, 32>}, {pipeline_mode = #tpu.pipeline_mode<synchronous>, transform_indices = @transform_3, window_bounds = array<i64: 32, 32>}, {pipeline_mode = #tpu.pipeline_mode<synchronous>, transform_indices = @transform_4, window_bounds = array<i64: 32, 32>}, {pipeline_mode = #tpu.pipeline_mode<synchronous>, transform_indices = @transform_5, window_bounds = array<i64: 32, 32>}, {pipeline_mode = #tpu.pipeline_mode<synchronous>, transform_indices = @transform_6, window_bounds = array<i64: 32, 32>}, {pipeline_mode = #tpu.pipeline_mode<synchronous>, transform_indices = @transform_7, window_bounds = array<i64: 1, 32>}, {pipeline_mode = #tpu.pipeline_mode<synchronous>, transform_indices = @transform_8, window_bounds = array<i64: 1, 32>}, {pipeline_mode = #tpu.pipeline_mode<synchronous>, transform_indices = @transform_9, window_bounds = array<i64: 32, 64>}, {pipeline_mode = #tpu.pipeline_mode<synchronous>, transform_indices = @transform_10, window_bounds = array<i64: 1, 64>}, {pipeline_mode = #tpu.pipeline_mode<synchronous>, transform_indices = @transform_11, window_bounds = array<i64: 64, 32>}, {pipeline_mode = #tpu.pipeline_mode<synchronous>, transform_indices = @transform_12, window_bounds = array<i64: 1, 32>}, {transform_indices = @transform_13, window_bounds = array<i64: 1, 8, 32>}]} {
    %c0 = arith.constant 0 : index
    %c0_0 = arith.constant 0 : index
    %0 = vector.load %arg3[%c0, %c0_0] : memref<1x32xf32, #tpu.memory_space<vmem>>, vector<1x32xf32>
    %c0_1 = arith.constant 0 : index
    %c0_2 = arith.constant 0 : index
    %1 = vector.load %arg4[%c0_1, %c0_2] : memref<1x32xf32, #tpu.memory_space<vmem>>, vector<1x32xf32>
    %c0_i32 = arith.constant 0 : i32
    %2 = arith.cmpi eq, %arg1, %c0_i32 : i32
    %3 = arith.extui %2 : i1 to i32
    %c0_i32_3 = arith.constant 0 : i32
    %4 = arith.cmpi ne, %3, %c0_i32_3 : i32
    scf.if %4 {
      %c0_91 = arith.constant 0 : index
      %c0_92 = arith.constant 0 : index
      %c0_93 = arith.constant 0 : index
      %197 = vector.load %arg2[%c0_91, %c0_92, %c0_93] : memref<1x8x32xf32, #tpu.memory_space<vmem>>, vector<1x8x32xf32>
      %198 = vector.shape_cast %197 : vector<1x8x32xf32> to vector<8x32xf32>
      %cst_94 = arith.constant dense<0.000000e+00> : vector<8xf32>
      %199 = vector.multi_reduction <add>, %198, %cst_94 [1] : vector<8x32xf32> to vector<8xf32>
      %200 = vector.shape_cast %199 : vector<8xf32> to vector<8x1xf32>
      %cst_95 = arith.constant 3.200000e+01 : f32
      %201 = vector.broadcast %cst_95 : f32 to vector<8x1xf32>
      %202 = arith.divf %200, %201 : vector<8x1xf32>
      %203 = vector.broadcast %202 : vector<8x1xf32> to vector<8x32xf32>
      %204 = arith.subf %198, %203 : vector<8x32xf32>
      %205 = arith.mulf %204, %204 : vector<8x32xf32>
      %cst_96 = arith.constant dense<0.000000e+00> : vector<8xf32>
      %206 = vector.multi_reduction <add>, %205, %cst_96 [1] : vector<8x32xf32> to vector<8xf32>
      %207 = vector.shape_cast %206 : vector<8xf32> to vector<8x1xf32>
      %cst_97 = arith.constant 0.0322580636 : f32
      %208 = vector.broadcast %cst_97 : f32 to vector<8x1xf32>
      %209 = arith.mulf %207, %208 : vector<8x1xf32>
      %210 = math.sqrt %209 : vector<8x1xf32>
      %cst_98 = arith.constant 9.99999997E-7 : f32
      %211 = vector.broadcast %cst_98 : f32 to vector<8x1xf32>
      %212 = arith.addf %210, %211 : vector<8x1xf32>
      %213 = tpu.reciprocal %212 {approx = true} : vector<8x1xf32> -> vector<8x1xf32>
      %214 = vector.broadcast %202 : vector<8x1xf32> to vector<8x32xf32>
      %215 = arith.subf %198, %214 : vector<8x32xf32>
      %216 = vector.broadcast %213 : vector<8x1xf32> to vector<8x32xf32>
      %217 = arith.mulf %215, %216 : vector<8x32xf32>
      %218 = vector.broadcast %0 : vector<1x32xf32> to vector<8x32xf32>
      %219 = arith.mulf %218, %217 : vector<8x32xf32>
      %220 = vector.broadcast %1 : vector<1x32xf32> to vector<8x32xf32>
      %221 = arith.addf %219, %220 : vector<8x32xf32>
      %222 = arith.truncf %221 : vector<8x32xf32> to vector<8x32xbf16>
      %c0_99 = arith.constant 0 : index
      %c0_100 = arith.constant 0 : index
      %223 = vector.load %arg6[%c0_99, %c0_100] : memref<32x32xbf16, #tpu.memory_space<vmem>>, vector<32x32xbf16>
      %cst_101 = arith.constant dense<0.000000e+00> : vector<8x32xf32>
      %224 = tpu.matmul %222, %223, %cst_101 {dimension_numbers = #tpu.dot_dimension_numbers<[1], [0], [0], [1], [0, 0, 1, 1], [], []>} : vector<8x32xbf16>, vector<32x32xbf16>, vector<8x32xf32> -> vector<8x32xf32>
      %225 = arith.truncf %224 : vector<8x32xf32> to vector<8x32xbf16>
      %c0_102 = arith.constant 0 : index
      %c0_103 = arith.constant 0 : index
      %226 = vector.load %arg7[%c0_102, %c0_103] : memref<32x32xbf16, #tpu.memory_space<vmem>>, vector<32x32xbf16>
      %cst_104 = arith.constant dense<0.000000e+00> : vector<8x32xf32>
      %227 = tpu.matmul %222, %226, %cst_104 {dimension_numbers = #tpu.dot_dimension_numbers<[1], [0], [0], [1], [0, 0, 1, 1], [], []>} : vector<8x32xbf16>, vector<32x32xbf16>, vector<8x32xf32> -> vector<8x32xf32>
      %228 = arith.truncf %227 : vector<8x32xf32> to vector<8x32xbf16>
      %229 = vector.extract_strided_slice %225 {offsets = [0, 0], sizes = [8, 8], strides = [1, 1]} : vector<8x32xbf16> to vector<8x8xbf16>
      %c0_105 = arith.constant 0 : index
      %c0_106 = arith.constant 0 : index
      %c0_107 = arith.constant 0 : index
      %230 = vector.load %arg16[%c0_105, %c0_106, %c0_107] : memref<4x8x8xbf16, #tpu.memory_space<vmem>>, vector<1x8x8xbf16>
      %231 = vector.shape_cast %230 : vector<1x8x8xbf16> to vector<8x8xbf16>
      %232 = vector.shape_cast %229 : vector<8x8xbf16> to vector<1x8x8xbf16>
      tpu.vector_store %arg16[%c0_105, %c0_106, %c0_107], %232 {strides = array<i32>} : memref<4x8x8xbf16, #tpu.memory_space<vmem>>, vector<1x8x8xbf16>,
      %233 = vector.extract_strided_slice %228 {offsets = [0, 0], sizes = [8, 8], strides = [1, 1]} : vector<8x32xbf16> to vector<8x8xbf16>
      %c0_108 = arith.constant 0 : index
      %c0_109 = arith.constant 0 : index
      %c0_110 = arith.constant 0 : index
      %234 = vector.load %arg17[%c0_108, %c0_109, %c0_110] : memref<4x8x8xbf16, #tpu.memory_space<vmem>>, vector<1x8x8xbf16>
      %235 = vector.shape_cast %234 : vector<1x8x8xbf16> to vector<8x8xbf16>
      %236 = vector.shape_cast %233 : vector<8x8xbf16> to vector<1x8x8xbf16>
      tpu.vector_store %arg17[%c0_108, %c0_109, %c0_110], %236 {strides = array<i32>} : memref<4x8x8xbf16, #tpu.memory_space<vmem>>, vector<1x8x8xbf16>,
      %237 = vector.extract_strided_slice %225 {offsets = [0, 8], sizes = [8, 8], strides = [1, 1]} : vector<8x32xbf16> to vector<8x8xbf16>
      %c1_111 = arith.constant 1 : index
      %c0_112 = arith.constant 0 : index
      %c0_113 = arith.constant 0 : index
      %238 = vector.load %arg16[%c1_111, %c0_112, %c0_113] : memref<4x8x8xbf16, #tpu.memory_space<vmem>>, vector<1x8x8xbf16>
      %239 = vector.shape_cast %238 : vector<1x8x8xbf16> to vector<8x8xbf16>
      %240 = vector.shape_cast %237 : vector<8x8xbf16> to vector<1x8x8xbf16>
      tpu.vector_store %arg16[%c1_111, %c0_112, %c0_113], %240 {strides = array<i32>} : memref<4x8x8xbf16, #tpu.memory_space<vmem>>, vector<1x8x8xbf16>,
      %241 = vector.extract_strided_slice %228 {offsets = [0, 8], sizes = [8, 8], strides = [1, 1]} : vector<8x32xbf16> to vector<8x8xbf16>
      %c1_114 = arith.constant 1 : index
      %c0_115 = arith.constant 0 : index
      %c0_116 = arith.constant 0 : index
      %242 = vector.load %arg17[%c1_114, %c0_115, %c0_116] : memref<4x8x8xbf16, #tpu.memory_space<vmem>>, vector<1x8x8xbf16>
      %243 = vector.shape_cast %242 : vector<1x8x8xbf16> to vector<8x8xbf16>
      %244 = vector.shape_cast %241 : vector<8x8xbf16> to vector<1x8x8xbf16>
      tpu.vector_store %arg17[%c1_114, %c0_115, %c0_116], %244 {strides = array<i32>} : memref<4x8x8xbf16, #tpu.memory_space<vmem>>, vector<1x8x8xbf16>,
      %245 = vector.extract_strided_slice %225 {offsets = [0, 16], sizes = [8, 8], strides = [1, 1]} : vector<8x32xbf16> to vector<8x8xbf16>
      %c2_117 = arith.constant 2 : index
      %c0_118 = arith.constant 0 : index
      %c0_119 = arith.constant 0 : index
      %246 = vector.load %arg16[%c2_117, %c0_118, %c0_119] : memref<4x8x8xbf16, #tpu.memory_space<vmem>>, vector<1x8x8xbf16>
      %247 = vector.shape_cast %246 : vector<1x8x8xbf16> to vector<8x8xbf16>
      %248 = vector.shape_cast %245 : vector<8x8xbf16> to vector<1x8x8xbf16>
      tpu.vector_store %arg16[%c2_117, %c0_118, %c0_119], %248 {strides = array<i32>} : memref<4x8x8xbf16, #tpu.memory_space<vmem>>, vector<1x8x8xbf16>,
      %249 = vector.extract_strided_slice %228 {offsets = [0, 16], sizes = [8, 8], strides = [1, 1]} : vector<8x32xbf16> to vector<8x8xbf16>
      %c2_120 = arith.constant 2 : index
      %c0_121 = arith.constant 0 : index
      %c0_122 = arith.constant 0 : index
      %250 = vector.load %arg17[%c2_120, %c0_121, %c0_122] : memref<4x8x8xbf16, #tpu.memory_space<vmem>>, vector<1x8x8xbf16>
      %251 = vector.shape_cast %250 : vector<1x8x8xbf16> to vector<8x8xbf16>
      %252 = vector.shape_cast %249 : vector<8x8xbf16> to vector<1x8x8xbf16>
      tpu.vector_store %arg17[%c2_120, %c0_121, %c0_122], %252 {strides = array<i32>} : memref<4x8x8xbf16, #tpu.memory_space<vmem>>, vector<1x8x8xbf16>,
      %253 = vector.extract_strided_slice %225 {offsets = [0, 24], sizes = [8, 8], strides = [1, 1]} : vector<8x32xbf16> to vector<8x8xbf16>
      %c3_123 = arith.constant 3 : index
      %c0_124 = arith.constant 0 : index
      %c0_125 = arith.constant 0 : index
      %254 = vector.load %arg16[%c3_123, %c0_124, %c0_125] : memref<4x8x8xbf16, #tpu.memory_space<vmem>>, vector<1x8x8xbf16>
      %255 = vector.shape_cast %254 : vector<1x8x8xbf16> to vector<8x8xbf16>
      %256 = vector.shape_cast %253 : vector<8x8xbf16> to vector<1x8x8xbf16>
      tpu.vector_store %arg16[%c3_123, %c0_124, %c0_125], %256 {strides = array<i32>} : memref<4x8x8xbf16, #tpu.memory_space<vmem>>, vector<1x8x8xbf16>,
      %257 = vector.extract_strided_slice %228 {offsets = [0, 24], sizes = [8, 8], strides = [1, 1]} : vector<8x32xbf16> to vector<8x8xbf16>
      %c3_126 = arith.constant 3 : index
      %c0_127 = arith.constant 0 : index
      %c0_128 = arith.constant 0 : index
      %258 = vector.load %arg17[%c3_126, %c0_127, %c0_128] : memref<4x8x8xbf16, #tpu.memory_space<vmem>>, vector<1x8x8xbf16>
      %259 = vector.shape_cast %258 : vector<1x8x8xbf16> to vector<8x8xbf16>
      %260 = vector.shape_cast %257 : vector<8x8xbf16> to vector<1x8x8xbf16>
      tpu.vector_store %arg17[%c3_126, %c0_127, %c0_128], %260 {strides = array<i32>} : memref<4x8x8xbf16, #tpu.memory_space<vmem>>, vector<1x8x8xbf16>,
    } else {
    }
    %c8_i32 = arith.constant 8 : i32
    %5 = arith.muli %arg1, %c8_i32 : i32
    %6 = tpu.assume_multiple %5, 8 : i32
    %c0_4 = arith.constant 0 : index
    %7 = arith.index_cast %6 : i32 to index
    %c0_5 = arith.constant 0 : index
    %8 = vector.load %arg2[%c0_4, %7, %c0_5] : memref<1x8x32xf32, #tpu.memory_space<vmem>>, vector<1x8x32xf32>
    %9 = vector.shape_cast %8 : vector<1x8x32xf32> to vector<8x32xf32>
    %cst = arith.constant dense<0.000000e+00> : vector<8xf32>
    %10 = vector.multi_reduction <add>, %9, %cst [1] : vector<8x32xf32> to vector<8xf32>
    %11 = vector.shape_cast %10 : vector<8xf32> to vector<8x1xf32>
    %cst_6 = arith.constant 3.200000e+01 : f32
    %12 = vector.broadcast %cst_6 : f32 to vector<8x1xf32>
    %13 = arith.divf %11, %12 : vector<8x1xf32>
    %14 = vector.broadcast %13 : vector<8x1xf32> to vector<8x32xf32>
    %15 = arith.subf %9, %14 : vector<8x32xf32>
    %16 = arith.mulf %15, %15 : vector<8x32xf32>
    %cst_7 = arith.constant dense<0.000000e+00> : vector<8xf32>
    %17 = vector.multi_reduction <add>, %16, %cst_7 [1] : vector<8x32xf32> to vector<8xf32>
    %18 = vector.shape_cast %17 : vector<8xf32> to vector<8x1xf32>
    %cst_8 = arith.constant 0.0322580636 : f32
    %19 = vector.broadcast %cst_8 : f32 to vector<8x1xf32>
    %20 = arith.mulf %18, %19 : vector<8x1xf32>
    %21 = math.sqrt %20 : vector<8x1xf32>
    %cst_9 = arith.constant 9.99999997E-7 : f32
    %22 = vector.broadcast %cst_9 : f32 to vector<8x1xf32>
    %23 = arith.addf %21, %22 : vector<8x1xf32>
    %24 = tpu.reciprocal %23 {approx = true} : vector<8x1xf32> -> vector<8x1xf32>
    %25 = vector.broadcast %13 : vector<8x1xf32> to vector<8x32xf32>
    %26 = arith.subf %9, %25 : vector<8x32xf32>
    %27 = vector.broadcast %24 : vector<8x1xf32> to vector<8x32xf32>
    %28 = arith.mulf %26, %27 : vector<8x32xf32>
    %29 = vector.broadcast %0 : vector<1x32xf32> to vector<8x32xf32>
    %30 = arith.mulf %29, %28 : vector<8x32xf32>
    %31 = vector.broadcast %1 : vector<1x32xf32> to vector<8x32xf32>
    %32 = arith.addf %30, %31 : vector<8x32xf32>
    %33 = arith.truncf %32 : vector<8x32xf32> to vector<8x32xbf16>
    %c0_10 = arith.constant 0 : index
    %c0_11 = arith.constant 0 : index
    %34 = vector.load %arg5[%c0_10, %c0_11] : memref<32x32xbf16, #tpu.memory_space<vmem>>, vector<32x32xbf16>
    %cst_12 = arith.constant dense<0.000000e+00> : vector<8x32xf32>
    %35 = tpu.matmul %33, %34, %cst_12 {dimension_numbers = #tpu.dot_dimension_numbers<[1], [0], [0], [1], [0, 0, 1, 1], [], []>} : vector<8x32xbf16>, vector<32x32xbf16>, vector<8x32xf32> -> vector<8x32xf32>
    %36 = arith.truncf %35 : vector<8x32xf32> to vector<8x32xbf16>
    %37 = vector.extract_strided_slice %36 {offsets = [0, 0], sizes = [8, 8], strides = [1, 1]} : vector<8x32xbf16> to vector<8x8xbf16>
    %c0_13 = arith.constant 0 : index
    %c0_14 = arith.constant 0 : index
    %c0_15 = arith.constant 0 : index
    %38 = vector.load %arg16[%c0_13, %c0_14, %c0_15] : memref<4x8x8xbf16, #tpu.memory_space<vmem>>, vector<1x8x8xbf16>
    %39 = vector.shape_cast %38 : vector<1x8x8xbf16> to vector<8x8xbf16>
    %cst_16 = arith.constant dense<0.000000e+00> : vector<8x8xf32>
    %40 = tpu.matmul %37, %39, %cst_16 {dimension_numbers = #tpu.dot_dimension_numbers<[1], [1], [0], [0], [0, 0, 1, 0], [], []>} : vector<8x8xbf16>, vector<8x8xbf16>, vector<8x8xf32> -> vector<8x8xf32>
    %cst_17 = arith.constant dense<0xFF800000> : vector<8xf32>
    %41 = vector.multi_reduction <maximumf>, %40, %cst_17 [1] : vector<8x8xf32> to vector<8xf32>
    %42 = vector.shape_cast %41 : vector<8xf32> to vector<8x1xf32>
    %43 = vector.broadcast %42 : vector<8x1xf32> to vector<8x8xf32>
    %44 = arith.subf %40, %43 : vector<8x8xf32>
    %45 = math.exp %44 : vector<8x8xf32>
    %cst_18 = arith.constant dense<0.000000e+00> : vector<8xf32>
    %46 = vector.multi_reduction <add>, %45, %cst_18 [1] : vector<8x8xf32> to vector<8xf32>
    %47 = vector.shape_cast %46 : vector<8xf32> to vector<8x1xf32>
    %48 = arith.truncf %45 : vector<8x8xf32> to vector<8x8xbf16>
    %c0_19 = arith.constant 0 : index
    %c0_20 = arith.constant 0 : index
    %c0_21 = arith.constant 0 : index
    %49 = vector.load %arg17[%c0_19, %c0_20, %c0_21] : memref<4x8x8xbf16, #tpu.memory_space<vmem>>, vector<1x8x8xbf16>
    %50 = vector.shape_cast %49 : vector<1x8x8xbf16> to vector<8x8xbf16>
    %cst_22 = arith.constant dense<0.000000e+00> : vector<8x8xf32>
    %51 = tpu.matmul %48, %50, %cst_22 {dimension_numbers = #tpu.dot_dimension_numbers<[1], [0], [0], [1], [0, 0, 1, 1], [], []>} : vector<8x8xbf16>, vector<8x8xbf16>, vector<8x8xf32> -> vector<8x8xf32>
    %52 = tpu.reciprocal %47 {approx = true} : vector<8x1xf32> -> vector<8x1xf32>
    %53 = vector.broadcast %52 : vector<8x1xf32> to vector<8x8xf32>
    %54 = arith.mulf %51, %53 : vector<8x8xf32>
    %55 = vector.extract_strided_slice %36 {offsets = [0, 8], sizes = [8, 8], strides = [1, 1]} : vector<8x32xbf16> to vector<8x8xbf16>
    %c1 = arith.constant 1 : index
    %c0_23 = arith.constant 0 : index
    %c0_24 = arith.constant 0 : index
    %56 = vector.load %arg16[%c1, %c0_23, %c0_24] : memref<4x8x8xbf16, #tpu.memory_space<vmem>>, vector<1x8x8xbf16>
    %57 = vector.shape_cast %56 : vector<1x8x8xbf16> to vector<8x8xbf16>
    %cst_25 = arith.constant dense<0.000000e+00> : vector<8x8xf32>
    %58 = tpu.matmul %55, %57, %cst_25 {dimension_numbers = #tpu.dot_dimension_numbers<[1], [1], [0], [0], [0, 0, 1, 0], [], []>} : vector<8x8xbf16>, vector<8x8xbf16>, vector<8x8xf32> -> vector<8x8xf32>
    %cst_26 = arith.constant dense<0xFF800000> : vector<8xf32>
    %59 = vector.multi_reduction <maximumf>, %58, %cst_26 [1] : vector<8x8xf32> to vector<8xf32>
    %60 = vector.shape_cast %59 : vector<8xf32> to vector<8x1xf32>
    %61 = vector.broadcast %60 : vector<8x1xf32> to vector<8x8xf32>
    %62 = arith.subf %58, %61 : vector<8x8xf32>
    %63 = math.exp %62 : vector<8x8xf32>
    %cst_27 = arith.constant dense<0.000000e+00> : vector<8xf32>
    %64 = vector.multi_reduction <add>, %63, %cst_27 [1] : vector<8x8xf32> to vector<8xf32>
    %65 = vector.shape_cast %64 : vector<8xf32> to vector<8x1xf32>
    %66 = arith.truncf %63 : vector<8x8xf32> to vector<8x8xbf16>
    %c1_28 = arith.constant 1 : index
    %c0_29 = arith.constant 0 : index
    %c0_30 = arith.constant 0 : index
    %67 = vector.load %arg17[%c1_28, %c0_29, %c0_30] : memref<4x8x8xbf16, #tpu.memory_space<vmem>>, vector<1x8x8xbf16>
    %68 = vector.shape_cast %67 : vector<1x8x8xbf16> to vector<8x8xbf16>
    %cst_31 = arith.constant dense<0.000000e+00> : vector<8x8xf32>
    %69 = tpu.matmul %66, %68, %cst_31 {dimension_numbers = #tpu.dot_dimension_numbers<[1], [0], [0], [1], [0, 0, 1, 1], [], []>} : vector<8x8xbf16>, vector<8x8xbf16>, vector<8x8xf32> -> vector<8x8xf32>
    %70 = tpu.reciprocal %65 {approx = true} : vector<8x1xf32> -> vector<8x1xf32>
    %71 = vector.broadcast %70 : vector<8x1xf32> to vector<8x8xf32>
    %72 = arith.mulf %69, %71 : vector<8x8xf32>
    %73 = vector.extract_strided_slice %36 {offsets = [0, 16], sizes = [8, 8], strides = [1, 1]} : vector<8x32xbf16> to vector<8x8xbf16>
    %c2 = arith.constant 2 : index
    %c0_32 = arith.constant 0 : index
    %c0_33 = arith.constant 0 : index
    %74 = vector.load %arg16[%c2, %c0_32, %c0_33] : memref<4x8x8xbf16, #tpu.memory_space<vmem>>, vector<1x8x8xbf16>
    %75 = vector.shape_cast %74 : vector<1x8x8xbf16> to vector<8x8xbf16>
    %cst_34 = arith.constant dense<0.000000e+00> : vector<8x8xf32>
    %76 = tpu.matmul %73, %75, %cst_34 {dimension_numbers = #tpu.dot_dimension_numbers<[1], [1], [0], [0], [0, 0, 1, 0], [], []>} : vector<8x8xbf16>, vector<8x8xbf16>, vector<8x8xf32> -> vector<8x8xf32>
    %cst_35 = arith.constant dense<0xFF800000> : vector<8xf32>
    %77 = vector.multi_reduction <maximumf>, %76, %cst_35 [1] : vector<8x8xf32> to vector<8xf32>
    %78 = vector.shape_cast %77 : vector<8xf32> to vector<8x1xf32>
    %79 = vector.broadcast %78 : vector<8x1xf32> to vector<8x8xf32>
    %80 = arith.subf %76, %79 : vector<8x8xf32>
    %81 = math.exp %80 : vector<8x8xf32>
    %cst_36 = arith.constant dense<0.000000e+00> : vector<8xf32>
    %82 = vector.multi_reduction <add>, %81, %cst_36 [1] : vector<8x8xf32> to vector<8xf32>
    %83 = vector.shape_cast %82 : vector<8xf32> to vector<8x1xf32>
    %84 = arith.truncf %81 : vector<8x8xf32> to vector<8x8xbf16>
    %c2_37 = arith.constant 2 : index
    %c0_38 = arith.constant 0 : index
    %c0_39 = arith.constant 0 : index
    %85 = vector.load %arg17[%c2_37, %c0_38, %c0_39] : memref<4x8x8xbf16, #tpu.memory_space<vmem>>, vector<1x8x8xbf16>
    %86 = vector.shape_cast %85 : vector<1x8x8xbf16> to vector<8x8xbf16>
    %cst_40 = arith.constant dense<0.000000e+00> : vector<8x8xf32>
    %87 = tpu.matmul %84, %86, %cst_40 {dimension_numbers = #tpu.dot_dimension_numbers<[1], [0], [0], [1], [0, 0, 1, 1], [], []>} : vector<8x8xbf16>, vector<8x8xbf16>, vector<8x8xf32> -> vector<8x8xf32>
    %88 = tpu.reciprocal %83 {approx = true} : vector<8x1xf32> -> vector<8x1xf32>
    %89 = vector.broadcast %88 : vector<8x1xf32> to vector<8x8xf32>
    %90 = arith.mulf %87, %89 : vector<8x8xf32>
    %91 = vector.extract_strided_slice %36 {offsets = [0, 24], sizes = [8, 8], strides = [1, 1]} : vector<8x32xbf16> to vector<8x8xbf16>
    %c3 = arith.constant 3 : index
    %c0_41 = arith.constant 0 : index
    %c0_42 = arith.constant 0 : index
    %92 = vector.load %arg16[%c3, %c0_41, %c0_42] : memref<4x8x8xbf16, #tpu.memory_space<vmem>>, vector<1x8x8xbf16>
    %93 = vector.shape_cast %92 : vector<1x8x8xbf16> to vector<8x8xbf16>
    %cst_43 = arith.constant dense<0.000000e+00> : vector<8x8xf32>
    %94 = tpu.matmul %91, %93, %cst_43 {dimension_numbers = #tpu.dot_dimension_numbers<[1], [1], [0], [0], [0, 0, 1, 0], [], []>} : vector<8x8xbf16>, vector<8x8xbf16>, vector<8x8xf32> -> vector<8x8xf32>
    %cst_44 = arith.constant dense<0xFF800000> : vector<8xf32>
    %95 = vector.multi_reduction <maximumf>, %94, %cst_44 [1] : vector<8x8xf32> to vector<8xf32>
    %96 = vector.shape_cast %95 : vector<8xf32> to vector<8x1xf32>
    %97 = vector.broadcast %96 : vector<8x1xf32> to vector<8x8xf32>
    %98 = arith.subf %94, %97 : vector<8x8xf32>
    %99 = math.exp %98 : vector<8x8xf32>
    %cst_45 = arith.constant dense<0.000000e+00> : vector<8xf32>
    %100 = vector.multi_reduction <add>, %99, %cst_45 [1] : vector<8x8xf32> to vector<8xf32>
    %101 = vector.shape_cast %100 : vector<8xf32> to vector<8x1xf32>
    %102 = arith.truncf %99 : vector<8x8xf32> to vector<8x8xbf16>
    %c3_46 = arith.constant 3 : index
    %c0_47 = arith.constant 0 : index
    %c0_48 = arith.constant 0 : index
    %103 = vector.load %arg17[%c3_46, %c0_47, %c0_48] : memref<4x8x8xbf16, #tpu.memory_space<vmem>>, vector<1x8x8xbf16>
    %104 = vector.shape_cast %103 : vector<1x8x8xbf16> to vector<8x8xbf16>
    %cst_49 = arith.constant dense<0.000000e+00> : vector<8x8xf32>
    %105 = tpu.matmul %102, %104, %cst_49 {dimension_numbers = #tpu.dot_dimension_numbers<[1], [0], [0], [1], [0, 0, 1, 1], [], []>} : vector<8x8xbf16>, vector<8x8xbf16>, vector<8x8xf32> -> vector<8x8xf32>
    %106 = tpu.reciprocal %101 {approx = true} : vector<8x1xf32> -> vector<8x1xf32>
    %107 = vector.broadcast %106 : vector<8x1xf32> to vector<8x8xf32>
    %108 = arith.mulf %105, %107 : vector<8x8xf32>
    %109 = tpu.concatenate %54, %72, %90, %108 in 1 : vector<8x8xf32>, vector<8x8xf32>, vector<8x8xf32>, vector<8x8xf32> -> vector<8x32xf32>
    %110 = arith.truncf %109 : vector<8x32xf32> to vector<8x32xbf16>
    %c0_50 = arith.constant 0 : index
    %c0_51 = arith.constant 0 : index
    %111 = vector.load %arg8[%c0_50, %c0_51] : memref<32x32xbf16, #tpu.memory_space<vmem>>, vector<32x32xbf16>
    %cst_52 = arith.constant dense<0.000000e+00> : vector<8x32xf32>
    %112 = tpu.matmul %110, %111, %cst_52 {dimension_numbers = #tpu.dot_dimension_numbers<[1], [0], [0], [1], [0, 0, 1, 1], [], []>} : vector<8x32xbf16>, vector<32x32xbf16>, vector<8x32xf32> -> vector<8x32xf32>
    %113 = arith.addf %9, %112 : vector<8x32xf32>
    %c0_53 = arith.constant 0 : index
    %c0_54 = arith.constant 0 : index
    %114 = vector.load %arg9[%c0_53, %c0_54] : memref<1x32xf32, #tpu.memory_space<vmem>>, vector<1x32xf32>
    %c0_55 = arith.constant 0 : index
    %c0_56 = arith.constant 0 : index
    %115 = vector.load %arg10[%c0_55, %c0_56] : memref<1x32xf32, #tpu.memory_space<vmem>>, vector<1x32xf32>
    %cst_57 = arith.constant dense<0.000000e+00> : vector<8xf32>
    %116 = vector.multi_reduction <add>, %113, %cst_57 [1] : vector<8x32xf32> to vector<8xf32>
    %117 = vector.shape_cast %116 : vector<8xf32> to vector<8x1xf32>
    %cst_58 = arith.constant 3.200000e+01 : f32
    %118 = vector.broadcast %cst_58 : f32 to vector<8x1xf32>
    %119 = arith.divf %117, %118 : vector<8x1xf32>
    %120 = vector.broadcast %119 : vector<8x1xf32> to vector<8x32xf32>
    %121 = arith.subf %113, %120 : vector<8x32xf32>
    %122 = arith.mulf %121, %121 : vector<8x32xf32>
    %cst_59 = arith.constant dense<0.000000e+00> : vector<8xf32>
    %123 = vector.multi_reduction <add>, %122, %cst_59 [1] : vector<8x32xf32> to vector<8xf32>
    %124 = vector.shape_cast %123 : vector<8xf32> to vector<8x1xf32>
    %cst_60 = arith.constant 0.0322580636 : f32
    %125 = vector.broadcast %cst_60 : f32 to vector<8x1xf32>
    %126 = arith.mulf %124, %125 : vector<8x1xf32>
    %127 = math.sqrt %126 : vector<8x1xf32>
    %cst_61 = arith.constant 9.99999997E-7 : f32
    %128 = vector.broadcast %cst_61 : f32 to vector<8x1xf32>
    %129 = arith.addf %127, %128 : vector<8x1xf32>
    %130 = tpu.reciprocal %129 {approx = true} : vector<8x1xf32> -> vector<8x1xf32>
    %131 = vector.broadcast %119 : vector<8x1xf32> to vector<8x32xf32>
    %132 = arith.subf %113, %131 : vector<8x32xf32>
    %133 = vector.broadcast %130 : vector<8x1xf32> to vector<8x32xf32>
    %134 = arith.mulf %132, %133 : vector<8x32xf32>
    %135 = vector.broadcast %114 : vector<1x32xf32> to vector<8x32xf32>
    %136 = arith.mulf %135, %134 : vector<8x32xf32>
    %137 = vector.broadcast %115 : vector<1x32xf32> to vector<8x32xf32>
    %138 = arith.addf %136, %137 : vector<8x32xf32>
    %139 = arith.truncf %138 : vector<8x32xf32> to vector<8x32xbf16>
    %cst_62 = arith.constant 0.000000e+00 : f32
    %140 = vector.broadcast %cst_62 : f32 to vector<8x32xf32>
    %c0_63 = arith.constant 0 : index
    %c0_64 = arith.constant 0 : index
    %141 = vector.load %arg11[%c0_63, %c0_64] : memref<32x64xbf16, #tpu.memory_space<vmem>>, vector<32x64xbf16>
    %cst_65 = arith.constant dense<0.000000e+00> : vector<8x64xf32>
    %142 = tpu.matmul %139, %141, %cst_65 {dimension_numbers = #tpu.dot_dimension_numbers<[1], [0], [0], [1], [0, 0, 1, 1], [], []>} : vector<8x32xbf16>, vector<32x64xbf16>, vector<8x64xf32> -> vector<8x64xf32>
    %c0_66 = arith.constant 0 : index
    %c0_67 = arith.constant 0 : index
    %143 = vector.load %arg12[%c0_66, %c0_67] : memref<1x64xf32, #tpu.memory_space<vmem>>, vector<1x64xf32>
    %144 = vector.broadcast %143 : vector<1x64xf32> to vector<8x64xf32>
    %145 = arith.addf %142, %144 : vector<8x64xf32>
    %cst_68 = arith.constant 5.000000e-01 : f32
    %146 = vector.broadcast %cst_68 : f32 to vector<8x64xf32>
    %147 = arith.mulf %146, %145 : vector<8x64xf32>
    %cst_69 = arith.constant 0.707106769 : f32
    %148 = vector.broadcast %cst_69 : f32 to vector<8x64xf32>
    %149 = arith.mulf %145, %148 : vector<8x64xf32>
    %150 = math.absf %149 : vector<8x64xf32>
    %cst_70 = arith.constant 0.327591091 : f32
    %151 = vector.broadcast %cst_70 : f32 to vector<8x64xf32>
    %152 = arith.mulf %151, %150 : vector<8x64xf32>
    %cst_71 = arith.constant 1.000000e+00 : f32
    %153 = vector.broadcast %cst_71 : f32 to vector<8x64xf32>
    %154 = arith.addf %153, %152 : vector<8x64xf32>
    %cst_72 = arith.constant 1.000000e+00 : f32
    %155 = vector.broadcast %cst_72 : f32 to vector<8x64xf32>
    %156 = arith.divf %155, %154 : vector<8x64xf32>
    %cst_73 = arith.constant 1.06140542 : f32
    %157 = vector.broadcast %cst_73 : f32 to vector<8x64xf32>
    %158 = arith.mulf %157, %156 : vector<8x64xf32>
    %cst_74 = arith.constant -1.45315206 : f32
    %159 = vector.broadcast %cst_74 : f32 to vector<8x64xf32>
    %160 = arith.addf %158, %159 : vector<8x64xf32>
    %161 = arith.mulf %160, %156 : vector<8x64xf32>
    %cst_75 = arith.constant 1.42141378 : f32
    %162 = vector.broadcast %cst_75 : f32 to vector<8x64xf32>
    %163 = arith.addf %161, %162 : vector<8x64xf32>
    %164 = arith.mulf %163, %156 : vector<8x64xf32>
    %cst_76 = arith.constant -0.284496725 : f32
    %165 = vector.broadcast %cst_76 : f32 to vector<8x64xf32>
    %166 = arith.addf %164, %165 : vector<8x64xf32>
    %167 = arith.mulf %166, %156 : vector<8x64xf32>
    %cst_77 = arith.constant 0.254829586 : f32
    %168 = vector.broadcast %cst_77 : f32 to vector<8x64xf32>
    %169 = arith.addf %167, %168 : vector<8x64xf32>
    %170 = arith.mulf %169, %156 : vector<8x64xf32>
    %cst_78 = arith.constant 0.000000e+00 : f32
    %171 = vector.broadcast %cst_78 : f32 to vector<8x64xf32>
    %172 = arith.subf %171, %150 : vector<8x64xf32>
    %173 = arith.mulf %172, %150 : vector<8x64xf32>
    %174 = math.exp %173 : vector<8x64xf32>
    %175 = arith.mulf %170, %174 : vector<8x64xf32>
    %cst_79 = arith.constant 1.000000e+00 : f32
    %176 = vector.broadcast %cst_79 : f32 to vector<8x64xf32>
    %177 = arith.subf %176, %175 : vector<8x64xf32>
    %cst_80 = arith.constant 0.000000e+00 : f32
    %178 = vector.broadcast %cst_80 : f32 to vector<8x64xf32>
    %179 = arith.cmpf oge, %149, %178 : vector<8x64xf32>
    %cst_81 = arith.constant 0.000000e+00 : f32
    %180 = vector.broadcast %cst_81 : f32 to vector<8x64xf32>
    %181 = arith.subf %180, %177 : vector<8x64xf32>
    %182 = arith.select %179, %177, %181 : vector<8x64xi1>, vector<8x64xf32>
    %cst_82 = arith.constant 1.000000e+00 : f32
    %183 = vector.broadcast %cst_82 : f32 to vector<8x64xf32>
    %184 = arith.addf %183, %182 : vector<8x64xf32>
    %185 = arith.mulf %147, %184 : vector<8x64xf32>
    %186 = arith.truncf %185 : vector<8x64xf32> to vector<8x64xbf16>
    %c0_83 = arith.constant 0 : index
    %c0_84 = arith.constant 0 : index
    %187 = vector.load %arg13[%c0_83, %c0_84] : memref<64x32xbf16, #tpu.memory_space<vmem>>, vector<64x32xbf16>
    %cst_85 = arith.constant dense<0.000000e+00> : vector<8x32xf32>
    %188 = tpu.matmul %186, %187, %cst_85 {dimension_numbers = #tpu.dot_dimension_numbers<[1], [0], [0], [1], [0, 0, 1, 1], [], []>} : vector<8x64xbf16>, vector<64x32xbf16>, vector<8x32xf32> -> vector<8x32xf32>
    %189 = arith.addf %140, %188 : vector<8x32xf32>
    %190 = arith.addf %113, %189 : vector<8x32xf32>
    %c0_86 = arith.constant 0 : index
    %c0_87 = arith.constant 0 : index
    %191 = vector.load %arg14[%c0_86, %c0_87] : memref<1x32xf32, #tpu.memory_space<vmem>>, vector<1x32xf32>
    %192 = vector.broadcast %191 : vector<1x32xf32> to vector<8x32xf32>
    %193 = arith.addf %190, %192 : vector<8x32xf32>
    %c0_88 = arith.constant 0 : index
    %c0_89 = arith.constant 0 : index
    %c0_90 = arith.constant 0 : index
    %194 = vector.load %arg15[%c0_88, %c0_89, %c0_90] : memref<1x8x32xf32, #tpu.memory_space<vmem>>, vector<1x8x32xf32>
    %195 = vector.shape_cast %194 : vector<1x8x32xf32> to vector<8x32xf32>
    %196 = vector.shape_cast %193 : vector<8x32xf32> to vector<1x8x32xf32>
    tpu.vector_store %arg15[%c0_88, %c0_89, %c0_90], %196 {strides = array<i32>} : memref<1x8x32xf32, #tpu.memory_space<vmem>>, vector<1x8x32xf32>,
    return
  }
  func.func @transform_0(%arg0: i32, %arg1: i32) -> (i32, i32, i32) {
    %c0_i32 = arith.constant 0 : i32
    %c0_i32_0 = arith.constant 0 : i32
    %c0_i32_1 = arith.constant 0 : i32
    return %arg0, %c0_i32, %c0_i32_0 : i32, i32, i32
  }
  func.func @transform_1(%arg0: i32, %arg1: i32) -> (i32, i32) {
    %c0_i32 = arith.constant 0 : i32
    %c0_i32_0 = arith.constant 0 : i32
    %c0_i32_1 = arith.constant 0 : i32
    return %c0_i32, %c0_i32_0 : i32, i32
  }
  func.func @transform_2(%arg0: i32, %arg1: i32) -> (i32, i32) {
    %c0_i32 = arith.constant 0 : i32
    %c0_i32_0 = arith.constant 0 : i32
    %c0_i32_1 = arith.constant 0 : i32
    return %c0_i32, %c0_i32_0 : i32, i32
  }
  func.func @transform_3(%arg0: i32, %arg1: i32) -> (i32, i32) {
    %c0_i32 = arith.constant 0 : i32
    %c0_i32_0 = arith.constant 0 : i32
    %c0_i32_1 = arith.constant 0 : i32
    return %c0_i32, %c0_i32_0 : i32, i32
  }
  func.func @transform_4(%arg0: i32, %arg1: i32) -> (i32, i32) {
    %c0_i32 = arith.constant 0 : i32
    %c0_i32_0 = arith.constant 0 : i32
    %c0_i32_1 = arith.constant 0 : i32
    return %c0_i32, %c0_i32_0 : i32, i32
  }
  func.func @transform_5(%arg0: i32, %arg1: i32) -> (i32, i32) {
    %c0_i32 = arith.constant 0 : i32
    %c0_i32_0 = arith.constant 0 : i32
    %c0_i32_1 = arith.constant 0 : i32
    return %c0_i32, %c0_i32_0 : i32, i32
  }
  func.func @transform_6(%arg0: i32, %arg1: i32) -> (i32, i32) {
    %c0_i32 = arith.constant 0 : i32
    %c0_i32_0 = arith.constant 0 : i32
    %c0_i32_1 = arith.constant 0 : i32
    return %c0_i32, %c0_i32_0 : i32, i32
  }
  func.func @transform_7(%arg0: i32, %arg1: i32) -> (i32, i32) {
    %c0_i32 = arith.constant 0 : i32
    %c0_i32_0 = arith.constant 0 : i32
    %c0_i32_1 = arith.constant 0 : i32
    return %c0_i32, %c0_i32_0 : i32, i32
  }
  func.func @transform_8(%arg0: i32, %arg1: i32) -> (i32, i32) {
    %c0_i32 = arith.constant 0 : i32
    %c0_i32_0 = arith.constant 0 : i32
    %c0_i32_1 = arith.constant 0 : i32
    return %c0_i32, %c0_i32_0 : i32, i32
  }
  func.func @transform_9(%arg0: i32, %arg1: i32) -> (i32, i32) {
    %c0_i32 = arith.constant 0 : i32
    %c0_i32_0 = arith.constant 0 : i32
    %c0_i32_1 = arith.constant 0 : i32
    return %c0_i32, %c0_i32_0 : i32, i32
  }
  func.func @transform_10(%arg0: i32, %arg1: i32) -> (i32, i32) {
    %c0_i32 = arith.constant 0 : i32
    %c0_i32_0 = arith.constant 0 : i32
    %c0_i32_1 = arith.constant 0 : i32
    return %c0_i32, %c0_i32_0 : i32, i32
  }
  func.func @transform_11(%arg0: i32, %arg1: i32) -> (i32, i32) {
    %c0_i32 = arith.constant 0 : i32
    %c0_i32_0 = arith.constant 0 : i32
    %c0_i32_1 = arith.constant 0 : i32
    return %c0_i32, %c0_i32_0 : i32, i32
  }
  func.func @transform_12(%arg0: i32, %arg1: i32) -> (i32, i32) {
    %c0_i32 = arith.constant 0 : i32
    %c0_i32_0 = arith.constant 0 : i32
    %c0_i32_1 = arith.constant 0 : i32
    return %c0_i32, %c0_i32_0 : i32, i32
  }
  func.func @transform_13(%arg0: i32, %arg1: i32) -> (i32, i32, i32) {
    %c0_i32 = arith.constant 0 : i32
    %c0_i32_0 = arith.constant 0 : i32
    return %arg0, %arg1, %c0_i32 : i32, i32, i32
  }
}

module attributes {stable_mosaic.version = 11 : i64} {
  func.func @transformer_layer_kernel(%arg0: i32, %arg1: i32, %arg2: memref<1x8x32xf32, #tpu.memory_space<vmem>>, %arg3: memref<1x32xf32, #tpu.memory_space<vmem>>, %arg4: memref<1x32xf32, #tpu.memory_space<vmem>>, %arg5: memref<32x32xbf16, #tpu.memory_space<vmem>>, %arg6: memref<32x32xbf16, #tpu.memory_space<vmem>>, %arg7: memref<32x32xbf16, #tpu.memory_space<vmem>>, %arg8: memref<32x32xbf16, #tpu.memory_space<vmem>>, %arg9: memref<1x32xf32, #tpu.memory_space<vmem>>, %arg10: memref<1x32xf32, #tpu.memory_space<vmem>>, %arg11: memref<32x64xbf16, #tpu.memory_space<vmem>>, %arg12: memref<1x64xf32, #tpu.memory_space<vmem>>, %arg13: memref<64x32xbf16, #tpu.memory_space<vmem>>, %arg14: memref<1x32xf32, #tpu.memory_space<vmem>>, %arg15: memref<1x8x32xf32, #tpu.memory_space<vmem>>, %arg16: memref<4x8x8xbf16, #tpu.memory_space<vmem>>, %arg17: memref<4x8x8xbf16, #tpu.memory_space<vmem>>) attributes {dimension_semantics = [#tpu.dimension_semantics<parallel>, #tpu.dimension_semantics<arbitrary>], iteration_bounds = array<i64: 2, 1>, scalar_prefetch = 0 : i64, scratch_operands = 2 : i64, tpu.core_type = #tpu.core_type<tc>, window_params = [{transform_indices = @transform_0, window_bounds = array<i64: 1, 8, 32>}, {pipeline_mode = #tpu.pipeline_mode<synchronous>, transform_indices = @transform_1, window_bounds = array<i64: 1, 32>}, {pipeline_mode = #tpu.pipeline_mode<synchronous>, transform_indices = @transform_2, window_bounds = array<i64: 1, 32>}, {pipeline_mode = #tpu.pipeline_mode<synchronous>, transform_indices = @transform_3, window_bounds = array<i64: 32, 32>}, {pipeline_mode = #tpu.pipeline_mode<synchronous>, transform_indices = @transform_4, window_bounds = array<i64: 32, 32>}, {pipeline_mode = #tpu.pipeline_mode<synchronous>, transform_indices = @transform_5, window_bounds = array<i64: 32, 32>}, {pipeline_mode = #tpu.pipeline_mode<synchronous>, transform_indices = @transform_6, window_bounds = array<i64: 32, 32>}, {pipeline_mode = #tpu.pipeline_mode<synchronous>, transform_indices = @transform_7, window_bounds = array<i64: 1, 32>}, {pipeline_mode = #tpu.pipeline_mode<synchronous>, transform_indices = @transform_8, window_bounds = array<i64: 1, 32>}, {pipeline_mode = #tpu.pipeline_mode<synchronous>, transform_indices = @transform_9, window_bounds = array<i64: 32, 64>}, {pipeline_mode = #tpu.pipeline_mode<synchronous>, transform_indices = @transform_10, window_bounds = array<i64: 1, 64>}, {pipeline_mode = #tpu.pipeline_mode<synchronous>, transform_indices = @transform_11, window_bounds = array<i64: 64, 32>}, {pipeline_mode = #tpu.pipeline_mode<synchronous>, transform_indices = @transform_12, window_bounds = array<i64: 1, 32>}, {transform_indices = @transform_13, window_bounds = array<i64: 1, 8, 32>}]} {
    %c0 = arith.constant 0 : index
    %c0_0 = arith.constant 0 : index
    %0 = vector.load %arg3[%c0, %c0_0] : memref<1x32xf32, #tpu.memory_space<vmem>>, vector<1x32xf32>
    %c0_1 = arith.constant 0 : index
    %c0_2 = arith.constant 0 : index
    %1 = vector.load %arg4[%c0_1, %c0_2] : memref<1x32xf32, #tpu.memory_space<vmem>>, vector<1x32xf32>
    %c0_i32 = arith.constant 0 : i32
    %2 = arith.cmpi eq, %arg1, %c0_i32 : i32
    %3 = arith.extui %2 : i1 to i32
    %c0_i32_3 = arith.constant 0 : i32
    %4 = arith.cmpi ne, %3, %c0_i32_3 : i32
    scf.if %4 {
      %c0_91 = arith.constant 0 : index
      %c0_92 = arith.constant 0 : index
      %c0_93 = arith.constant 0 : index
      %197 = vector.load %arg2[%c0_91, %c0_92, %c0_93] : memref<1x8x32xf32, #tpu.memory_space<vmem>>, vector<1x8x32xf32>
      %198 = vector.shape_cast %197 : vector<1x8x32xf32> to vector<8x32xf32>
      %cst_94 = arith.constant dense<0.000000e+00> : vector<8xf32>
      %199 = vector.multi_reduction <add>, %198, %cst_94 [1] : vector<8x32xf32> to vector<8xf32>
      %200 = vector.shape_cast %199 : vector<8xf32> to vector<8x1xf32>
      %cst_95 = arith.constant 3.200000e+01 : f32
      %201 = vector.broadcast %cst_95 : f32 to vector<8x1xf32>
      %202 = arith.divf %200, %201 : vector<8x1xf32>
      %203 = vector.broadcast %202 : vector<8x1xf32> to vector<8x32xf32>
      %204 = arith.subf %198, %203 : vector<8x32xf32>
      %205 = arith.mulf %204, %204 : vector<8x32xf32>
      %cst_96 = arith.constant dense<0.000000e+00> : vector<8xf32>
      %206 = vector.multi_reduction <add>, %205, %cst_96 [1] : vector<8x32xf32> to vector<8xf32>
      %207 = vector.shape_cast %206 : vector<8xf32> to vector<8x1xf32>
      %cst_97 = arith.constant 0.0322580636 : f32
      %208 = vector.broadcast %cst_97 : f32 to vector<8x1xf32>
      %209 = arith.mulf %207, %208 : vector<8x1xf32>
      %210 = math.sqrt %209 : vector<8x1xf32>
      %cst_98 = arith.constant 9.99999997E-7 : f32
      %211 = vector.broadcast %cst_98 : f32 to vector<8x1xf32>
      %212 = arith.addf %210, %211 : vector<8x1xf32>
      %213 = tpu.reciprocal %212 {approx = true} : vector<8x1xf32> -> vector<8x1xf32>
      %214 = vector.broadcast %202 : vector<8x1xf32> to vector<8x32xf32>
      %215 = arith.subf %198, %214 : vector<8x32xf32>
      %216 = vector.broadcast %213 : vector<8x1xf32> to vector<8x32xf32>
      %217 = arith.mulf %215, %216 : vector<8x32xf32>
      %218 = vector.broadcast %0 : vector<1x32xf32> to vector<8x32xf32>
      %219 = arith.mulf %218, %217 : vector<8x32xf32>
      %220 = vector.broadcast %1 : vector<1x32xf32> to vector<8x32xf32>
      %221 = arith.addf %219, %220 : vector<8x32xf32>
      %222 = arith.truncf %221 : vector<8x32xf32> to vector<8x32xbf16>
      %c0_99 = arith.constant 0 : index
      %c0_100 = arith.constant 0 : index
      %223 = vector.load %arg6[%c0_99, %c0_100] : memref<32x32xbf16, #tpu.memory_space<vmem>>, vector<32x32xbf16>
      %cst_101 = arith.constant dense<0.000000e+00> : vector<8x32xf32>
      %224 = tpu.matmul %222, %223, %cst_101 {dimension_numbers = #tpu.dot_dimension_numbers<[1], [0], [0], [1], [0, 0, 1, 1], [], []>} : vector<8x32xbf16>, vector<32x32xbf16>, vector<8x32xf32> -> vector<8x32xf32>
      %225 = arith.truncf %224 : vector<8x32xf32> to vector<8x32xbf16>
      %c0_102 = arith.constant 0 : index
      %c0_103 = arith.constant 0 : index
      %226 = vector.load %arg7[%c0_102, %c0_103] : memref<32x32xbf16, #tpu.memory_space<vmem>>, vector<32x32xbf16>
      %cst_104 = arith.constant dense<0.000000e+00> : vector<8x32xf32>
      %227 = tpu.matmul %222, %226, %cst_104 {dimension_numbers = #tpu.dot_dimension_numbers<[1], [0], [0], [1], [0, 0, 1, 1], [], []>} : vector<8x32xbf16>, vector<32x32xbf16>, vector<8x32xf32> -> vector<8x32xf32>
      %228 = arith.truncf %227 : vector<8x32xf32> to vector<8x32xbf16>
      %229 = vector.extract_strided_slice %225 {offsets = [0, 0], sizes = [8, 8], strides = [1, 1]} : vector<8x32xbf16> to vector<8x8xbf16>
      %c0_105 = arith.constant 0 : index
      %c0_106 = arith.constant 0 : index
      %c0_107 = arith.constant 0 : index
      %230 = vector.load %arg16[%c0_105, %c0_106, %c0_107] : memref<4x8x8xbf16, #tpu.memory_space<vmem>>, vector<1x8x8xbf16>
      %231 = vector.shape_cast %230 : vector<1x8x8xbf16> to vector<8x8xbf16>
      %232 = vector.shape_cast %229 : vector<8x8xbf16> to vector<1x8x8xbf16>
      tpu.vector_store %arg16[%c0_105, %c0_106, %c0_107], %232 {strides = array<i32>} : memref<4x8x8xbf16, #tpu.memory_space<vmem>>, vector<1x8x8xbf16>,
      %233 = vector.extract_strided_slice %228 {offsets = [0, 0], sizes = [8, 8], strides = [1, 1]} : vector<8x32xbf16> to vector<8x8xbf16>
      %c0_108 = arith.constant 0 : index
      %c0_109 = arith.constant 0 : index
      %c0_110 = arith.constant 0 : index
      %234 = vector.load %arg17[%c0_108, %c0_109, %c0_110] : memref<4x8x8xbf16, #tpu.memory_space<vmem>>, vector<1x8x8xbf16>
      %235 = vector.shape_cast %234 : vector<1x8x8xbf16> to vector<8x8xbf16>
      %236 = vector.shape_cast %233 : vector<8x8xbf16> to vector<1x8x8xbf16>
      tpu.vector_store %arg17[%c0_108, %c0_109, %c0_110], %236 {strides = array<i32>} : memref<4x8x8xbf16, #tpu.memory_space<vmem>>, vector<1x8x8xbf16>,
      %237 = vector.extract_strided_slice %225 {offsets = [0, 8], sizes = [8, 8], strides = [1, 1]} : vector<8x32xbf16> to vector<8x8xbf16>
      %c1_111 = arith.constant 1 : index
      %c0_112 = arith.constant 0 : index
      %c0_113 = arith.constant 0 : index
      %238 = vector.load %arg16[%c1_111, %c0_112, %c0_113] : memref<4x8x8xbf16, #tpu.memory_space<vmem>>, vector<1x8x8xbf16>
      %239 = vector.shape_cast %238 : vector<1x8x8xbf16> to vector<8x8xbf16>
      %240 = vector.shape_cast %237 : vector<8x8xbf16> to vector<1x8x8xbf16>
      tpu.vector_store %arg16[%c1_111, %c0_112, %c0_113], %240 {strides = array<i32>} : memref<4x8x8xbf16, #tpu.memory_space<vmem>>, vector<1x8x8xbf16>,
      %241 = vector.extract_strided_slice %228 {offsets = [0, 8], sizes = [8, 8], strides = [1, 1]} : vector<8x32xbf16> to vector<8x8xbf16>
      %c1_114 = arith.constant 1 : index
      %c0_115 = arith.constant 0 : index
      %c0_116 = arith.constant 0 : index
      %242 = vector.load %arg17[%c1_114, %c0_115, %c0_116] : memref<4x8x8xbf16, #tpu.memory_space<vmem>>, vector<1x8x8xbf16>
      %243 = vector.shape_cast %242 : vector<1x8x8xbf16> to vector<8x8xbf16>
      %244 = vector.shape_cast %241 : vector<8x8xbf16> to vector<1x8x8xbf16>
      tpu.vector_store %arg17[%c1_114, %c0_115, %c0_116], %244 {strides = array<i32>} : memref<4x8x8xbf16, #tpu.memory_space<vmem>>, vector<1x8x8xbf16>,
      %245 = vector.extract_strided_slice %225 {offsets = [0, 16], sizes = [8, 8], strides = [1, 1]} : vector<8x32xbf16> to vector<8x8xbf16>
      %c2_117 = arith.constant 2 : index
      %c0_118 = arith.constant 0 : index
      %c0_119 = arith.constant 0 : index
      %246 = vector.load %arg16[%c2_117, %c0_118, %c0_119] : memref<4x8x8xbf16, #tpu.memory_space<vmem>>, vector<1x8x8xbf16>
      %247 = vector.shape_cast %246 : vector<1x8x8xbf16> to vector<8x8xbf16>
      %248 = vector.shape_cast %245 : vector<8x8xbf16> to vector<1x8x8xbf16>
      tpu.vector_store %arg16[%c2_117, %c0_118, %c0_119], %248 {strides = array<i32>} : memref<4x8x8xbf16, #tpu.memory_space<vmem>>, vector<1x8x8xbf16>,
      %249 = vector.extract_strided_slice %228 {offsets = [0, 16], sizes = [8, 8], strides = [1, 1]} : vector<8x32xbf16> to vector<8x8xbf16>
      %c2_120 = arith.constant 2 : index
      %c0_121 = arith.constant 0 : index
      %c0_122 = arith.constant 0 : index
      %250 = vector.load %arg17[%c2_120, %c0_121, %c0_122] : memref<4x8x8xbf16, #tpu.memory_space<vmem>>, vector<1x8x8xbf16>
      %251 = vector.shape_cast %250 : vector<1x8x8xbf16> to vector<8x8xbf16>
      %252 = vector.shape_cast %249 : vector<8x8xbf16> to vector<1x8x8xbf16>
      tpu.vector_store %arg17[%c2_120, %c0_121, %c0_122], %252 {strides = array<i32>} : memref<4x8x8xbf16, #tpu.memory_space<vmem>>, vector<1x8x8xbf16>,
      %253 = vector.extract_strided_slice %225 {offsets = [0, 24], sizes = [8, 8], strides = [1, 1]} : vector<8x32xbf16> to vector<8x8xbf16>
      %c3_123 = arith.constant 3 : index
      %c0_124 = arith.constant 0 : index
      %c0_125 = arith.constant 0 : index
      %254 = vector.load %arg16[%c3_123, %c0_124, %c0_125] : memref<4x8x8xbf16, #tpu.memory_space<vmem>>, vector<1x8x8xbf16>
      %255 = vector.shape_cast %254 : vector<1x8x8xbf16> to vector<8x8xbf16>
      %256 = vector.shape_cast %253 : vector<8x8xbf16> to vector<1x8x8xbf16>
      tpu.vector_store %arg16[%c3_123, %c0_124, %c0_125], %256 {strides = array<i32>} : memref<4x8x8xbf16, #tpu.memory_space<vmem>>, vector<1x8x8xbf16>,
      %257 = vector.extract_strided_slice %228 {offsets = [0, 24], sizes = [8, 8], strides = [1, 1]} : vector<8x32xbf16> to vector<8x8xbf16>
      %c3_126 = arith.constant 3 : index
      %c0_127 = arith.constant 0 : index
      %c0_128 = arith.constant 0 : index
      %258 = vector.load %arg17[%c3_126, %c0_127, %c0_128] : memref<4x8x8xbf16, #tpu.memory_space<vmem>>, vector<1x8x8xbf16>
      %259 = vector.shape_cast %258 : vector<1x8x8xbf16> to vector<8x8xbf16>
      %260 = vector.shape_cast %257 : vector<8x8xbf16> to vector<1x8x8xbf16>
      tpu.vector_store %arg17[%c3_126, %c0_127, %c0_128], %260 {strides = array<i32>} : memref<4x8x8xbf16, #tpu.memory_space<vmem>>, vector<1x8x8xbf16>,
    } else {
    }
    %c8_i32 = arith.constant 8 : i32
    %5 = arith.muli %arg1, %c8_i32 : i32
    %6 = tpu.assume_multiple %5, 8 : i32
    %c0_4 = arith.constant 0 : index
    %7 = arith.index_cast %6 : i32 to index
    %c0_5 = arith.constant 0 : index
    %8 = vector.load %arg2[%c0_4, %7, %c0_5] : memref<1x8x32xf32, #tpu.memory_space<vmem>>, vector<1x8x32xf32>
    %9 = vector.shape_cast %8 : vector<1x8x32xf32> to vector<8x32xf32>
    %cst = arith.constant dense<0.000000e+00> : vector<8xf32>
    %10 = vector.multi_reduction <add>, %9, %cst [1] : vector<8x32xf32> to vector<8xf32>
    %11 = vector.shape_cast %10 : vector<8xf32> to vector<8x1xf32>
    %cst_6 = arith.constant 3.200000e+01 : f32
    %12 = vector.broadcast %cst_6 : f32 to vector<8x1xf32>
    %13 = arith.divf %11, %12 : vector<8x1xf32>
    %14 = vector.broadcast %13 : vector<8x1xf32> to vector<8x32xf32>
    %15 = arith.subf %9, %14 : vector<8x32xf32>
    %16 = arith.mulf %15, %15 : vector<8x32xf32>
    %cst_7 = arith.constant dense<0.000000e+00> : vector<8xf32>
    %17 = vector.multi_reduction <add>, %16, %cst_7 [1] : vector<8x32xf32> to vector<8xf32>
    %18 = vector.shape_cast %17 : vector<8xf32> to vector<8x1xf32>
    %cst_8 = arith.constant 0.0322580636 : f32
    %19 = vector.broadcast %cst_8 : f32 to vector<8x1xf32>
    %20 = arith.mulf %18, %19 : vector<8x1xf32>
    %21 = math.sqrt %20 : vector<8x1xf32>
    %cst_9 = arith.constant 9.99999997E-7 : f32
    %22 = vector.broadcast %cst_9 : f32 to vector<8x1xf32>
    %23 = arith.addf %21, %22 : vector<8x1xf32>
    %24 = tpu.reciprocal %23 {approx = true} : vector<8x1xf32> -> vector<8x1xf32>
    %25 = vector.broadcast %13 : vector<8x1xf32> to vector<8x32xf32>
    %26 = arith.subf %9, %25 : vector<8x32xf32>
    %27 = vector.broadcast %24 : vector<8x1xf32> to vector<8x32xf32>
    %28 = arith.mulf %26, %27 : vector<8x32xf32>
    %29 = vector.broadcast %0 : vector<1x32xf32> to vector<8x32xf32>
    %30 = arith.mulf %29, %28 : vector<8x32xf32>
    %31 = vector.broadcast %1 : vector<1x32xf32> to vector<8x32xf32>
    %32 = arith.addf %30, %31 : vector<8x32xf32>
    %33 = arith.truncf %32 : vector<8x32xf32> to vector<8x32xbf16>
    %c0_10 = arith.constant 0 : index
    %c0_11 = arith.constant 0 : index
    %34 = vector.load %arg5[%c0_10, %c0_11] : memref<32x32xbf16, #tpu.memory_space<vmem>>, vector<32x32xbf16>
    %cst_12 = arith.constant dense<0.000000e+00> : vector<8x32xf32>
    %35 = tpu.matmul %33, %34, %cst_12 {dimension_numbers = #tpu.dot_dimension_numbers<[1], [0], [0], [1], [0, 0, 1, 1], [], []>} : vector<8x32xbf16>, vector<32x32xbf16>, vector<8x32xf32> -> vector<8x32xf32>
    %36 = arith.truncf %35 : vector<8x32xf32> to vector<8x32xbf16>
    %37 = vector.extract_strided_slice %36 {offsets = [0, 0], sizes = [8, 8], strides = [1, 1]} : vector<8x32xbf16> to vector<8x8xbf16>
    %c0_13 = arith.constant 0 : index
    %c0_14 = arith.constant 0 : index
    %c0_15 = arith.constant 0 : index
    %38 = vector.load %arg16[%c0_13, %c0_14, %c0_15] : memref<4x8x8xbf16, #tpu.memory_space<vmem>>, vector<1x8x8xbf16>
    %39 = vector.shape_cast %38 : vector<1x8x8xbf16> to vector<8x8xbf16>
    %cst_16 = arith.constant dense<0.000000e+00> : vector<8x8xf32>
    %40 = tpu.matmul %37, %39, %cst_16 {dimension_numbers = #tpu.dot_dimension_numbers<[1], [1], [0], [0], [0, 0, 1, 0], [], []>} : vector<8x8xbf16>, vector<8x8xbf16>, vector<8x8xf32> -> vector<8x8xf32>
    %cst_17 = arith.constant dense<0xFF800000> : vector<8xf32>
    %41 = vector.multi_reduction <maximumf>, %40, %cst_17 [1] : vector<8x8xf32> to vector<8xf32>
    %42 = vector.shape_cast %41 : vector<8xf32> to vector<8x1xf32>
    %43 = vector.broadcast %42 : vector<8x1xf32> to vector<8x8xf32>
    %44 = arith.subf %40, %43 : vector<8x8xf32>
    %45 = math.exp %44 : vector<8x8xf32>
    %cst_18 = arith.constant dense<0.000000e+00> : vector<8xf32>
    %46 = vector.multi_reduction <add>, %45, %cst_18 [1] : vector<8x8xf32> to vector<8xf32>
    %47 = vector.shape_cast %46 : vector<8xf32> to vector<8x1xf32>
    %48 = arith.truncf %45 : vector<8x8xf32> to vector<8x8xbf16>
    %c0_19 = arith.constant 0 : index
    %c0_20 = arith.constant 0 : index
    %c0_21 = arith.constant 0 : index
    %49 = vector.load %arg17[%c0_19, %c0_20, %c0_21] : memref<4x8x8xbf16, #tpu.memory_space<vmem>>, vector<1x8x8xbf16>
    %50 = vector.shape_cast %49 : vector<1x8x8xbf16> to vector<8x8xbf16>
    %cst_22 = arith.constant dense<0.000000e+00> : vector<8x8xf32>
    %51 = tpu.matmul %48, %50, %cst_22 {dimension_numbers = #tpu.dot_dimension_numbers<[1], [0], [0], [1], [0, 0, 1, 1], [], []>} : vector<8x8xbf16>, vector<8x8xbf16>, vector<8x8xf32> -> vector<8x8xf32>
    %52 = tpu.reciprocal %47 {approx = true} : vector<8x1xf32> -> vector<8x1xf32>
    %53 = vector.broadcast %52 : vector<8x1xf32> to vector<8x8xf32>
    %54 = arith.mulf %51, %53 : vector<8x8xf32>
    %55 = vector.extract_strided_slice %36 {offsets = [0, 8], sizes = [8, 8], strides = [1, 1]} : vector<8x32xbf16> to vector<8x8xbf16>
    %c1 = arith.constant 1 : index
    %c0_23 = arith.constant 0 : index
    %c0_24 = arith.constant 0 : index
    %56 = vector.load %arg16[%c1, %c0_23, %c0_24] : memref<4x8x8xbf16, #tpu.memory_space<vmem>>, vector<1x8x8xbf16>
    %57 = vector.shape_cast %56 : vector<1x8x8xbf16> to vector<8x8xbf16>
    %cst_25 = arith.constant dense<0.000000e+00> : vector<8x8xf32>
    %58 = tpu.matmul %55, %57, %cst_25 {dimension_numbers = #tpu.dot_dimension_numbers<[1], [1], [0], [0], [0, 0, 1, 0], [], []>} : vector<8x8xbf16>, vector<8x8xbf16>, vector<8x8xf32> -> vector<8x8xf32>
    %cst_26 = arith.constant dense<0xFF800000> : vector<8xf32>
    %59 = vector.multi_reduction <maximumf>, %58, %cst_26 [1] : vector<8x8xf32> to vector<8xf32>
    %60 = vector.shape_cast %59 : vector<8xf32> to vector<8x1xf32>
    %61 = vector.broadcast %60 : vector<8x1xf32> to vector<8x8xf32>
    %62 = arith.subf %58, %61 : vector<8x8xf32>
    %63 = math.exp %62 : vector<8x8xf32>
    %cst_27 = arith.constant dense<0.000000e+00> : vector<8xf32>
    %64 = vector.multi_reduction <add>, %63, %cst_27 [1] : vector<8x8xf32> to vector<8xf32>
    %65 = vector.shape_cast %64 : vector<8xf32> to vector<8x1xf32>
    %66 = arith.truncf %63 : vector<8x8xf32> to vector<8x8xbf16>
    %c1_28 = arith.constant 1 : index
    %c0_29 = arith.constant 0 : index
    %c0_30 = arith.constant 0 : index
    %67 = vector.load %arg17[%c1_28, %c0_29, %c0_30] : memref<4x8x8xbf16, #tpu.memory_space<vmem>>, vector<1x8x8xbf16>
    %68 = vector.shape_cast %67 : vector<1x8x8xbf16> to vector<8x8xbf16>
    %cst_31 = arith.constant dense<0.000000e+00> : vector<8x8xf32>
    %69 = tpu.matmul %66, %68, %cst_31 {dimension_numbers = #tpu.dot_dimension_numbers<[1], [0], [0], [1], [0, 0, 1, 1], [], []>} : vector<8x8xbf16>, vector<8x8xbf16>, vector<8x8xf32> -> vector<8x8xf32>
    %70 = tpu.reciprocal %65 {approx = true} : vector<8x1xf32> -> vector<8x1xf32>
    %71 = vector.broadcast %70 : vector<8x1xf32> to vector<8x8xf32>
    %72 = arith.mulf %69, %71 : vector<8x8xf32>
    %73 = vector.extract_strided_slice %36 {offsets = [0, 16], sizes = [8, 8], strides = [1, 1]} : vector<8x32xbf16> to vector<8x8xbf16>
    %c2 = arith.constant 2 : index
    %c0_32 = arith.constant 0 : index
    %c0_33 = arith.constant 0 : index
    %74 = vector.load %arg16[%c2, %c0_32, %c0_33] : memref<4x8x8xbf16, #tpu.memory_space<vmem>>, vector<1x8x8xbf16>
    %75 = vector.shape_cast %74 : vector<1x8x8xbf16> to vector<8x8xbf16>
    %cst_34 = arith.constant dense<0.000000e+00> : vector<8x8xf32>
    %76 = tpu.matmul %73, %75, %cst_34 {dimension_numbers = #tpu.dot_dimension_numbers<[1], [1], [0], [0], [0, 0, 1, 0], [], []>} : vector<8x8xbf16>, vector<8x8xbf16>, vector<8x8xf32> -> vector<8x8xf32>
    %cst_35 = arith.constant dense<0xFF800000> : vector<8xf32>
    %77 = vector.multi_reduction <maximumf>, %76, %cst_35 [1] : vector<8x8xf32> to vector<8xf32>
    %78 = vector.shape_cast %77 : vector<8xf32> to vector<8x1xf32>
    %79 = vector.broadcast %78 : vector<8x1xf32> to vector<8x8xf32>
    %80 = arith.subf %76, %79 : vector<8x8xf32>
    %81 = math.exp %80 : vector<8x8xf32>
    %cst_36 = arith.constant dense<0.000000e+00> : vector<8xf32>
    %82 = vector.multi_reduction <add>, %81, %cst_36 [1] : vector<8x8xf32> to vector<8xf32>
    %83 = vector.shape_cast %82 : vector<8xf32> to vector<8x1xf32>
    %84 = arith.truncf %81 : vector<8x8xf32> to vector<8x8xbf16>
    %c2_37 = arith.constant 2 : index
    %c0_38 = arith.constant 0 : index
    %c0_39 = arith.constant 0 : index
    %85 = vector.load %arg17[%c2_37, %c0_38, %c0_39] : memref<4x8x8xbf16, #tpu.memory_space<vmem>>, vector<1x8x8xbf16>
    %86 = vector.shape_cast %85 : vector<1x8x8xbf16> to vector<8x8xbf16>
    %cst_40 = arith.constant dense<0.000000e+00> : vector<8x8xf32>
    %87 = tpu.matmul %84, %86, %cst_40 {dimension_numbers = #tpu.dot_dimension_numbers<[1], [0], [0], [1], [0, 0, 1, 1], [], []>} : vector<8x8xbf16>, vector<8x8xbf16>, vector<8x8xf32> -> vector<8x8xf32>
    %88 = tpu.reciprocal %83 {approx = true} : vector<8x1xf32> -> vector<8x1xf32>
    %89 = vector.broadcast %88 : vector<8x1xf32> to vector<8x8xf32>
    %90 = arith.mulf %87, %89 : vector<8x8xf32>
    %91 = vector.extract_strided_slice %36 {offsets = [0, 24], sizes = [8, 8], strides = [1, 1]} : vector<8x32xbf16> to vector<8x8xbf16>
    %c3 = arith.constant 3 : index
    %c0_41 = arith.constant 0 : index
    %c0_42 = arith.constant 0 : index
    %92 = vector.load %arg16[%c3, %c0_41, %c0_42] : memref<4x8x8xbf16, #tpu.memory_space<vmem>>, vector<1x8x8xbf16>
    %93 = vector.shape_cast %92 : vector<1x8x8xbf16> to vector<8x8xbf16>
    %cst_43 = arith.constant dense<0.000000e+00> : vector<8x8xf32>
    %94 = tpu.matmul %91, %93, %cst_43 {dimension_numbers = #tpu.dot_dimension_numbers<[1], [1], [0], [0], [0, 0, 1, 0], [], []>} : vector<8x8xbf16>, vector<8x8xbf16>, vector<8x8xf32> -> vector<8x8xf32>
    %cst_44 = arith.constant dense<0xFF800000> : vector<8xf32>
    %95 = vector.multi_reduction <maximumf>, %94, %cst_44 [1] : vector<8x8xf32> to vector<8xf32>
    %96 = vector.shape_cast %95 : vector<8xf32> to vector<8x1xf32>
    %97 = vector.broadcast %96 : vector<8x1xf32> to vector<8x8xf32>
    %98 = arith.subf %94, %97 : vector<8x8xf32>
    %99 = math.exp %98 : vector<8x8xf32>
    %cst_45 = arith.constant dense<0.000000e+00> : vector<8xf32>
    %100 = vector.multi_reduction <add>, %99, %cst_45 [1] : vector<8x8xf32> to vector<8xf32>
    %101 = vector.shape_cast %100 : vector<8xf32> to vector<8x1xf32>
    %102 = arith.truncf %99 : vector<8x8xf32> to vector<8x8xbf16>
    %c3_46 = arith.constant 3 : index
    %c0_47 = arith.constant 0 : index
    %c0_48 = arith.constant 0 : index
    %103 = vector.load %arg17[%c3_46, %c0_47, %c0_48] : memref<4x8x8xbf16, #tpu.memory_space<vmem>>, vector<1x8x8xbf16>
    %104 = vector.shape_cast %103 : vector<1x8x8xbf16> to vector<8x8xbf16>
    %cst_49 = arith.constant dense<0.000000e+00> : vector<8x8xf32>
    %105 = tpu.matmul %102, %104, %cst_49 {dimension_numbers = #tpu.dot_dimension_numbers<[1], [0], [0], [1], [0, 0, 1, 1], [], []>} : vector<8x8xbf16>, vector<8x8xbf16>, vector<8x8xf32> -> vector<8x8xf32>
    %106 = tpu.reciprocal %101 {approx = true} : vector<8x1xf32> -> vector<8x1xf32>
    %107 = vector.broadcast %106 : vector<8x1xf32> to vector<8x8xf32>
    %108 = arith.mulf %105, %107 : vector<8x8xf32>
    %109 = tpu.concatenate %54, %72, %90, %108 in 1 : vector<8x8xf32>, vector<8x8xf32>, vector<8x8xf32>, vector<8x8xf32> -> vector<8x32xf32>
    %110 = arith.truncf %109 : vector<8x32xf32> to vector<8x32xbf16>
    %c0_50 = arith.constant 0 : index
    %c0_51 = arith.constant 0 : index
    %111 = vector.load %arg8[%c0_50, %c0_51] : memref<32x32xbf16, #tpu.memory_space<vmem>>, vector<32x32xbf16>
    %cst_52 = arith.constant dense<0.000000e+00> : vector<8x32xf32>
    %112 = tpu.matmul %110, %111, %cst_52 {dimension_numbers = #tpu.dot_dimension_numbers<[1], [0], [0], [1], [0, 0, 1, 1], [], []>} : vector<8x32xbf16>, vector<32x32xbf16>, vector<8x32xf32> -> vector<8x32xf32>
    %113 = arith.addf %9, %112 : vector<8x32xf32>
    %c0_53 = arith.constant 0 : index
    %c0_54 = arith.constant 0 : index
    %114 = vector.load %arg9[%c0_53, %c0_54] : memref<1x32xf32, #tpu.memory_space<vmem>>, vector<1x32xf32>
    %c0_55 = arith.constant 0 : index
    %c0_56 = arith.constant 0 : index
    %115 = vector.load %arg10[%c0_55, %c0_56] : memref<1x32xf32, #tpu.memory_space<vmem>>, vector<1x32xf32>
    %cst_57 = arith.constant dense<0.000000e+00> : vector<8xf32>
    %116 = vector.multi_reduction <add>, %113, %cst_57 [1] : vector<8x32xf32> to vector<8xf32>
    %117 = vector.shape_cast %116 : vector<8xf32> to vector<8x1xf32>
    %cst_58 = arith.constant 3.200000e+01 : f32
    %118 = vector.broadcast %cst_58 : f32 to vector<8x1xf32>
    %119 = arith.divf %117, %118 : vector<8x1xf32>
    %120 = vector.broadcast %119 : vector<8x1xf32> to vector<8x32xf32>
    %121 = arith.subf %113, %120 : vector<8x32xf32>
    %122 = arith.mulf %121, %121 : vector<8x32xf32>
    %cst_59 = arith.constant dense<0.000000e+00> : vector<8xf32>
    %123 = vector.multi_reduction <add>, %122, %cst_59 [1] : vector<8x32xf32> to vector<8xf32>
    %124 = vector.shape_cast %123 : vector<8xf32> to vector<8x1xf32>
    %cst_60 = arith.constant 0.0322580636 : f32
    %125 = vector.broadcast %cst_60 : f32 to vector<8x1xf32>
    %126 = arith.mulf %124, %125 : vector<8x1xf32>
    %127 = math.sqrt %126 : vector<8x1xf32>
    %cst_61 = arith.constant 9.99999997E-7 : f32
    %128 = vector.broadcast %cst_61 : f32 to vector<8x1xf32>
    %129 = arith.addf %127, %128 : vector<8x1xf32>
    %130 = tpu.reciprocal %129 {approx = true} : vector<8x1xf32> -> vector<8x1xf32>
    %131 = vector.broadcast %119 : vector<8x1xf32> to vector<8x32xf32>
    %132 = arith.subf %113, %131 : vector<8x32xf32>
    %133 = vector.broadcast %130 : vector<8x1xf32> to vector<8x32xf32>
    %134 = arith.mulf %132, %133 : vector<8x32xf32>
    %135 = vector.broadcast %114 : vector<1x32xf32> to vector<8x32xf32>
    %136 = arith.mulf %135, %134 : vector<8x32xf32>
    %137 = vector.broadcast %115 : vector<1x32xf32> to vector<8x32xf32>
    %138 = arith.addf %136, %137 : vector<8x32xf32>
    %139 = arith.truncf %138 : vector<8x32xf32> to vector<8x32xbf16>
    %cst_62 = arith.constant 0.000000e+00 : f32
    %140 = vector.broadcast %cst_62 : f32 to vector<8x32xf32>
    %c0_63 = arith.constant 0 : index
    %c0_64 = arith.constant 0 : index
    %141 = vector.load %arg11[%c0_63, %c0_64] : memref<32x64xbf16, #tpu.memory_space<vmem>>, vector<32x64xbf16>
    %cst_65 = arith.constant dense<0.000000e+00> : vector<8x64xf32>
    %142 = tpu.matmul %139, %141, %cst_65 {dimension_numbers = #tpu.dot_dimension_numbers<[1], [0], [0], [1], [0, 0, 1, 1], [], []>} : vector<8x32xbf16>, vector<32x64xbf16>, vector<8x64xf32> -> vector<8x64xf32>
    %c0_66 = arith.constant 0 : index
    %c0_67 = arith.constant 0 : index
    %143 = vector.load %arg12[%c0_66, %c0_67] : memref<1x64xf32, #tpu.memory_space<vmem>>, vector<1x64xf32>
    %144 = vector.broadcast %143 : vector<1x64xf32> to vector<8x64xf32>
    %145 = arith.addf %142, %144 : vector<8x64xf32>
    %cst_68 = arith.constant 5.000000e-01 : f32
    %146 = vector.broadcast %cst_68 : f32 to vector<8x64xf32>
    %147 = arith.mulf %146, %145 : vector<8x64xf32>
    %cst_69 = arith.constant 0.707106769 : f32
    %148 = vector.broadcast %cst_69 : f32 to vector<8x64xf32>
    %149 = arith.mulf %145, %148 : vector<8x64xf32>
    %150 = math.absf %149 : vector<8x64xf32>
    %cst_70 = arith.constant 0.327591091 : f32
    %151 = vector.broadcast %cst_70 : f32 to vector<8x64xf32>
    %152 = arith.mulf %151, %150 : vector<8x64xf32>
    %cst_71 = arith.constant 1.000000e+00 : f32
    %153 = vector.broadcast %cst_71 : f32 to vector<8x64xf32>
    %154 = arith.addf %153, %152 : vector<8x64xf32>
    %cst_72 = arith.constant 1.000000e+00 : f32
    %155 = vector.broadcast %cst_72 : f32 to vector<8x64xf32>
    %156 = arith.divf %155, %154 : vector<8x64xf32>
    %cst_73 = arith.constant 1.06140542 : f32
    %157 = vector.broadcast %cst_73 : f32 to vector<8x64xf32>
    %158 = arith.mulf %157, %156 : vector<8x64xf32>
    %cst_74 = arith.constant -1.45315206 : f32
    %159 = vector.broadcast %cst_74 : f32 to vector<8x64xf32>
    %160 = arith.addf %158, %159 : vector<8x64xf32>
    %161 = arith.mulf %160, %156 : vector<8x64xf32>
    %cst_75 = arith.constant 1.42141378 : f32
    %162 = vector.broadcast %cst_75 : f32 to vector<8x64xf32>
    %163 = arith.addf %161, %162 : vector<8x64xf32>
    %164 = arith.mulf %163, %156 : vector<8x64xf32>
    %cst_76 = arith.constant -0.284496725 : f32
    %165 = vector.broadcast %cst_76 : f32 to vector<8x64xf32>
    %166 = arith.addf %164, %165 : vector<8x64xf32>
    %167 = arith.mulf %166, %156 : vector<8x64xf32>
    %cst_77 = arith.constant 0.254829586 : f32
    %168 = vector.broadcast %cst_77 : f32 to vector<8x64xf32>
    %169 = arith.addf %167, %168 : vector<8x64xf32>
    %170 = arith.mulf %169, %156 : vector<8x64xf32>
    %cst_78 = arith.constant 0.000000e+00 : f32
    %171 = vector.broadcast %cst_78 : f32 to vector<8x64xf32>
    %172 = arith.subf %171, %150 : vector<8x64xf32>
    %173 = arith.mulf %172, %150 : vector<8x64xf32>
    %174 = math.exp %173 : vector<8x64xf32>
    %175 = arith.mulf %170, %174 : vector<8x64xf32>
    %cst_79 = arith.constant 1.000000e+00 : f32
    %176 = vector.broadcast %cst_79 : f32 to vector<8x64xf32>
    %177 = arith.subf %176, %175 : vector<8x64xf32>
    %cst_80 = arith.constant 0.000000e+00 : f32
    %178 = vector.broadcast %cst_80 : f32 to vector<8x64xf32>
    %179 = arith.cmpf oge, %149, %178 : vector<8x64xf32>
    %cst_81 = arith.constant 0.000000e+00 : f32
    %180 = vector.broadcast %cst_81 : f32 to vector<8x64xf32>
    %181 = arith.subf %180, %177 : vector<8x64xf32>
    %182 = arith.select %179, %177, %181 : vector<8x64xi1>, vector<8x64xf32>
    %cst_82 = arith.constant 1.000000e+00 : f32
    %183 = vector.broadcast %cst_82 : f32 to vector<8x64xf32>
    %184 = arith.addf %183, %182 : vector<8x64xf32>
    %185 = arith.mulf %147, %184 : vector<8x64xf32>
    %186 = arith.truncf %185 : vector<8x64xf32> to vector<8x64xbf16>
    %c0_83 = arith.constant 0 : index
    %c0_84 = arith.constant 0 : index
    %187 = vector.load %arg13[%c0_83, %c0_84] : memref<64x32xbf16, #tpu.memory_space<vmem>>, vector<64x32xbf16>
    %cst_85 = arith.constant dense<0.000000e+00> : vector<8x32xf32>
    %188 = tpu.matmul %186, %187, %cst_85 {dimension_numbers = #tpu.dot_dimension_numbers<[1], [0], [0], [1], [0, 0, 1, 1], [], []>} : vector<8x64xbf16>, vector<64x32xbf16>, vector<8x32xf32> -> vector<8x32xf32>
    %189 = arith.addf %140, %188 : vector<8x32xf32>
    %190 = arith.addf %113, %189 : vector<8x32xf32>
    %c0_86 = arith.constant 0 : index
    %c0_87 = arith.constant 0 : index
    %191 = vector.load %arg14[%c0_86, %c0_87] : memref<1x32xf32, #tpu.memory_space<vmem>>, vector<1x32xf32>
    %192 = vector.broadcast %191 : vector<1x32xf32> to vector<8x32xf32>
    %193 = arith.addf %190, %192 : vector<8x32xf32>
    %c0_88 = arith.constant 0 : index
    %c0_89 = arith.constant 0 : index
    %c0_90 = arith.constant 0 : index
    %194 = vector.load %arg15[%c0_88, %c0_89, %c0_90] : memref<1x8x32xf32, #tpu.memory_space<vmem>>, vector<1x8x32xf32>
    %195 = vector.shape_cast %194 : vector<1x8x32xf32> to vector<8x32xf32>
    %196 = vector.shape_cast %193 : vector<8x32xf32> to vector<1x8x32xf32>
    tpu.vector_store %arg15[%c0_88, %c0_89, %c0_90], %196 {strides = array<i32>} : memref<1x8x32xf32, #tpu.memory_space<vmem>>, vector<1x8x32xf32>,
    return
  }
  func.func @transform_0(%arg0: i32, %arg1: i32) -> (i32, i32, i32) {
    %c0_i32 = arith.constant 0 : i32
    %c0_i32_0 = arith.constant 0 : i32
    %c0_i32_1 = arith.constant 0 : i32
    return %arg0, %c0_i32, %c0_i32_0 : i32, i32, i32
  }
  func.func @transform_1(%arg0: i32, %arg1: i32) -> (i32, i32) {
    %c0_i32 = arith.constant 0 : i32
    %c0_i32_0 = arith.constant 0 : i32
    %c0_i32_1 = arith.constant 0 : i32
    return %c0_i32, %c0_i32_0 : i32, i32
  }
  func.func @transform_2(%arg0: i32, %arg1: i32) -> (i32, i32) {
    %c0_i32 = arith.constant 0 : i32
    %c0_i32_0 = arith.constant 0 : i32
    %c0_i32_1 = arith.constant 0 : i32
    return %c0_i32, %c0_i32_0 : i32, i32
  }
  func.func @transform_3(%arg0: i32, %arg1: i32) -> (i32, i32) {
    %c0_i32 = arith.constant 0 : i32
    %c0_i32_0 = arith.constant 0 : i32
    %c0_i32_1 = arith.constant 0 : i32
    return %c0_i32, %c0_i32_0 : i32, i32
  }
  func.func @transform_4(%arg0: i32, %arg1: i32) -> (i32, i32) {
    %c0_i32 = arith.constant 0 : i32
    %c0_i32_0 = arith.constant 0 : i32
    %c0_i32_1 = arith.constant 0 : i32
    return %c0_i32, %c0_i32_0 : i32, i32
  }
  func.func @transform_5(%arg0: i32, %arg1: i32) -> (i32, i32) {
    %c0_i32 = arith.constant 0 : i32
    %c0_i32_0 = arith.constant 0 : i32
    %c0_i32_1 = arith.constant 0 : i32
    return %c0_i32, %c0_i32_0 : i32, i32
  }
  func.func @transform_6(%arg0: i32, %arg1: i32) -> (i32, i32) {
    %c0_i32 = arith.constant 0 : i32
    %c0_i32_0 = arith.constant 0 : i32
    %c0_i32_1 = arith.constant 0 : i32
    return %c0_i32, %c0_i32_0 : i32, i32
  }
  func.func @transform_7(%arg0: i32, %arg1: i32) -> (i32, i32) {
    %c0_i32 = arith.constant 0 : i32
    %c0_i32_0 = arith.constant 0 : i32
    %c0_i32_1 = arith.constant 0 : i32
    return %c0_i32, %c0_i32_0 : i32, i32
  }
  func.func @transform_8(%arg0: i32, %arg1: i32) -> (i32, i32) {
    %c0_i32 = arith.constant 0 : i32
    %c0_i32_0 = arith.constant 0 : i32
    %c0_i32_1 = arith.constant 0 : i32
    return %c0_i32, %c0_i32_0 : i32, i32
  }
  func.func @transform_9(%arg0: i32, %arg1: i32) -> (i32, i32) {
    %c0_i32 = arith.constant 0 : i32
    %c0_i32_0 = arith.constant 0 : i32
    %c0_i32_1 = arith.constant 0 : i32
    return %c0_i32, %c0_i32_0 : i32, i32
  }
  func.func @transform_10(%arg0: i32, %arg1: i32) -> (i32, i32) {
    %c0_i32 = arith.constant 0 : i32
    %c0_i32_0 = arith.constant 0 : i32
    %c0_i32_1 = arith.constant 0 : i32
    return %c0_i32, %c0_i32_0 : i32, i32
  }
  func.func @transform_11(%arg0: i32, %arg1: i32) -> (i32, i32) {
    %c0_i32 = arith.constant 0 : i32
    %c0_i32_0 = arith.constant 0 : i32
    %c0_i32_1 = arith.constant 0 : i32
    return %c0_i32, %c0_i32_0 : i32, i32
  }
  func.func @transform_12(%arg0: i32, %arg1: i32) -> (i32, i32) {
    %c0_i32 = arith.constant 0 : i32
    %c0_i32_0 = arith.constant 0 : i32
    %c0_i32_1 = arith.constant 0 : i32
    return %c0_i32, %c0_i32_0 : i32, i32
  }
  func.func @transform_13(%arg0: i32, %arg1: i32) -> (i32, i32, i32) {
    %c0_i32 = arith.constant 0 : i32
    %c0_i32_0 = arith.constant 0 : i32
    return %arg0, %arg1, %c0_i32 : i32, i32, i32
  }
}

</mosaic_0001>

<bundles_post_ra>
// kernel: tpu_custom_call.1
= control target key start
LH: loop header
LB: loop body
LE: loop exit
PB: predicated region body
PF: predicated region fallthrough
CT: control target
= control target key end

     0   :  { %s2115_s0 = inlined_call_operand.vmem [shape: f32[2,8,32], index: 0, kind: input, shape index: {}]   ;;  %s2116_s1 = inlined_call_operand.hbm [shape: f32[1,32], index: 1, kind: input, shape index: {}]   ;;  %s2117_s2 = inlined_call_operand.vmem [shape: f32[1,32], index: 2, kind: input, shape index: {}]   ;;  %s2118_s3 = inlined_call_operand.vmem [shape: bf16[32,32], index: 3, kind: input, shape index: {}]   ;;  %s2119_s4 = inlined_call_operand.vmem [shape: bf16[32,32], index: 4, kind: input, shape index: {}]   ;;  %s2120_s5 = inlined_call_operand.hbm [shape: bf16[32,32], index: 5, kind: input, shape index: {}]   ;;  %s2121_s6 = inlined_call_operand.hbm [shape: bf16[32,32], index: 6, kind: input, shape index: {}]   ;;  %s2122_s7 = inlined_call_operand.vmem [shape: f32[1,32], index: 7, kind: input, shape index: {}]   ;;  %s2123_s8 = inlined_call_operand.vmem [shape: f32[1,32], index: 8, kind: input, shape index: {}]   ;;  %s2124_s9 = inlined_call_operand.hbm [shape: bf16[32,64], index: 9, kind: input, shape index: {}]   ;;  %s2125_s10 = inlined_call_operand.vmem [shape: f32[1,64], index: 10, kind: input, shape index: {}]   ;;  %s2126_s11 = inlined_call_operand.vmem [shape: bf16[64,32], index: 11, kind: input, shape index: {}]   ;;  %s2127_s12 = inlined_call_operand.vmem [shape: f32[1,32], index: 12, kind: input, shape index: {}]   ;;  %s2128_s13 = inlined_call_operand.hbm [shape: f32[2,8,32], index: 13, kind: output, shape index: {}]  }
   0x1   :  { %2139 = sst [smem:[#allocation25_spill]] %s2120_s5 }
   0x2   :  { %2140 = sst [smem:[#allocation26_spill]] %s2127_s12 }
   0x3   :  { %2141 = sst [smem:[#allocation27_spill]] %s2128_s13 }
   0x4   :  { %18 = vsyncpa [#allocation5], 0 }
   0x5   :  { %19 = vsyncpa [#allocation8], 0 }
   0x6   :  { %20 = vsyncpa [#allocation11], 0 }
   0x7   :  { %21 = vsyncpa [#allocation6], 0 }
   0x8   :  { %23 = vsyncpa [#allocation6 + $0x1], 0  ;;  %s1857_s25 = smov 0   ;;  %s1859_s26 = smov 0  }
   0x9   :  { %s1861_s27 = smov 0   ;;  %s1863_s28 = smov 0  }
   0xa   :  { %s1865_s29 = smov 0   ;;  %s1867_s30 = smov 0  }
   0xb LB: > { %2142 = sst [smem:[#allocation17_spill]] %s1752_s25  ;;  %s1314_s14 = sadd.s32 4294967295, %s1772_s30   ;;  %s1772_s30 = sphi %s1867_s30, %s29_s30   ;;  %s1768_s29 = sphi %s1865_s29, %s2166_s29   ;;  %s1764_s28 = sphi %s1863_s28, %s2165_s28   ;;  %s1760_s27 = sphi %s1861_s27, %s2164_s27   ;;  %s1756_s26 = sphi %s1859_s26, %s2168_s26   ;;  %s1752_s25 = sphi %s1857_s25, %s2167_s25  }
   0xc   : > { %2143 = sst [smem:[#allocation18_spill]] %s1760_s27  ;;  %s1315_s15 = sadd.s32 4294967294, %s1772_s30  }
   0xd   : > { %2144 = sst [smem:[#allocation19_spill]] %s1768_s29  ;;  %s41_s16 = sadd.s32 1, %s1768_s29 }
   0xe   : > { %2145 = sst [smem:[#allocation20_spill]] %s1772_s30  ;;  %s328_s17 = sadd.s32 1, %s1760_s27 }
   0xf   : > { %p43_p0 = scmp.ge.s32.totalorder %s41_s16, 2  ;;  %p338_p1 = scmp.ne.s32.totalorder %s1760_s27, %s1756_s26 }
  0x10   : > { %p339_p2 = scmp.eq.s32.totalorder %s1314_s14, 1  ;;  %p344_p3 = scmp.ne.s32.totalorder %s1756_s26, %s1752_s25 }
  0x11   : > { %s2170_s16 = smov (%p43_p0, %s41_s16), 0  ;;  %p345_p5 = scmp.eq.s32.totalorder %s1315_s15, 1 }
  0x12   : > { %2146 = sst [smem:[#allocation21_spill]] %s2170_s16  ;;  %p1897_p4 = por %p339_p2, %p338_p1 }
  0x13   : > { %s323_s19 = ssub.s32 %s1768_s29, %s2170_s16  ;;  %p1316_p6 = scmp.ge.s32.totalorder %s1772_s30, 1 }
  0x14   : > { %s2147_s18 = scalar_select %p1897_p4, 1, 0 }
  0x15   : > { %p326_p7 = scmp.eq.s32.totalorder %s323_s19, 0  ;;  %p1904_p8 = por %p345_p5, %p344_p3 }
  0x16   : > { %2148 = sst [smem:[#allocation22_spill]] %s2147_s18  ;;  %p352_p9 = scmp.lt.s32.totalorder %s1772_s30, 3 }
  0x17   : > { %s2149_s20 = scalar_select %p1904_p8, 1, 0 }
  0x18   : > { %s1910_s21 = scalar_select %p326_p7, %s1760_s27, %s328_s17  }
  0x19   : > { %2150 = sst [smem:[#allocation23_spill]] %s2149_s20  ;;  %p1912_p10 = pnand %p1316_p6, %p352_p9 }
  0x1a   : > { %2151 = sst [smem:[#allocation24_spill]] %s1910_s21  ;;  %p1916_p11 = scmp.eq.s32.totalorder %s1314_s14, 0 }
  0x1b   : > { %s2154_s5 = sld [smem:[#allocation25_spill]]  ;;  %p1435_p12 = pneg %p1912_p10 }
  0x1c   : > { %s1774_s16 = smov [#allocation7]   ;;  %s1775_s14 = smov 64  }
  0x1d   : > { %s386_s17 = sshll.u32 %s1774_s16, 4  ;;  %p1927_p13 = pnand %p1916_p11, %p1435_p12  ;;  %s387_s17 = int_to_ptr.vmem [resolvable:$true] %s386_s17 }
  0x1e   : > { %s1776_s21 = smov 4   ;;  %s1777_s16 = smov [#allocation4]  }
  0x1f   : > { %s366_s27 = sshll.u32 %s1777_s16, 4  ;;  %s398_s30 = sshll.u32 %s2121_s6, 4  ;;  %s367_s27 = int_to_ptr.vmem [resolvable:$true] %s366_s27  ;;  %s399_s30 = int_to_ptr.hbm [resolvable:$true] %s398_s30 }
  0x20   : > { %s1778_s18 = smov [#allocation9]   ;;  %s1779_s24 = smov [#allocation10]  }
  0x21   : > { %s384_s19 = sshll.u32 %s2154_s5, 4  ;;  %s364_s5 = sshll.u32 %s2116_s1, 4  ;;  %s385_s19 = int_to_ptr.hbm [resolvable:$true] %s384_s19  ;;  %s365_s5 = int_to_ptr.hbm [resolvable:$true] %s364_s5 }
  0x22   : > { %1441 = dma.hbm_to_vmem [thread:$0]  (!%p1927_p13), %s385_s19, 256, %s387_s17, [#allocation8], %s1775_s14, %s1775_s14, %s1776_s21  }
  0x23   : > { %1438 = dma.hbm_to_vmem [thread:$0]  (!%p1927_p13), %s365_s5, 16, %s367_s27, [#allocation5]  }
  0x24   : > { %s400_s12 = sshll.u32 %s1778_s18, 4  ;;  %s418_s17 = sshll.u32 %s2124_s9, 4  ;;  %s401_s12 = int_to_ptr.vmem [resolvable:$true] %s400_s12  ;;  %s419_s17 = int_to_ptr.hbm [resolvable:$true] %s418_s17 }
  0x25   : > { %1444 = dma.hbm_to_vmem [thread:$0]  (!%p1927_p13), %s399_s30, 256, %s401_s12, [#allocation8], %s1775_s14, %s1775_s14, %s1776_s21  }
  0x26   : > { %s420_s15 = sshll.u32 %s1779_s24, 4  ;;  %452 = sbr.rel (%p1912_p10) target bundleno = 1865 (0x749), region = 72  ;;  %s421_s15 = int_to_ptr.vmem [resolvable:$true] %s420_s15 }
  0x27   : > { %1447 = dma.hbm_to_vmem [thread:$0]  (!%p1927_p13), %s419_s17, 256, %s421_s15, [#allocation11], %s1775_s14, %s1775_s14, %s1776_s21  }
  0x2b   : > { %1735 = dma.done.wait (%p1916_p11), [#allocation5], 16  }
  0x2c   : > { %1737 = vsyncadd (%p1916_p11), [#allocation5], 4294967280 }
  0x2d   : > { %1739 = dma.done.wait (%p1916_p11), [#allocation8], 512  }
  0x2e   : > { %1741 = vsyncadd (%p1916_p11), [#allocation8], 4294966784 }
  0x2f   : > { %1743 = dma.done.wait (%p1916_p11), [#allocation11], 256  }
  0x30   : > { %1745 = vsyncadd (%p1916_p11), [#allocation11], 4294967040  ;;  %p511_p0 = scmp.lt.s32.totalorder %s1764_s28, 1  ;;  %vm523_vm0 = vcmask 261120   ;;  %v1780_v2 = vmov 32.0   ;;  %v1404_v19 = vld [vmem:[%s2119_s4 + $0x8] sm:$0xff] }
  0x31   : > { %1528 = vrcp.f32 %v1780_v2  ;;  %v1406_v20 = vld [vmem:[#allocation7 + $0x8] sm:$0xff]  ;;  %590 = vmatpush.bf16.msra.mxu0 %v1404_v19  ;;  %v1403_v21 = vld [vmem:[%s2119_s4] sm:$0xff]  ;;  %vm628_vm6 = vcmask 60416   ;;  %s1781_s17 = smov 104   ;;  %s1782_s24 = smov 120   ;;  %vm742_vm7 = vcmask 64512  }
  0x32   : > { %s512_s5 = scalar_select %p511_p0, %s1764_s28, 1  ;;  %620 = vmatpush.bf16.msra.mxu1 %v1406_v20  ;;  %v1405_v22 = vld [vmem:[#allocation7] sm:$0xff]  ;;  %v1522_v49 = vld [vmem:[#allocation4] ss:$0 sm:$0xff]  ;;  %vm776_vm8 = vcmask 1043456   ;;  %vm979_vm9 = vcmask 130048  }
  0x33   : > { %v1408_v26 = vld [vmem:[%s2118_s3 + $0x8] sm:$0xff]  ;;  %v1407_v30 = vld [vmem:[%s2118_s3] sm:$0xff]  ;;  %s1783_s15 = smov 112   ;;  %s1786_s13 = smov 16   ;;  %vm981_vm10 = vcmask 195584  }
  0x34   : > { %s1328_s12 = sshll.u32 %s512_s5, 3  ;;  %733 = vmatpush.bf16.msra.mxu2 %v1408_v26  ;;  %v1523_v54 = vld [vmem:[%s2117_s2] ss:$0 sm:$0xff]  ;;  %s1784_s5 = smov 8  }
  0x35   : > { %s514_s27 = scalar_lea.vmem %s2115_s0, %s1328_s12  ;;  %591 = vmatpush.bf16.msra.mxu0 %v1403_v21  ;;  %s1785_s12 = smov 24  }
  0x36   : > { %v1967_v0 = vld [vmem:[%s514_s27] sm:$0xff]  ;;  %621 = vmatpush.bf16.msra.mxu1 %v1405_v22  ;;  %s2156_s27 = sld [smem:[#allocation27_spill]] }
  0x37   : > { %v524_v1 = vsel %vm523_vm0, %v1967_v0, 0.0  ;;  %v1529_v3 = vpop.eup %1528  ;;  %s2158_s21 = sld [smem:[#allocation26_spill]] }
  0x38   : > { %525 = vadd.xlane.f32.xlu0 %v524_v1  ;;  %v528_v4 = vmul.f32 32.0, %v1529_v3  ;;  %vm532_vm1 = vweird.f32 %v1529_v3  ;;  %734 = vmatpush.bf16.msra.mxu2 %v1407_v30 }
  0x3a   : > { %v529_v5 = vsub.f32 1.0, %v528_v4 }
  0x3c   : > { %v530_v6 = vmul.f32 %v1529_v3, %v529_v5  ;;  %s2157_s18 = smov %s2156_s27 }
  0x3e   : > { %v531_v7 = vadd.f32 %v1529_v3, %v530_v6 }
  0x40   : > { %668 = vadd.xlane.f32.xlu0 %v524_v1  ;;  %v1971_v8 = vsel %vm532_vm1, %v1529_v3, %v531_v7 }
  0xab   : > { %v526_v9 = vpop.xlane.xlu0 %525 }
  0xac   : > { %v534_v10 = vmul.f32 %v1971_v8, %v526_v9 }
  0xae   : > { %v535_v11 = vsub.f32 %v1967_v0, %v534_v10 }
  0xb0   : > { %v536_v12 = vmul.f32 %v535_v11, %v535_v11 }
  0xb2   : > { %v537_v13 = vsel %vm523_vm0, %v536_v12, 0.0 }
  0xb3   : > { %538 = vadd.xlane.f32.xlu1 %v537_v13  ;;  %v669_v14 = vpop.xlane.xlu0 %668 }
  0xb4   : > { %v677_v15 = vmul.f32 %v669_v14, %v1971_v8 }
  0xb6   : > { %v678_v16 = vsub.f32 %v1967_v0, %v677_v15 }
  0xb8   : > { %v679_v17 = vmul.f32 %v678_v16, %v678_v16 }
  0xba   : > { %v680_v18 = vsel %vm523_vm0, %v679_v17, 0.0 }
  0xbb   : > { %681 = vadd.xlane.f32.xlu1 %v680_v18 }
 0x126   : > { %v539_v23 = vpop.xlane.xlu1 %538 }
 0x127   : > { %v540_v24 = vmul.f32 0.032258064, %v539_v23 }
 0x129   : > { %1530 = vrsqrt.f32 %v540_v24  ;;  %vm548_vm2 = vcmp.eq.f32.partialorder %v540_v24, inf  ;;  %v551_v39 = vand.u32 2147483648, %v540_v24  ;;  %vm550_vm3 = vcmp.eq.f32.partialorder %v540_v24, 0.0 }
 0x12e   : > { %v682_v25 = vpop.xlane.xlu1 %681 }
 0x12f   : > { %v1531_v27 = vpop.eup %1530  ;;  %v683_v28 = vmul.f32 0.032258064, %v682_v25 }
 0x130   : > { %v542_v29 = vmul.f32 %v1531_v27, %v540_v24 }
 0x131   : > { %1532 = vrsqrt.f32 %v683_v28  ;;  %vm691_vm4 = vcmp.eq.f32.partialorder %v683_v28, inf  ;;  %v694_v47 = vand.u32 2147483648, %v683_v28  ;;  %vm693_vm5 = vcmp.eq.f32.partialorder %v683_v28, 0.0 }
 0x132   : > { %v543_v31 = vmul.f32 %v1531_v27, %v542_v29 }
 0x134   : > { %v544_v32 = vmul.f32 0.5, %v543_v31 }
 0x136   : > { %v545_v33 = vsub.f32 1.5, %v544_v32 }
 0x137   : > { %v1533_v34 = vpop.eup %1532 }
 0x138   : > { %v685_v35 = vmul.f32 %v1533_v34, %v683_v28  ;;  %v546_v36 = vmul.f32 %v1531_v27, %v545_v33 }
 0x13a   : > { %v686_v37 = vmul.f32 %v1533_v34, %v685_v35  ;;  %v547_v38 = vmul.f32 %v546_v36, %v540_v24 }
 0x13c   : > { %v549_v40 = vsel %vm548_vm2, %v540_v24, %v547_v38  ;;  %v687_v41 = vmul.f32 0.5, %v686_v37 }
 0x13d   : > { %v552_v42 = vsel %vm550_vm3, %v551_v39, %v549_v40  ;;  %vm1162_vm3 = vcmask 523264  }
 0x13e   : > { %v553_v43 = vadd.f32 1e-06, %v552_v42  ;;  %v688_v44 = vsub.f32 1.5, %v687_v41 }
 0x140   : > { %1534 = vrcp.f32 %v553_v43  ;;  %v689_v45 = vmul.f32 %v1533_v34, %v688_v44 }
 0x142   : > { %v690_v46 = vmul.f32 %v689_v45, %v683_v28 }
 0x144   : > { %v692_v48 = vsel %vm691_vm4, %v683_v28, %v690_v46 }
 0x145   : > { %v695_v50 = vsel %vm693_vm5, %v694_v47, %v692_v48 }
 0x146   : > { %v1535_v51 = vpop.eup %1534  ;;  %v696_v52 = vadd.f32 1e-06, %v695_v50 }
 0x147   : > { %v555_v53 = vmul.f32 %v1535_v51, %v535_v11 }
 0x148   : > { %1536 = vrcp.f32 %v696_v52 }
 0x149   : > { %v559_v55 = vmul.f32 %v1522_v49, %v555_v53 }
 0x14b   : > { %v563_v56 = vadd.f32 %v1523_v54, %v559_v55 }
 0x14d   : > { %v564_v57 = vpack.c.bf16 %v563_v56, %v563_v56 }
 0x14e   : > { %v1537_v58 = vpop.eup %1536 }
 0x14f   : > { %1337 = vmatmul.msk.bf16.vlgmr.msra.gmra.mxu0 %vm523_vm0, %v564_v57  ;;  %1346 = vmatmul.msk.bf16.vlgmr.msra.gmra.mxu1 %vm523_vm0, %v564_v57  ;;  %v698_v59 = vmul.f32 %v1537_v58, %v678_v16 }
 0x151   : > { %v702_v60 = vmul.f32 %v1522_v49, %v698_v59 }
 0x153   : > { %v706_v61 = vadd.f32 %v1523_v54, %v702_v60 }
 0x155   : > { %v707_v62 = vpack.c.bf16 %v706_v61, %v706_v61 }
 0x157   : > { %1355 = vmatmul.msk.bf16.vlgmr.msra.gmra.mxu2 %vm523_vm0, %v707_v62 }
 0x1cc   : > { %v593_v63 = vpop.f32.mrf.mxu0  ;;  %v623_v1 = vpop.f32.mrf.mxu1 }
 0x1cd   : > { %v597_v2 = vpack.c.bf16 %v593_v63, %v593_v63  ;;  %v1997_v3 = vpack.c.bf16 %v623_v1, %v623_v1 }
 0x1cf   : > { %629 = vst.msk [vmem:[#allocation2] sm:$0xf] %vm628_vm6, %v597_v2  ;;  %653 = vrot.lane.b32.xlu0 %v597_v2, %s1781_s17  ;;  %632 = vrot.lane.b32.xlu2 %v597_v2, %s1782_s24 }
 0x1d0   : > { %630 = vst.msk [vmem:[#allocation3] sm:$0xf] %vm628_vm6, %v1997_v3 }
 0x1d4   : > { %v595_v4 = vpop.f32.mrf.mxu0  ;;  %v625_v5 = vpop.f32.mrf.mxu1 }
 0x1d6   : > { %v741_v6 = vld [vmem:[#allocation2] sm:$0xf] }
 0x1d7   : > { %638 = vrot.lane.b32.xlu0 %v1997_v3, %s1782_s24  ;;  %643 = vrot.lane.b32.xlu2 %v597_v2, %s1783_s15  ;;  %v747_v7 = vsel %vm742_vm7, %v741_v6, 0  ;;  %v772_v9 = vld [vmem:[#allocation3] sm:$0xf] }
 0x1d8   : > { %756 = vmatpush.bf16.xpose.msra.mxu3 %v747_v7  ;;  %v778_v10 = vsel %vm776_vm8, %v772_v9, 0 }
 0x1d9   : > { %787 = vmatpush.bf16.msrb.mxu0 %v778_v10 }
 0x1da   : > { %v736_v11 = vpop.f32.mrf.mxu2 }
 0x1db   : > { %v740_v12 = vpack.c.bf16 %v736_v11, %v736_v11 }
 0x1dd   : > { %v798_v13 = vunpack.c.l.b16 %v740_v12 }
 0x1df   : > { %v799_v14 = vpack.c.b16 %v798_v13, %v798_v13  ;;  %1356 = vmatmul.msk.bf16.vlgmr.msra.gmra.mxu3 %vm742_vm7, %v740_v12 }
 0x1e1   : > { %800 = vrot.lane.b32.xlu1 %v799_v14, %s1782_s24  ;;  %856 = vrot.lane.b32.xlu2 %v799_v14, %s1783_s15 }
 0x1e2   : > { %v738_v15 = vpop.f32.mrf.mxu2 }
 0x1e9   : > { %912 = vrot.lane.b32.xlu2 %v799_v14, %s1781_s17 }
 0x229   : > { %v633_v16 = vpop.permute.xlu2 %632 }
 0x22a   : > { %636 = vst.msk [vmem:[#allocation2 + $0x4] sm:$0xf] %vm628_vm6, %v633_v16 }
 0x231   : > { %v644_v17 = vpop.permute.xlu2 %643  ;;  %v796_v18 = vld [vmem:[#allocation2 + $0x4] sm:$0xf] }
 0x232   : > { %647 = vst.msk [vmem:[#allocation2 + $0x8] sm:$0xf] %vm628_vm6, %v644_v17  ;;  %v806_v19 = vsel %vm742_vm7, %v796_v18, 0 }
 0x233   : > { %815 = vmatpush.bf16.xpose.msrb.mxu1 %v806_v19 }
 0x239   : > { %v855_v20 = vld [vmem:[#allocation2 + $0x8] sm:$0xf] }
 0x23a   : > { %v862_v21 = vsel %vm742_vm7, %v855_v20, 0 }
 0x23b   : > { %871 = vmatpush.bf16.xpose.msrb.mxu3 %v862_v21  ;;  %v857_v22 = vpop.permute.xlu2 %856 }
 0x241   : > { %v654_v23 = vpop.permute.xlu0 %653 }
 0x242   : > { %657 = vst.msk [vmem:[#allocation2 + $0xc] sm:$0xf] %vm628_vm6, %v654_v23  ;;  %1360 = vmatmul.msk.bf16.vlgmr.msrb.gmra.mxu3 %vm742_vm7, %v857_v22 }
 0x243   : > { %v913_v31 = vpop.permute.xlu2 %912 }
 0x249   : > { %v639_v24 = vpop.permute.xlu0 %638  ;;  %v911_v25 = vld [vmem:[#allocation2 + $0xc] sm:$0xf] }
 0x24a   : > { %642 = vst.msk [vmem:[#allocation3 + $0x4] sm:$0xf] %vm628_vm6, %v639_v24  ;;  %v918_v26 = vsel %vm742_vm7, %v911_v25, 0 }
 0x24b   : > { %927 = vmatpush.bf16.xpose.msra.mxu1 %v918_v26 }
 0x251   : > { %v832_v27 = vld [vmem:[#allocation3 + $0x4] sm:$0xf] }
 0x252   : > { %v837_v28 = vsel %vm776_vm8, %v832_v27, 0 }
 0x253   : > { %v801_v29 = vpop.permute.xlu1 %800  ;;  %846 = vmatpush.bf16.msrb.mxu2 %v837_v28  ;;  %v1410_v28 = vld [vmem:[#allocation9 + $0x8] sm:$0xff] }
 0x254   : > { %1358 = vmatmul.msk.bf16.vlgmr.msrb.gmra.mxu1 %vm742_vm7, %v801_v29  ;;  %1009 = vmatpush.bf16.msra.mxu3 %v1410_v28  ;;  %v1409_v29 = vld [vmem:[#allocation9] sm:$0xff] }
 0x258   : > { %1010 = vmatpush.bf16.msra.mxu3 %v1409_v29 }
 0x262   : > { %v758_v30 = vpop.f32.mrf.mxu3 }
 0x263   : > { %v762_v32 = vsel %vm742_vm7, %v758_v30, -inf }
 0x264   : > { %1362 = vmatmul.msk.bf16.vlgmr.msra.gmra.mxu1 %vm742_vm7, %v913_v31  ;;  %763 = vmax.xlane.f32.xlu1 %v762_v32 }
 0x26a   : > { %v760_v33 = vpop.f32.mrf.mxu3 }
 0x2c5   : > { %v873_v34 = vpop.f32.mrf.mxu3 }
 0x2c6   : > { %v877_v35 = vsel %vm742_vm7, %v873_v34, -inf }
 0x2c7   : > { %878 = vmax.xlane.f32.xlu1 %v877_v35 }
 0x2cd   : > { %v875_v36 = vpop.f32.mrf.mxu3 }
 0x2d1   : > { %v817_v37 = vpop.f32.mrf.mxu1 }
 0x2d2   : > { %v821_v38 = vsel %vm742_vm7, %v817_v37, -inf }
 0x2d3   : > { %822 = vmax.xlane.f32.xlu2 %v821_v38 }
 0x2d7   : > { %v764_v39 = vpop.xlane.xlu1 %763 }
 0x2d8   : > { %v765_v40 = vsub.f32 %v758_v30, %v764_v39 }
 0x2d9   : > { %v819_v41 = vpop.f32.mrf.mxu1 }
 0x2da   : > { %v766_v42 = vmul.f32 1.442695, %v765_v40 }
 0x2dc   : > { %1538 = vpow2.f32 %v766_v42 }
 0x2e1   : > { %v929_v43 = vpop.f32.mrf.mxu1 }
 0x2e2   : > { %v1539_v44 = vpop.eup %1538  ;;  %v933_v45 = vsel %vm742_vm7, %v929_v43, -inf }
 0x2e3   : > { %934 = vmax.xlane.f32.xlu0 %v933_v45  ;;  %v771_v46 = vpack.c.bf16 %v1539_v44, %v1539_v44  ;;  %v768_v48 = vsel %vm742_vm7, %v1539_v44, 0.0 }
 0x2e5   : > { %1357 = vmatmul.msk.bf16.vlgmr.msrb.gmra.mxu0 %vm742_vm7, %v771_v46 }
 0x2e9   : > { %v931_v47 = vpop.f32.mrf.mxu1 }
 0x2eb   : > { %658 = vrot.lane.b32.xlu2 %v1997_v3, %s1781_s17 }
 0x2f7   : > { %648 = vrot.lane.b32.xlu0 %v1997_v3, %s1783_s15  ;;  %s508_s15 = sand.u32 1, %s1756_s26  }
 0x321   : > { %769 = vadd.xlane.f32.xlu0 %v768_v48 }
 0x33a   : > { %v879_v49 = vpop.xlane.xlu1 %878 }
 0x33b   : > { %v880_v50 = vsub.f32 %v873_v34, %v879_v49  ;;  %v1412_v49 = vld [vmem:[#allocation10 + $0x8] sm:$0xff] }
 0x33d   : > { %v881_v51 = vmul.f32 1.442695, %v880_v50  ;;  %v1411_v50 = vld [vmem:[#allocation10] sm:$0xff] }
 0x33f   : > { %1540 = vpow2.f32 %v881_v51 }
 0x345   : > { %v1541_v52 = vpop.eup %1540 }
 0x346   : > { %v823_v53 = vpop.xlane.xlu2 %822  ;;  %v883_v54 = vsel %vm742_vm7, %v1541_v52, 0.0  ;;  %v886_v12 = vpack.c.bf16 %v1541_v52, %v1541_v52 }
 0x347   : > { %v824_v55 = vsub.f32 %v817_v37, %v823_v53  ;;  %884 = vadd.xlane.f32.xlu2 %v883_v54 }
 0x349   : > { %v825_v56 = vmul.f32 1.442695, %v824_v55 }
 0x34b   : > { %1542 = vpow2.f32 %v825_v56 }
 0x34e   : > { %v659_v57 = vpop.permute.xlu2 %658 }
 0x34f   : > { %662 = vst.msk [vmem:[#allocation3 + $0xc] sm:$0xf] %vm628_vm6, %v659_v57 }
 0x351   : > { %v1543_v58 = vpop.eup %1542 }
 0x352   : > { %v827_v59 = vsel %vm742_vm7, %v1543_v58, 0.0  ;;  %v830_v60 = vpack.c.bf16 %v1543_v58, %v1543_v58 }
 0x353   : > { %828 = vadd.xlane.f32.xlu1 %v827_v59 }
 0x354   : > { %1359 = vmatmul.msk.bf16.vlgmr.msrb.gmra.mxu2 %vm742_vm7, %v830_v60 }
 0x356   : > { %v935_v61 = vpop.xlane.xlu0 %934  ;;  %v944_v62 = vld [vmem:[#allocation3 + $0xc] sm:$0xf] }
 0x357   : > { %v936_v63 = vsub.f32 %v929_v43, %v935_v61  ;;  %v949_v1 = vsel %vm776_vm8, %v944_v62, 0  ;;  %v1524_v62 = vld [vmem:[%s2122_s7] ss:$0 sm:$0xff] }
 0x358   : > { %958 = vmatpush.bf16.msra.mxu2 %v949_v1 }
 0x359   : > { %v937_v2 = vmul.f32 1.442695, %v936_v63 }
 0x35b   : > { %1544 = vpow2.f32 %v937_v2  ;;  %v1525_v2 = vld [vmem:[%s2123_s8] ss:$0 sm:$0xff] }
 0x361   : > { %v1545_v3 = vpop.eup %1544 }
 0x362   : > { %v942_v4 = vpack.c.bf16 %v1545_v3, %v1545_v3  ;;  %v789_v5 = vpop.f32.mrf.mxu0  ;;  %v939_v6 = vsel %vm742_vm7, %v1545_v3, 0.0 }
 0x363   : > { %940 = vadd.xlane.f32.xlu1 %v939_v6  ;;  %v1526_v6 = vld [vmem:[%s2125_s10] ss:$0 sm:$0xff] }
 0x364   : > { %1363 = vmatmul.msk.bf16.vlgmr.msra.gmra.mxu2 %vm742_vm7, %v942_v4 }
 0x369   : > { %v649_v7 = vpop.permute.xlu0 %648 }
 0x36a   : > { %652 = vst.msk [vmem:[#allocation3 + $0x8] sm:$0xf] %vm628_vm6, %v649_v7  ;;  %v791_v9 = vpop.f32.mrf.mxu0 }
 0x371   : > { %v888_v10 = vld [vmem:[#allocation3 + $0x8] sm:$0xf] }
 0x372   : > { %v893_v11 = vsel %vm776_vm8, %v888_v10, 0 }
 0x373   : > { %902 = vmatpush.bf16.msra.mxu0 %v893_v11 }
 0x376   : > { %1361 = vmatmul.msk.bf16.vlgmr.msra.gmra.mxu0 %vm742_vm7, %v886_v12 }
 0x377   : > { %1082 = vmatpush.bf16.msrb.mxu0 %v1412_v49 }
 0x37b   : > { %1083 = vmatpush.bf16.msrb.mxu0 %v1411_v50 }
 0x394   : > { %v770_v30 = vpop.xlane.xlu0 %769 }
 0x3ba   : > { %v885_v22 = vpop.xlane.xlu2 %884 }
 0x3c6   : > { %v829_v13 = vpop.xlane.xlu1 %828 }
 0x3c7   : > { %1546 = vrcp.f32 %v829_v13 }
 0x3cd   : > { %v1547_v14 = vpop.eup %1546 }
 0x3d6   : > { %v941_v17 = vpop.xlane.xlu1 %940 }
 0x3d7   : > { %v848_v15 = vpop.f32.mrf.mxu2  ;;  %1548 = vrcp.f32 %v941_v17 }
 0x3d8   : > { %v853_v16 = vmul.f32 %v1547_v14, %v848_v15  ;;  %1550 = vrcp.f32 %v885_v22  ;;  %v1416_v15 = vld [vmem:[%s2126_s11 + $0x18] sm:$0xff] }
 0x3d9   : > { %1552 = vrcp.f32 %v770_v30  ;;  %1170 = vmatpush.bf16.msrb.mxu1 %v1416_v15 }
 0x3da   : > { %967 = vrot.lane.b32.xlu1 %v853_v16, %s1784_s5  ;;  %v1415_v16 = vld [vmem:[%s2126_s11 + $0x10] sm:$0xff]  ;;  %s1327_s5 = sshll.u32 %s508_s15, 3 }
 0x3db   : > { %s510_s23 = scalar_lea.vmem [#allocation12], %s1327_s5  ;;  %s1702_s5 = scalar_lea.hbm %s2157_s18, 16 }
 0x3dc   : > { %s1200_s14 = sshll.u32 %s510_s23, 4  ;;  %s1201_s14 = int_to_ptr.vmem [resolvable:$true] %s1200_s14 }
 0x3dd   : > { %v1549_v19 = vpop.eup %1548  ;;  %1171 = vmatpush.bf16.msrb.mxu1 %v1415_v16 }
 0x3de   : > { %v1551_v24 = vpop.eup %1550 }
 0x3df   : > { %v850_v18 = vpop.f32.mrf.mxu2  ;;  %v1553_v32 = vpop.eup %1552 }
 0x3e0   : > { %v794_v33 = vmul.f32 %v1553_v32, %v789_v5 }
 0x3e7   : > { %v960_v20 = vpop.f32.mrf.mxu2 }
 0x3e8   : > { %v965_v21 = vmul.f32 %v1549_v19, %v960_v20  ;;  %v1414_v19 = vld [vmem:[%s2126_s11 + $0x8] sm:$0xff] }
 0x3e9   : > { %1172 = vmatpush.bf16.msrb.mxu1 %v1414_v19 }
 0x3ea   : > { %975 = vrot.lane.b32.xlu2 %v965_v21, %s1785_s12  ;;  %s1400_s12 = sshll.u32 %s1764_s28, 3  ;;  %s1187_s28 = scalar_lea.sflag [#allocation6], %s508_s15 }
 0x3eb   : > { %s1198_s29 = scalar_lea.hbm %s2156_s27, %s1400_s12 }
 0x3ec   : > { %s1202_s16 = sshll.u32 %s1198_s29, 4  ;;  %s1203_s16 = int_to_ptr.hbm [resolvable:$true] %s1202_s16 }
 0x3ed   : > { %s1696_s19 = sshra.s32 %s1203_s16, 4  ;;  %s1697_s19 = int_to_ptr.hbm [resolvable:$true] %s1696_s19 }
 0x3ee   : > { %s1698_s17 = scalar_lea.hbm %s1697_s19, 8  ;;  %p1703_p5 = scmp.lt.s32.totalorder %s1697_s19, %s2157_s18 }
 0x3ef   : > { %v962_v23 = vpop.f32.mrf.mxu2  ;;  %p1699_p1 = scmp.ne.s32.totalorder %s1697_s19, %s1698_s17  ;;  %p1704_p6 = scmp.lt.s32.totalorder %s1702_s5, %s1698_s17 }
 0x3f1   : > { %p1700_p2 = pnand %p1699_p1, %p1897_p4  ;;  %p1705_p7 = por %p1704_p6, %p1703_p5 }
 0x3f3   : > { %v904_v25 = vpop.f32.mrf.mxu0  ;;  %p1701_p3 = pneg %p1700_p2 }
 0x3f4   : > { %v909_v26 = vmul.f32 %v1551_v24, %v904_v25  ;;  %v1413_v24 = vld [vmem:[%s2126_s11] sm:$0xff] }
 0x3f5   : > { %1173 = vmatpush.bf16.msrb.mxu1 %v1413_v24  ;;  %p1706_p9 = pnand %p1705_p7, %p1701_p3 }
 0x3f6   : > { %971 = vrot.lane.b32.xlu1 %v909_v26, %s1786_s13 }
 0x3fb   : > { %v906_v27 = vpop.f32.mrf.mxu0 }
 0x444   : > { %v976_v36 = vpop.permute.xlu2 %975 }
 0x44c   : > { %v968_v31 = vpop.permute.xlu1 %967 }
 0x44d   : > { %v978_v34 = vsel %vm742_vm7, %v794_v33, %v968_v31 }
 0x468   : > { %v972_v35 = vpop.permute.xlu1 %971 }
 0x469   : > { %v980_v37 = vsel %vm979_vm9, %v978_v34, %v972_v35 }
 0x46a   : > { %v982_v38 = vsel %vm981_vm10, %v980_v37, %v976_v36 }
 0x46b   : > { %v983_v39 = vpack.c.bf16 %v982_v38, %v982_v38 }
 0x46d   : > { %1372 = vmatmul.msk.bf16.vlgmr.msra.gmra.mxu3 %vm523_vm0, %v983_v39 }
 0x4f0   : > { %v1012_v40 = vpop.f32.mrf.mxu3 }
 0x4f1   : > { %v2044_v41 = vadd.f32 %v1012_v40, %v1967_v0 }
 0x4f3   : > { %v1019_v42 = vsel %vm523_vm0, %v2044_v41, 0.0 }
 0x4f4   : > { %1020 = vadd.xlane.f32.xlu1 %v1019_v42 }
 0x4f8   : > { %v1014_v43 = vpop.f32.mrf.mxu3 }
 0x567   : > { %v1021_v44 = vpop.xlane.xlu1 %1020 }
 0x568   : > { %v1022_v45 = vmul.f32 %v1021_v44, %v1971_v8 }
 0x56a   : > { %v1023_v46 = vsub.f32 %v2044_v41, %v1022_v45 }
 0x56c   : > { %v1024_v47 = vmul.f32 %v1023_v46, %v1023_v46 }
 0x56e   : > { %v1025_v48 = vsel %vm523_vm0, %v1024_v47, 0.0 }
 0x56f   : > { %1026 = vadd.xlane.f32.xlu0 %v1025_v48 }
 0x5e2   : > { %v1027_v0 = vpop.xlane.xlu0 %1026 }
 0x5e3   : > { %v1028_v51 = vmul.f32 0.032258064, %v1027_v0  ;;  %v1527_v0 = vld [vmem:[%s2158_s21] ss:$0 sm:$0xff] }
 0x5e5   : > { %1554 = vrsqrt.f32 %v1028_v51  ;;  %vm1036_vm11 = vcmp.eq.f32.partialorder %v1028_v51, inf  ;;  %v1039_v58 = vand.u32 2147483648, %v1028_v51  ;;  %vm1038_vm12 = vcmp.eq.f32.partialorder %v1028_v51, 0.0 }
 0x5eb   : > { %v1555_v52 = vpop.eup %1554 }
 0x5ec   : > { %v1030_v53 = vmul.f32 %v1555_v52, %v1028_v51 }
 0x5ee   : > { %v1031_v54 = vmul.f32 %v1555_v52, %v1030_v53 }
 0x5f0   : > { %v1032_v55 = vmul.f32 0.5, %v1031_v54 }
 0x5f2   : > { %v1033_v56 = vsub.f32 1.5, %v1032_v55 }
 0x5f4   : > { %v1034_v57 = vmul.f32 %v1555_v52, %v1033_v56 }
 0x5f6   : > { %v1035_v8 = vmul.f32 %v1034_v57, %v1028_v51 }
 0x5f8   : > { %v1037_v59 = vsel %vm1036_vm11, %v1028_v51, %v1035_v8 }
 0x5f9   : > { %v1040_v60 = vsel %vm1038_vm12, %v1039_v58, %v1037_v59 }
 0x5fa   : > { %v1041_v61 = vadd.f32 1e-06, %v1040_v60 }
 0x5fc   : > { %1556 = vrcp.f32 %v1041_v61 }
 0x602   : > { %v1557_v63 = vpop.eup %1556 }
 0x603   : > { %v1043_v1 = vmul.f32 %v1557_v63, %v1023_v46 }
 0x605   : > { %v1047_v3 = vmul.f32 %v1524_v62, %v1043_v1 }
 0x607   : > { %v1051_v4 = vadd.f32 %v1525_v2, %v1047_v3 }
 0x609   : > { %v1052_v5 = vpack.c.bf16 %v1051_v4, %v1051_v4 }
 0x60b   : > { %1381 = vmatmul.msk.bf16.vlgmr.msrb.gmra.mxu0 %vm523_vm0, %v1052_v5 }
 0x688   : > { %v1085_v7 = vpop.f32.mrf.mxu0 }
 0x689   : > { %v1086_v9 = vadd.f32 %v1526_v6, %v1085_v7 }
 0x68b   : > { %v1090_v10 = vmul.f32 0.70710677, %v1086_v9  ;;  %v1089_v47 = vmul.f32 0.5, %v1086_v9 }
 0x68d   : > { %v1091_v11 = vand.u32 2147483647, %v1090_v10  ;;  %vm1124_vm2 = vcmp.ge.f32.partialorder %v1090_v10, 0.0 }
 0x68f   : > { %v1092_v12 = vmul.f32 0.3275911, %v1091_v11  ;;  %v1118_v29 = vsub.f32 0.0, %v1091_v11 }
 0x690   : > { %v1087_v13 = vpop.f32.mrf.mxu0 }
 0x691   : > { %v1093_v14 = vadd.f32 1.0, %v1092_v12  ;;  %v1119_v32 = vmul.f32 %v1118_v29, %v1091_v11 }
 0x693   : > { %1558 = vrcp.f32 %v1093_v14  ;;  %v1105_v21 = vand.u32 2147483648, %v1093_v14  ;;  %v1103_v23 = vand.u32 2147483647, %v1093_v14  ;;  %vm1099_vm14 = vweird.f32 %v1093_v14 }
 0x694   : > { %v1120_v35 = vmul.f32 1.442695, %v1119_v32 }
 0x695   : > { %v1106_v26 = vor.u32 1.1754944e-38, %v1105_v21  ;;  %vm1104_vm1 = vcmp.eq.f32.partialorder %v1103_v23, 8.507059e+37 }
 0x696   : > { %1560 = vpow2.f32 %v1120_v35 }
 0x699   : > { %v1559_v17 = vpop.eup %1558 }
 0x69a   : > { %v1095_v18 = vmul.f32 %v1559_v17, %v1093_v14  ;;  %vm1100_vm13 = vweird.f32 %v1559_v17 }
 0x69b   : > { %vm1101_vm15 = vmor %vm1099_vm14, %vm1100_vm13 }
 0x69c   : > { %v1096_v20 = vsub.f32 1.0, %v1095_v18  ;;  %v1561_v42 = vpop.eup %1560 }
 0x69e   : > { %v1097_v22 = vmul.f32 %v1559_v17, %v1096_v20 }
 0x6a0   : > { %v1098_v25 = vadd.f32 %v1559_v17, %v1097_v22 }
 0x6a2   : > { %v1102_v27 = vsel %vm1101_vm15, %v1559_v17, %v1098_v25 }
 0x6a3   : > { %v1107_v28 = vsel %vm1104_vm1, %v1106_v26, %v1102_v27 }
 0x6a4   : > { %v1109_v30 = vmul.f32 1.0614054, %v1107_v28 }
 0x6a6   : > { %v1110_v31 = vadd.f32 -1.4531521, %v1109_v30 }
 0x6a8   : > { %v1111_v33 = vmul.f32 %v1110_v31, %v1107_v28 }
 0x6aa   : > { %v1112_v34 = vadd.f32 1.4214138, %v1111_v33 }
 0x6ac   : > { %v1113_v36 = vmul.f32 %v1112_v34, %v1107_v28 }
 0x6ae   : > { %v1114_v37 = vadd.f32 -0.28449672, %v1113_v36 }
 0x6b0   : > { %v1115_v38 = vmul.f32 %v1114_v37, %v1107_v28 }
 0x6b2   : > { %v1116_v39 = vadd.f32 0.2548296, %v1115_v38 }
 0x6b4   : > { %v1117_v40 = vmul.f32 %v1116_v39, %v1107_v28 }
 0x6b6   : > { %v1122_v43 = vmul.f32 %v1561_v42, %v1117_v40 }
 0x6b8   : > { %v1123_v44 = vsub.f32 1.0, %v1122_v43 }
 0x6ba   : > { %v1125_v45 = vsub.f32 0.0, %v1123_v44 }
 0x6bc   : > { %v1126_v46 = vsel %vm1124_vm2, %v1123_v44, %v1125_v45 }
 0x6bd   : > { %v1127_v48 = vadd.f32 1.0, %v1126_v46 }
 0x6bf   : > { %v1128_v49 = vmul.f32 %v1127_v48, %v1089_v47 }
 0x6c1   : > { %v1129_v50 = vpack.c.bf16 %v1128_v49, %v1128_v49 }
 0x6c3   : > { %1398 = vmatmul.msk.bf16.vlgmr.msrb.gmra.mxu1 %vm1162_vm3, %v1129_v50 }
 0x740   : > { %v1175_v51 = vpop.f32.mrf.mxu1 }
 0x741   : > { %v1179_v52 = vadd.f32 %v1175_v51, %v2044_v41 }
 0x743   : > { %v1184_v53 = vadd.f32 %v1527_v0, %v1179_v52 }
 0x745   : > { %1185 = vst.msk [vmem:[%s510_s23] sm:$0xff] %vm523_vm0, %v1184_v53 }
 0x746   : > { %1709 = shalt.err (!%p1706_p9)
}
 0x747   : > { %1433 = dma.vmem_to_hbm [thread:$0]  (%p1897_p4), %s1201_s14, 128, %s1203_s16, %s1187_s28  }
 0x748   : > { %v1177_v41 = vpop.f32.mrf.mxu1 }
 0x749 PF: > { %s2160_s15 = sld [smem:[#allocation20_spill]] }
 0x74a   : > { %s2161_s27 = sld [smem:[#allocation17_spill]] }
 0x74f   : > { %p1460_p10 = scmp.ge.s32.totalorder %s2160_s15, 2 }
 0x750   : > { %s1214_s30 = sand.u32 1, %s2161_s27  }
 0x751   : > { %p1449_p11 = pnand %p1460_p10, %p1904_p8  ;;  %s1215_s20 = scalar_lea.sflag [#allocation6], %s1214_s30 }
 0x753   : > { %p1450_p12 = pneg %p1449_p11 }
 0x755   : > { %1747 = dma.done.wait (%p1450_p12), %s1215_s20, 128  }
 0x756   : > { %1749 = vsyncadd (%p1450_p12), %s1215_s20, 4294967168  ;;  %s29_s30 = sadd.s32 1, %s2160_s15   ;;  %s2163_s21 = sld [smem:[#allocation18_spill]] }
 0x757   : > { %p26_p13 = scmp.ge.s32.totalorder %s29_s30, 4   ;;  %s2164_s27 = sld [smem:[#allocation24_spill]] }
 0x758   : > { %s2165_s28 = sld [smem:[#allocation19_spill]]  ;;  %s2167_s25 = smov %s1756_s26 }
 0x759   : > { %s2166_s29 = sld [smem:[#allocation21_spill]]  ;;  %28 = sbr.rel (!%p26_p13) target bundleno = 11 (0xb), region = 141 }
 0x75c   : > { %s2168_s26 = smov %s2163_s21 }
 0x75e   :  { %1221 = vsyncpa [#allocation5], 1 }
 0x75f   :  { %1223 = vsyncpa [#allocation5 + $0x1], 1 }
 0x760   :  { %1224 = vsyncpa [#allocation8], 1 }
 0x761   :  { %1225 = vsyncpa [#allocation11], 1 }
 0x762   :  { %1226 = vsyncpa [#allocation6], 1 }
 0x763   :  { %1228 = vsyncpa [#allocation6 + $0x1], 1 }

// kernel: tpu_custom_call.1
= control target key start
LH: loop header
LB: loop body
LE: loop exit
PB: predicated region body
PF: predicated region fallthrough
CT: control target
= control target key end

     0   :  { %s2115_s0 = inlined_call_operand.vmem [shape: f32[2,8,32], index: 0, kind: input, shape index: {}]   ;;  %s2116_s1 = inlined_call_operand.hbm [shape: f32[1,32], index: 1, kind: input, shape index: {}]   ;;  %s2117_s2 = inlined_call_operand.vmem [shape: f32[1,32], index: 2, kind: input, shape index: {}]   ;;  %s2118_s3 = inlined_call_operand.vmem [shape: bf16[32,32], index: 3, kind: input, shape index: {}]   ;;  %s2119_s4 = inlined_call_operand.vmem [shape: bf16[32,32], index: 4, kind: input, shape index: {}]   ;;  %s2120_s5 = inlined_call_operand.hbm [shape: bf16[32,32], index: 5, kind: input, shape index: {}]   ;;  %s2121_s6 = inlined_call_operand.hbm [shape: bf16[32,32], index: 6, kind: input, shape index: {}]   ;;  %s2122_s7 = inlined_call_operand.vmem [shape: f32[1,32], index: 7, kind: input, shape index: {}]   ;;  %s2123_s8 = inlined_call_operand.vmem [shape: f32[1,32], index: 8, kind: input, shape index: {}]   ;;  %s2124_s9 = inlined_call_operand.hbm [shape: bf16[32,64], index: 9, kind: input, shape index: {}]   ;;  %s2125_s10 = inlined_call_operand.vmem [shape: f32[1,64], index: 10, kind: input, shape index: {}]   ;;  %s2126_s11 = inlined_call_operand.vmem [shape: bf16[64,32], index: 11, kind: input, shape index: {}]   ;;  %s2127_s12 = inlined_call_operand.vmem [shape: f32[1,32], index: 12, kind: input, shape index: {}]   ;;  %s2128_s13 = inlined_call_operand.hbm [shape: f32[2,8,32], index: 13, kind: output, shape index: {}]  }
   0x1   :  { %2139 = sst [smem:[#allocation25_spill]] %s2120_s5 }
   0x2   :  { %2140 = sst [smem:[#allocation26_spill]] %s2127_s12 }
   0x3   :  { %2141 = sst [smem:[#allocation27_spill]] %s2128_s13 }
   0x4   :  { %18 = vsyncpa [#allocation5], 0 }
   0x5   :  { %19 = vsyncpa [#allocation8], 0 }
   0x6   :  { %20 = vsyncpa [#allocation11], 0 }
   0x7   :  { %21 = vsyncpa [#allocation6], 0 }
   0x8   :  { %23 = vsyncpa [#allocation6 + $0x1], 0  ;;  %s1857_s25 = smov 0   ;;  %s1859_s26 = smov 0  }
   0x9   :  { %s1861_s27 = smov 0   ;;  %s1863_s28 = smov 0  }
   0xa   :  { %s1865_s29 = smov 0   ;;  %s1867_s30 = smov 0  }
   0xb LB: > { %2142 = sst [smem:[#allocation17_spill]] %s1752_s25  ;;  %s1314_s14 = sadd.s32 4294967295, %s1772_s30   ;;  %s1772_s30 = sphi %s1867_s30, %s29_s30   ;;  %s1768_s29 = sphi %s1865_s29, %s2166_s29   ;;  %s1764_s28 = sphi %s1863_s28, %s2165_s28   ;;  %s1760_s27 = sphi %s1861_s27, %s2164_s27   ;;  %s1756_s26 = sphi %s1859_s26, %s2168_s26   ;;  %s1752_s25 = sphi %s1857_s25, %s2167_s25  }
   0xc   : > { %2143 = sst [smem:[#allocation18_spill]] %s1760_s27  ;;  %s1315_s15 = sadd.s32 4294967294, %s1772_s30  }
   0xd   : > { %2144 = sst [smem:[#allocation19_spill]] %s1768_s29  ;;  %s41_s16 = sadd.s32 1, %s1768_s29 }
   0xe   : > { %2145 = sst [smem:[#allocation20_spill]] %s1772_s30  ;;  %s328_s17 = sadd.s32 1, %s1760_s27 }
   0xf   : > { %p43_p0 = scmp.ge.s32.totalorder %s41_s16, 2  ;;  %p338_p1 = scmp.ne.s32.totalorder %s1760_s27, %s1756_s26 }
  0x10   : > { %p339_p2 = scmp.eq.s32.totalorder %s1314_s14, 1  ;;  %p344_p3 = scmp.ne.s32.totalorder %s1756_s26, %s1752_s25 }
  0x11   : > { %s2170_s16 = smov (%p43_p0, %s41_s16), 0  ;;  %p345_p5 = scmp.eq.s32.totalorder %s1315_s15, 1 }
  0x12   : > { %2146 = sst [smem:[#allocation21_spill]] %s2170_s16  ;;  %p1897_p4 = por %p339_p2, %p338_p1 }
  0x13   : > { %s323_s19 = ssub.s32 %s1768_s29, %s2170_s16  ;;  %p1316_p6 = scmp.ge.s32.totalorder %s1772_s30, 1 }
  0x14   : > { %s2147_s18 = scalar_select %p1897_p4, 1, 0 }
  0x15   : > { %p326_p7 = scmp.eq.s32.totalorder %s323_s19, 0  ;;  %p1904_p8 = por %p345_p5, %p344_p3 }
  0x16   : > { %2148 = sst [smem:[#allocation22_spill]] %s2147_s18  ;;  %p352_p9 = scmp.lt.s32.totalorder %s1772_s30, 3 }
  0x17   : > { %s2149_s20 = scalar_select %p1904_p8, 1, 0 }
  0x18   : > { %s1910_s21 = scalar_select %p326_p7, %s1760_s27, %s328_s17  }
  0x19   : > { %2150 = sst [smem:[#allocation23_spill]] %s2149_s20  ;;  %p1912_p10 = pnand %p1316_p6, %p352_p9 }
  0x1a   : > { %2151 = sst [smem:[#allocation24_spill]] %s1910_s21  ;;  %p1916_p11 = scmp.eq.s32.totalorder %s1314_s14, 0 }
  0x1b   : > { %s2154_s5 = sld [smem:[#allocation25_spill]]  ;;  %p1435_p12 = pneg %p1912_p10 }
  0x1c   : > { %s1774_s16 = smov [#allocation7]   ;;  %s1775_s14 = smov 64  }
  0x1d   : > { %s386_s17 = sshll.u32 %s1774_s16, 4  ;;  %p1927_p13 = pnand %p1916_p11, %p1435_p12  ;;  %s387_s17 = int_to_ptr.vmem [resolvable:$true] %s386_s17 }
  0x1e   : > { %s1776_s21 = smov 4   ;;  %s1777_s16 = smov [#allocation4]  }
  0x1f   : > { %s366_s27 = sshll.u32 %s1777_s16, 4  ;;  %s398_s30 = sshll.u32 %s2121_s6, 4  ;;  %s367_s27 = int_to_ptr.vmem [resolvable:$true] %s366_s27  ;;  %s399_s30 = int_to_ptr.hbm [resolvable:$true] %s398_s30 }
  0x20   : > { %s1778_s18 = smov [#allocation9]   ;;  %s1779_s24 = smov [#allocation10]  }
  0x21   : > { %s384_s19 = sshll.u32 %s2154_s5, 4  ;;  %s364_s5 = sshll.u32 %s2116_s1, 4  ;;  %s385_s19 = int_to_ptr.hbm [resolvable:$true] %s384_s19  ;;  %s365_s5 = int_to_ptr.hbm [resolvable:$true] %s364_s5 }
  0x22   : > { %1441 = dma.hbm_to_vmem [thread:$0]  (!%p1927_p13), %s385_s19, 256, %s387_s17, [#allocation8], %s1775_s14, %s1775_s14, %s1776_s21  }
  0x23   : > { %1438 = dma.hbm_to_vmem [thread:$0]  (!%p1927_p13), %s365_s5, 16, %s367_s27, [#allocation5]  }
  0x24   : > { %s400_s12 = sshll.u32 %s1778_s18, 4  ;;  %s418_s17 = sshll.u32 %s2124_s9, 4  ;;  %s401_s12 = int_to_ptr.vmem [resolvable:$true] %s400_s12  ;;  %s419_s17 = int_to_ptr.hbm [resolvable:$true] %s418_s17 }
  0x25   : > { %1444 = dma.hbm_to_vmem [thread:$0]  (!%p1927_p13), %s399_s30, 256, %s401_s12, [#allocation8], %s1775_s14, %s1775_s14, %s1776_s21  }
  0x26   : > { %s420_s15 = sshll.u32 %s1779_s24, 4  ;;  %452 = sbr.rel (%p1912_p10) target bundleno = 1865 (0x749), region = 72  ;;  %s421_s15 = int_to_ptr.vmem [resolvable:$true] %s420_s15 }
  0x27   : > { %1447 = dma.hbm_to_vmem [thread:$0]  (!%p1927_p13), %s419_s17, 256, %s421_s15, [#allocation11], %s1775_s14, %s1775_s14, %s1776_s21  }
  0x2b   : > { %1735 = dma.done.wait (%p1916_p11), [#allocation5], 16  }
  0x2c   : > { %1737 = vsyncadd (%p1916_p11), [#allocation5], 4294967280 }
  0x2d   : > { %1739 = dma.done.wait (%p1916_p11), [#allocation8], 512  }
  0x2e   : > { %1741 = vsyncadd (%p1916_p11), [#allocation8], 4294966784 }
  0x2f   : > { %1743 = dma.done.wait (%p1916_p11), [#allocation11], 256  }
  0x30   : > { %1745 = vsyncadd (%p1916_p11), [#allocation11], 4294967040  ;;  %p511_p0 = scmp.lt.s32.totalorder %s1764_s28, 1  ;;  %vm523_vm0 = vcmask 261120   ;;  %v1780_v2 = vmov 32.0   ;;  %v1404_v19 = vld [vmem:[%s2119_s4 + $0x8] sm:$0xff] }
  0x31   : > { %1528 = vrcp.f32 %v1780_v2  ;;  %v1406_v20 = vld [vmem:[#allocation7 + $0x8] sm:$0xff]  ;;  %590 = vmatpush.bf16.msra.mxu0 %v1404_v19  ;;  %v1403_v21 = vld [vmem:[%s2119_s4] sm:$0xff]  ;;  %vm628_vm6 = vcmask 60416   ;;  %s1781_s17 = smov 104   ;;  %s1782_s24 = smov 120   ;;  %vm742_vm7 = vcmask 64512  }
  0x32   : > { %s512_s5 = scalar_select %p511_p0, %s1764_s28, 1  ;;  %620 = vmatpush.bf16.msra.mxu1 %v1406_v20  ;;  %v1405_v22 = vld [vmem:[#allocation7] sm:$0xff]  ;;  %v1522_v49 = vld [vmem:[#allocation4] ss:$0 sm:$0xff]  ;;  %vm776_vm8 = vcmask 1043456   ;;  %vm979_vm9 = vcmask 130048  }
  0x33   : > { %v1408_v26 = vld [vmem:[%s2118_s3 + $0x8] sm:$0xff]  ;;  %v1407_v30 = vld [vmem:[%s2118_s3] sm:$0xff]  ;;  %s1783_s15 = smov 112   ;;  %s1786_s13 = smov 16   ;;  %vm981_vm10 = vcmask 195584  }
  0x34   : > { %s1328_s12 = sshll.u32 %s512_s5, 3  ;;  %733 = vmatpush.bf16.msra.mxu2 %v1408_v26  ;;  %v1523_v54 = vld [vmem:[%s2117_s2] ss:$0 sm:$0xff]  ;;  %s1784_s5 = smov 8  }
  0x35   : > { %s514_s27 = scalar_lea.vmem %s2115_s0, %s1328_s12  ;;  %591 = vmatpush.bf16.msra.mxu0 %v1403_v21  ;;  %s1785_s12 = smov 24  }
  0x36   : > { %v1967_v0 = vld [vmem:[%s514_s27] sm:$0xff]  ;;  %621 = vmatpush.bf16.msra.mxu1 %v1405_v22  ;;  %s2156_s27 = sld [smem:[#allocation27_spill]] }
  0x37   : > { %v524_v1 = vsel %vm523_vm0, %v1967_v0, 0.0  ;;  %v1529_v3 = vpop.eup %1528  ;;  %s2158_s21 = sld [smem:[#allocation26_spill]] }
  0x38   : > { %525 = vadd.xlane.f32.xlu0 %v524_v1  ;;  %v528_v4 = vmul.f32 32.0, %v1529_v3  ;;  %vm532_vm1 = vweird.f32 %v1529_v3  ;;  %734 = vmatpush.bf16.msra.mxu2 %v1407_v30 }
  0x3a   : > { %v529_v5 = vsub.f32 1.0, %v528_v4 }
  0x3c   : > { %v530_v6 = vmul.f32 %v1529_v3, %v529_v5  ;;  %s2157_s18 = smov %s2156_s27 }
  0x3e   : > { %v531_v7 = vadd.f32 %v1529_v3, %v530_v6 }
  0x40   : > { %668 = vadd.xlane.f32.xlu0 %v524_v1  ;;  %v1971_v8 = vsel %vm532_vm1, %v1529_v3, %v531_v7 }
  0xab   : > { %v526_v9 = vpop.xlane.xlu0 %525 }
  0xac   : > { %v534_v10 = vmul.f32 %v1971_v8, %v526_v9 }
  0xae   : > { %v535_v11 = vsub.f32 %v1967_v0, %v534_v10 }
  0xb0   : > { %v536_v12 = vmul.f32 %v535_v11, %v535_v11 }
  0xb2   : > { %v537_v13 = vsel %vm523_vm0, %v536_v12, 0.0 }
  0xb3   : > { %538 = vadd.xlane.f32.xlu1 %v537_v13  ;;  %v669_v14 = vpop.xlane.xlu0 %668 }
  0xb4   : > { %v677_v15 = vmul.f32 %v669_v14, %v1971_v8 }
  0xb6   : > { %v678_v16 = vsub.f32 %v1967_v0, %v677_v15 }
  0xb8   : > { %v679_v17 = vmul.f32 %v678_v16, %v678_v16 }
  0xba   : > { %v680_v18 = vsel %vm523_vm0, %v679_v17, 0.0 }
  0xbb   : > { %681 = vadd.xlane.f32.xlu1 %v680_v18 }
 0x126   : > { %v539_v23 = vpop.xlane.xlu1 %538 }
 0x127   : > { %v540_v24 = vmul.f32 0.032258064, %v539_v23 }
 0x129   : > { %1530 = vrsqrt.f32 %v540_v24  ;;  %vm548_vm2 = vcmp.eq.f32.partialorder %v540_v24, inf  ;;  %v551_v39 = vand.u32 2147483648, %v540_v24  ;;  %vm550_vm3 = vcmp.eq.f32.partialorder %v540_v24, 0.0 }
 0x12e   : > { %v682_v25 = vpop.xlane.xlu1 %681 }
 0x12f   : > { %v1531_v27 = vpop.eup %1530  ;;  %v683_v28 = vmul.f32 0.032258064, %v682_v25 }
 0x130   : > { %v542_v29 = vmul.f32 %v1531_v27, %v540_v24 }
 0x131   : > { %1532 = vrsqrt.f32 %v683_v28  ;;  %vm691_vm4 = vcmp.eq.f32.partialorder %v683_v28, inf  ;;  %v694_v47 = vand.u32 2147483648, %v683_v28  ;;  %vm693_vm5 = vcmp.eq.f32.partialorder %v683_v28, 0.0 }
 0x132   : > { %v543_v31 = vmul.f32 %v1531_v27, %v542_v29 }
 0x134   : > { %v544_v32 = vmul.f32 0.5, %v543_v31 }
 0x136   : > { %v545_v33 = vsub.f32 1.5, %v544_v32 }
 0x137   : > { %v1533_v34 = vpop.eup %1532 }
 0x138   : > { %v685_v35 = vmul.f32 %v1533_v34, %v683_v28  ;;  %v546_v36 = vmul.f32 %v1531_v27, %v545_v33 }
 0x13a   : > { %v686_v37 = vmul.f32 %v1533_v34, %v685_v35  ;;  %v547_v38 = vmul.f32 %v546_v36, %v540_v24 }
 0x13c   : > { %v549_v40 = vsel %vm548_vm2, %v540_v24, %v547_v38  ;;  %v687_v41 = vmul.f32 0.5, %v686_v37 }
 0x13d   : > { %v552_v42 = vsel %vm550_vm3, %v551_v39, %v549_v40  ;;  %vm1162_vm3 = vcmask 523264  }
 0x13e   : > { %v553_v43 = vadd.f32 1e-06, %v552_v42  ;;  %v688_v44 = vsub.f32 1.5, %v687_v41 }
 0x140   : > { %1534 = vrcp.f32 %v553_v43  ;;  %v689_v45 = vmul.f32 %v1533_v34, %v688_v44 }
 0x142   : > { %v690_v46 = vmul.f32 %v689_v45, %v683_v28 }
 0x144   : > { %v692_v48 = vsel %vm691_vm4, %v683_v28, %v690_v46 }
 0x145   : > { %v695_v50 = vsel %vm693_vm5, %v694_v47, %v692_v48 }
 0x146   : > { %v1535_v51 = vpop.eup %1534  ;;  %v696_v52 = vadd.f32 1e-06, %v695_v50 }
 0x147   : > { %v555_v53 = vmul.f32 %v1535_v51, %v535_v11 }
 0x148   : > { %1536 = vrcp.f32 %v696_v52 }
 0x149   : > { %v559_v55 = vmul.f32 %v1522_v49, %v555_v53 }
 0x14b   : > { %v563_v56 = vadd.f32 %v1523_v54, %v559_v55 }
 0x14d   : > { %v564_v57 = vpack.c.bf16 %v563_v56, %v563_v56 }
 0x14e   : > { %v1537_v58 = vpop.eup %1536 }
 0x14f   : > { %1337 = vmatmul.msk.bf16.vlgmr.msra.gmra.mxu0 %vm523_vm0, %v564_v57  ;;  %1346 = vmatmul.msk.bf16.vlgmr.msra.gmra.mxu1 %vm523_vm0, %v564_v57  ;;  %v698_v59 = vmul.f32 %v1537_v58, %v678_v16 }
 0x151   : > { %v702_v60 = vmul.f32 %v1522_v49, %v698_v59 }
 0x153   : > { %v706_v61 = vadd.f32 %v1523_v54, %v702_v60 }
 0x155   : > { %v707_v62 = vpack.c.bf16 %v706_v61, %v706_v61 }
 0x157   : > { %1355 = vmatmul.msk.bf16.vlgmr.msra.gmra.mxu2 %vm523_vm0, %v707_v62 }
 0x1cc   : > { %v593_v63 = vpop.f32.mrf.mxu0  ;;  %v623_v1 = vpop.f32.mrf.mxu1 }
 0x1cd   : > { %v597_v2 = vpack.c.bf16 %v593_v63, %v593_v63  ;;  %v1997_v3 = vpack.c.bf16 %v623_v1, %v623_v1 }
 0x1cf   : > { %629 = vst.msk [vmem:[#allocation2] sm:$0xf] %vm628_vm6, %v597_v2  ;;  %653 = vrot.lane.b32.xlu0 %v597_v2, %s1781_s17  ;;  %632 = vrot.lane.b32.xlu2 %v597_v2, %s1782_s24 }
 0x1d0   : > { %630 = vst.msk [vmem:[#allocation3] sm:$0xf] %vm628_vm6, %v1997_v3 }
 0x1d4   : > { %v595_v4 = vpop.f32.mrf.mxu0  ;;  %v625_v5 = vpop.f32.mrf.mxu1 }
 0x1d6   : > { %v741_v6 = vld [vmem:[#allocation2] sm:$0xf] }
 0x1d7   : > { %638 = vrot.lane.b32.xlu0 %v1997_v3, %s1782_s24  ;;  %643 = vrot.lane.b32.xlu2 %v597_v2, %s1783_s15  ;;  %v747_v7 = vsel %vm742_vm7, %v741_v6, 0  ;;  %v772_v9 = vld [vmem:[#allocation3] sm:$0xf] }
 0x1d8   : > { %756 = vmatpush.bf16.xpose.msra.mxu3 %v747_v7  ;;  %v778_v10 = vsel %vm776_vm8, %v772_v9, 0 }
 0x1d9   : > { %787 = vmatpush.bf16.msrb.mxu0 %v778_v10 }
 0x1da   : > { %v736_v11 = vpop.f32.mrf.mxu2 }
 0x1db   : > { %v740_v12 = vpack.c.bf16 %v736_v11, %v736_v11 }
 0x1dd   : > { %v798_v13 = vunpack.c.l.b16 %v740_v12 }
 0x1df   : > { %v799_v14 = vpack.c.b16 %v798_v13, %v798_v13  ;;  %1356 = vmatmul.msk.bf16.vlgmr.msra.gmra.mxu3 %vm742_vm7, %v740_v12 }
 0x1e1   : > { %800 = vrot.lane.b32.xlu1 %v799_v14, %s1782_s24  ;;  %856 = vrot.lane.b32.xlu2 %v799_v14, %s1783_s15 }
 0x1e2   : > { %v738_v15 = vpop.f32.mrf.mxu2 }
 0x1e9   : > { %912 = vrot.lane.b32.xlu2 %v799_v14, %s1781_s17 }
 0x229   : > { %v633_v16 = vpop.permute.xlu2 %632 }
 0x22a   : > { %636 = vst.msk [vmem:[#allocation2 + $0x4] sm:$0xf] %vm628_vm6, %v633_v16 }
 0x231   : > { %v644_v17 = vpop.permute.xlu2 %643  ;;  %v796_v18 = vld [vmem:[#allocation2 + $0x4] sm:$0xf] }
 0x232   : > { %647 = vst.msk [vmem:[#allocation2 + $0x8] sm:$0xf] %vm628_vm6, %v644_v17  ;;  %v806_v19 = vsel %vm742_vm7, %v796_v18, 0 }
 0x233   : > { %815 = vmatpush.bf16.xpose.msrb.mxu1 %v806_v19 }
 0x239   : > { %v855_v20 = vld [vmem:[#allocation2 + $0x8] sm:$0xf] }
 0x23a   : > { %v862_v21 = vsel %vm742_vm7, %v855_v20, 0 }
 0x23b   : > { %871 = vmatpush.bf16.xpose.msrb.mxu3 %v862_v21  ;;  %v857_v22 = vpop.permute.xlu2 %856 }
 0x241   : > { %v654_v23 = vpop.permute.xlu0 %653 }
 0x242   : > { %657 = vst.msk [vmem:[#allocation2 + $0xc] sm:$0xf] %vm628_vm6, %v654_v23  ;;  %1360 = vmatmul.msk.bf16.vlgmr.msrb.gmra.mxu3 %vm742_vm7, %v857_v22 }
 0x243   : > { %v913_v31 = vpop.permute.xlu2 %912 }
 0x249   : > { %v639_v24 = vpop.permute.xlu0 %638  ;;  %v911_v25 = vld [vmem:[#allocation2 + $0xc] sm:$0xf] }
 0x24a   : > { %642 = vst.msk [vmem:[#allocation3 + $0x4] sm:$0xf] %vm628_vm6, %v639_v24  ;;  %v918_v26 = vsel %vm742_vm7, %v911_v25, 0 }
 0x24b   : > { %927 = vmatpush.bf16.xpose.msra.mxu1 %v918_v26 }
 0x251   : > { %v832_v27 = vld [vmem:[#allocation3 + $0x4] sm:$0xf] }
 0x252   : > { %v837_v28 = vsel %vm776_vm8, %v832_v27, 0 }
 0x253   : > { %v801_v29 = vpop.permute.xlu1 %800  ;;  %846 = vmatpush.bf16.msrb.mxu2 %v837_v28  ;;  %v1410_v28 = vld [vmem:[#allocation9 + $0x8] sm:$0xff] }
 0x254   : > { %1358 = vmatmul.msk.bf16.vlgmr.msrb.gmra.mxu1 %vm742_vm7, %v801_v29  ;;  %1009 = vmatpush.bf16.msra.mxu3 %v1410_v28  ;;  %v1409_v29 = vld [vmem:[#allocation9] sm:$0xff] }
 0x258   : > { %1010 = vmatpush.bf16.msra.mxu3 %v1409_v29 }
 0x262   : > { %v758_v30 = vpop.f32.mrf.mxu3 }
 0x263   : > { %v762_v32 = vsel %vm742_vm7, %v758_v30, -inf }
 0x264   : > { %1362 = vmatmul.msk.bf16.vlgmr.msra.gmra.mxu1 %vm742_vm7, %v913_v31  ;;  %763 = vmax.xlane.f32.xlu1 %v762_v32 }
 0x26a   : > { %v760_v33 = vpop.f32.mrf.mxu3 }
 0x2c5   : > { %v873_v34 = vpop.f32.mrf.mxu3 }
 0x2c6   : > { %v877_v35 = vsel %vm742_vm7, %v873_v34, -inf }
 0x2c7   : > { %878 = vmax.xlane.f32.xlu1 %v877_v35 }
 0x2cd   : > { %v875_v36 = vpop.f32.mrf.mxu3 }
 0x2d1   : > { %v817_v37 = vpop.f32.mrf.mxu1 }
 0x2d2   : > { %v821_v38 = vsel %vm742_vm7, %v817_v37, -inf }
 0x2d3   : > { %822 = vmax.xlane.f32.xlu2 %v821_v38 }
 0x2d7   : > { %v764_v39 = vpop.xlane.xlu1 %763 }
 0x2d8   : > { %v765_v40 = vsub.f32 %v758_v30, %v764_v39 }
 0x2d9   : > { %v819_v41 = vpop.f32.mrf.mxu1 }
 0x2da   : > { %v766_v42 = vmul.f32 1.442695, %v765_v40 }
 0x2dc   : > { %1538 = vpow2.f32 %v766_v42 }
 0x2e1   : > { %v929_v43 = vpop.f32.mrf.mxu1 }
 0x2e2   : > { %v1539_v44 = vpop.eup %1538  ;;  %v933_v45 = vsel %vm742_vm7, %v929_v43, -inf }
 0x2e3   : > { %934 = vmax.xlane.f32.xlu0 %v933_v45  ;;  %v771_v46 = vpack.c.bf16 %v1539_v44, %v1539_v44  ;;  %v768_v48 = vsel %vm742_vm7, %v1539_v44, 0.0 }
 0x2e5   : > { %1357 = vmatmul.msk.bf16.vlgmr.msrb.gmra.mxu0 %vm742_vm7, %v771_v46 }
 0x2e9   : > { %v931_v47 = vpop.f32.mrf.mxu1 }
 0x2eb   : > { %658 = vrot.lane.b32.xlu2 %v1997_v3, %s1781_s17 }
 0x2f7   : > { %648 = vrot.lane.b32.xlu0 %v1997_v3, %s1783_s15  ;;  %s508_s15 = sand.u32 1, %s1756_s26  }
 0x321   : > { %769 = vadd.xlane.f32.xlu0 %v768_v48 }
 0x33a   : > { %v879_v49 = vpop.xlane.xlu1 %878 }
 0x33b   : > { %v880_v50 = vsub.f32 %v873_v34, %v879_v49  ;;  %v1412_v49 = vld [vmem:[#allocation10 + $0x8] sm:$0xff] }
 0x33d   : > { %v881_v51 = vmul.f32 1.442695, %v880_v50  ;;  %v1411_v50 = vld [vmem:[#allocation10] sm:$0xff] }
 0x33f   : > { %1540 = vpow2.f32 %v881_v51 }
 0x345   : > { %v1541_v52 = vpop.eup %1540 }
 0x346   : > { %v823_v53 = vpop.xlane.xlu2 %822  ;;  %v883_v54 = vsel %vm742_vm7, %v1541_v52, 0.0  ;;  %v886_v12 = vpack.c.bf16 %v1541_v52, %v1541_v52 }
 0x347   : > { %v824_v55 = vsub.f32 %v817_v37, %v823_v53  ;;  %884 = vadd.xlane.f32.xlu2 %v883_v54 }
 0x349   : > { %v825_v56 = vmul.f32 1.442695, %v824_v55 }
 0x34b   : > { %1542 = vpow2.f32 %v825_v56 }
 0x34e   : > { %v659_v57 = vpop.permute.xlu2 %658 }
 0x34f   : > { %662 = vst.msk [vmem:[#allocation3 + $0xc] sm:$0xf] %vm628_vm6, %v659_v57 }
 0x351   : > { %v1543_v58 = vpop.eup %1542 }
 0x352   : > { %v827_v59 = vsel %vm742_vm7, %v1543_v58, 0.0  ;;  %v830_v60 = vpack.c.bf16 %v1543_v58, %v1543_v58 }
 0x353   : > { %828 = vadd.xlane.f32.xlu1 %v827_v59 }
 0x354   : > { %1359 = vmatmul.msk.bf16.vlgmr.msrb.gmra.mxu2 %vm742_vm7, %v830_v60 }
 0x356   : > { %v935_v61 = vpop.xlane.xlu0 %934  ;;  %v944_v62 = vld [vmem:[#allocation3 + $0xc] sm:$0xf] }
 0x357   : > { %v936_v63 = vsub.f32 %v929_v43, %v935_v61  ;;  %v949_v1 = vsel %vm776_vm8, %v944_v62, 0  ;;  %v1524_v62 = vld [vmem:[%s2122_s7] ss:$0 sm:$0xff] }
 0x358   : > { %958 = vmatpush.bf16.msra.mxu2 %v949_v1 }
 0x359   : > { %v937_v2 = vmul.f32 1.442695, %v936_v63 }
 0x35b   : > { %1544 = vpow2.f32 %v937_v2  ;;  %v1525_v2 = vld [vmem:[%s2123_s8] ss:$0 sm:$0xff] }
 0x361   : > { %v1545_v3 = vpop.eup %1544 }
 0x362   : > { %v942_v4 = vpack.c.bf16 %v1545_v3, %v1545_v3  ;;  %v789_v5 = vpop.f32.mrf.mxu0  ;;  %v939_v6 = vsel %vm742_vm7, %v1545_v3, 0.0 }
 0x363   : > { %940 = vadd.xlane.f32.xlu1 %v939_v6  ;;  %v1526_v6 = vld [vmem:[%s2125_s10] ss:$0 sm:$0xff] }
 0x364   : > { %1363 = vmatmul.msk.bf16.vlgmr.msra.gmra.mxu2 %vm742_vm7, %v942_v4 }
 0x369   : > { %v649_v7 = vpop.permute.xlu0 %648 }
 0x36a   : > { %652 = vst.msk [vmem:[#allocation3 + $0x8] sm:$0xf] %vm628_vm6, %v649_v7  ;;  %v791_v9 = vpop.f32.mrf.mxu0 }
 0x371   : > { %v888_v10 = vld [vmem:[#allocation3 + $0x8] sm:$0xf] }
 0x372   : > { %v893_v11 = vsel %vm776_vm8, %v888_v10, 0 }
 0x373   : > { %902 = vmatpush.bf16.msra.mxu0 %v893_v11 }
 0x376   : > { %1361 = vmatmul.msk.bf16.vlgmr.msra.gmra.mxu0 %vm742_vm7, %v886_v12 }
 0x377   : > { %1082 = vmatpush.bf16.msrb.mxu0 %v1412_v49 }
 0x37b   : > { %1083 = vmatpush.bf16.msrb.mxu0 %v1411_v50 }
 0x394   : > { %v770_v30 = vpop.xlane.xlu0 %769 }
 0x3ba   : > { %v885_v22 = vpop.xlane.xlu2 %884 }
 0x3c6   : > { %v829_v13 = vpop.xlane.xlu1 %828 }
 0x3c7   : > { %1546 = vrcp.f32 %v829_v13 }
 0x3cd   : > { %v1547_v14 = vpop.eup %1546 }
 0x3d6   : > { %v941_v17 = vpop.xlane.xlu1 %940 }
 0x3d7   : > { %v848_v15 = vpop.f32.mrf.mxu2  ;;  %1548 = vrcp.f32 %v941_v17 }
 0x3d8   : > { %v853_v16 = vmul.f32 %v1547_v14, %v848_v15  ;;  %1550 = vrcp.f32 %v885_v22  ;;  %v1416_v15 = vld [vmem:[%s2126_s11 + $0x18] sm:$0xff] }
 0x3d9   : > { %1552 = vrcp.f32 %v770_v30  ;;  %1170 = vmatpush.bf16.msrb.mxu1 %v1416_v15 }
 0x3da   : > { %967 = vrot.lane.b32.xlu1 %v853_v16, %s1784_s5  ;;  %v1415_v16 = vld [vmem:[%s2126_s11 + $0x10] sm:$0xff]  ;;  %s1327_s5 = sshll.u32 %s508_s15, 3 }
 0x3db   : > { %s510_s23 = scalar_lea.vmem [#allocation12], %s1327_s5  ;;  %s1702_s5 = scalar_lea.hbm %s2157_s18, 16 }
 0x3dc   : > { %s1200_s14 = sshll.u32 %s510_s23, 4  ;;  %s1201_s14 = int_to_ptr.vmem [resolvable:$true] %s1200_s14 }
 0x3dd   : > { %v1549_v19 = vpop.eup %1548  ;;  %1171 = vmatpush.bf16.msrb.mxu1 %v1415_v16 }
 0x3de   : > { %v1551_v24 = vpop.eup %1550 }
 0x3df   : > { %v850_v18 = vpop.f32.mrf.mxu2  ;;  %v1553_v32 = vpop.eup %1552 }
 0x3e0   : > { %v794_v33 = vmul.f32 %v1553_v32, %v789_v5 }
 0x3e7   : > { %v960_v20 = vpop.f32.mrf.mxu2 }
 0x3e8   : > { %v965_v21 = vmul.f32 %v1549_v19, %v960_v20  ;;  %v1414_v19 = vld [vmem:[%s2126_s11 + $0x8] sm:$0xff] }
 0x3e9   : > { %1172 = vmatpush.bf16.msrb.mxu1 %v1414_v19 }
 0x3ea   : > { %975 = vrot.lane.b32.xlu2 %v965_v21, %s1785_s12  ;;  %s1400_s12 = sshll.u32 %s1764_s28, 3  ;;  %s1187_s28 = scalar_lea.sflag [#allocation6], %s508_s15 }
 0x3eb   : > { %s1198_s29 = scalar_lea.hbm %s2156_s27, %s1400_s12 }
 0x3ec   : > { %s1202_s16 = sshll.u32 %s1198_s29, 4  ;;  %s1203_s16 = int_to_ptr.hbm [resolvable:$true] %s1202_s16 }
 0x3ed   : > { %s1696_s19 = sshra.s32 %s1203_s16, 4  ;;  %s1697_s19 = int_to_ptr.hbm [resolvable:$true] %s1696_s19 }
 0x3ee   : > { %s1698_s17 = scalar_lea.hbm %s1697_s19, 8  ;;  %p1703_p5 = scmp.lt.s32.totalorder %s1697_s19, %s2157_s18 }
 0x3ef   : > { %v962_v23 = vpop.f32.mrf.mxu2  ;;  %p1699_p1 = scmp.ne.s32.totalorder %s1697_s19, %s1698_s17  ;;  %p1704_p6 = scmp.lt.s32.totalorder %s1702_s5, %s1698_s17 }
 0x3f1   : > { %p1700_p2 = pnand %p1699_p1, %p1897_p4  ;;  %p1705_p7 = por %p1704_p6, %p1703_p5 }
 0x3f3   : > { %v904_v25 = vpop.f32.mrf.mxu0  ;;  %p1701_p3 = pneg %p1700_p2 }
 0x3f4   : > { %v909_v26 = vmul.f32 %v1551_v24, %v904_v25  ;;  %v1413_v24 = vld [vmem:[%s2126_s11] sm:$0xff] }
 0x3f5   : > { %1173 = vmatpush.bf16.msrb.mxu1 %v1413_v24  ;;  %p1706_p9 = pnand %p1705_p7, %p1701_p3 }
 0x3f6   : > { %971 = vrot.lane.b32.xlu1 %v909_v26, %s1786_s13 }
 0x3fb   : > { %v906_v27 = vpop.f32.mrf.mxu0 }
 0x444   : > { %v976_v36 = vpop.permute.xlu2 %975 }
 0x44c   : > { %v968_v31 = vpop.permute.xlu1 %967 }
 0x44d   : > { %v978_v34 = vsel %vm742_vm7, %v794_v33, %v968_v31 }
 0x468   : > { %v972_v35 = vpop.permute.xlu1 %971 }
 0x469   : > { %v980_v37 = vsel %vm979_vm9, %v978_v34, %v972_v35 }
 0x46a   : > { %v982_v38 = vsel %vm981_vm10, %v980_v37, %v976_v36 }
 0x46b   : > { %v983_v39 = vpack.c.bf16 %v982_v38, %v982_v38 }
 0x46d   : > { %1372 = vmatmul.msk.bf16.vlgmr.msra.gmra.mxu3 %vm523_vm0, %v983_v39 }
 0x4f0   : > { %v1012_v40 = vpop.f32.mrf.mxu3 }
 0x4f1   : > { %v2044_v41 = vadd.f32 %v1012_v40, %v1967_v0 }
 0x4f3   : > { %v1019_v42 = vsel %vm523_vm0, %v2044_v41, 0.0 }
 0x4f4   : > { %1020 = vadd.xlane.f32.xlu1 %v1019_v42 }
 0x4f8   : > { %v1014_v43 = vpop.f32.mrf.mxu3 }
 0x567   : > { %v1021_v44 = vpop.xlane.xlu1 %1020 }
 0x568   : > { %v1022_v45 = vmul.f32 %v1021_v44, %v1971_v8 }
 0x56a   : > { %v1023_v46 = vsub.f32 %v2044_v41, %v1022_v45 }
 0x56c   : > { %v1024_v47 = vmul.f32 %v1023_v46, %v1023_v46 }
 0x56e   : > { %v1025_v48 = vsel %vm523_vm0, %v1024_v47, 0.0 }
 0x56f   : > { %1026 = vadd.xlane.f32.xlu0 %v1025_v48 }
 0x5e2   : > { %v1027_v0 = vpop.xlane.xlu0 %1026 }
 0x5e3   : > { %v1028_v51 = vmul.f32 0.032258064, %v1027_v0  ;;  %v1527_v0 = vld [vmem:[%s2158_s21] ss:$0 sm:$0xff] }
 0x5e5   : > { %1554 = vrsqrt.f32 %v1028_v51  ;;  %vm1036_vm11 = vcmp.eq.f32.partialorder %v1028_v51, inf  ;;  %v1039_v58 = vand.u32 2147483648, %v1028_v51  ;;  %vm1038_vm12 = vcmp.eq.f32.partialorder %v1028_v51, 0.0 }
 0x5eb   : > { %v1555_v52 = vpop.eup %1554 }
 0x5ec   : > { %v1030_v53 = vmul.f32 %v1555_v52, %v1028_v51 }
 0x5ee   : > { %v1031_v54 = vmul.f32 %v1555_v52, %v1030_v53 }
 0x5f0   : > { %v1032_v55 = vmul.f32 0.5, %v1031_v54 }
 0x5f2   : > { %v1033_v56 = vsub.f32 1.5, %v1032_v55 }
 0x5f4   : > { %v1034_v57 = vmul.f32 %v1555_v52, %v1033_v56 }
 0x5f6   : > { %v1035_v8 = vmul.f32 %v1034_v57, %v1028_v51 }
 0x5f8   : > { %v1037_v59 = vsel %vm1036_vm11, %v1028_v51, %v1035_v8 }
 0x5f9   : > { %v1040_v60 = vsel %vm1038_vm12, %v1039_v58, %v1037_v59 }
 0x5fa   : > { %v1041_v61 = vadd.f32 1e-06, %v1040_v60 }
 0x5fc   : > { %1556 = vrcp.f32 %v1041_v61 }
 0x602   : > { %v1557_v63 = vpop.eup %1556 }
 0x603   : > { %v1043_v1 = vmul.f32 %v1557_v63, %v1023_v46 }
 0x605   : > { %v1047_v3 = vmul.f32 %v1524_v62, %v1043_v1 }
 0x607   : > { %v1051_v4 = vadd.f32 %v1525_v2, %v1047_v3 }
 0x609   : > { %v1052_v5 = vpack.c.bf16 %v1051_v4, %v1051_v4 }
 0x60b   : > { %1381 = vmatmul.msk.bf16.vlgmr.msrb.gmra.mxu0 %vm523_vm0, %v1052_v5 }
 0x688   : > { %v1085_v7 = vpop.f32.mrf.mxu0 }
 0x689   : > { %v1086_v9 = vadd.f32 %v1526_v6, %v1085_v7 }
 0x68b   : > { %v1090_v10 = vmul.f32 0.70710677, %v1086_v9  ;;  %v1089_v47 = vmul.f32 0.5, %v1086_v9 }
 0x68d   : > { %v1091_v11 = vand.u32 2147483647, %v1090_v10  ;;  %vm1124_vm2 = vcmp.ge.f32.partialorder %v1090_v10, 0.0 }
 0x68f   : > { %v1092_v12 = vmul.f32 0.3275911, %v1091_v11  ;;  %v1118_v29 = vsub.f32 0.0, %v1091_v11 }
 0x690   : > { %v1087_v13 = vpop.f32.mrf.mxu0 }
 0x691   : > { %v1093_v14 = vadd.f32 1.0, %v1092_v12  ;;  %v1119_v32 = vmul.f32 %v1118_v29, %v1091_v11 }
 0x693   : > { %1558 = vrcp.f32 %v1093_v14  ;;  %v1105_v21 = vand.u32 2147483648, %v1093_v14  ;;  %v1103_v23 = vand.u32 2147483647, %v1093_v14  ;;  %vm1099_vm14 = vweird.f32 %v1093_v14 }
 0x694   : > { %v1120_v35 = vmul.f32 1.442695, %v1119_v32 }
 0x695   : > { %v1106_v26 = vor.u32 1.1754944e-38, %v1105_v21  ;;  %vm1104_vm1 = vcmp.eq.f32.partialorder %v1103_v23, 8.507059e+37 }
 0x696   : > { %1560 = vpow2.f32 %v1120_v35 }
 0x699   : > { %v1559_v17 = vpop.eup %1558 }
 0x69a   : > { %v1095_v18 = vmul.f32 %v1559_v17, %v1093_v14  ;;  %vm1100_vm13 = vweird.f32 %v1559_v17 }
 0x69b   : > { %vm1101_vm15 = vmor %vm1099_vm14, %vm1100_vm13 }
 0x69c   : > { %v1096_v20 = vsub.f32 1.0, %v1095_v18  ;;  %v1561_v42 = vpop.eup %1560 }
 0x69e   : > { %v1097_v22 = vmul.f32 %v1559_v17, %v1096_v20 }
 0x6a0   : > { %v1098_v25 = vadd.f32 %v1559_v17, %v1097_v22 }
 0x6a2   : > { %v1102_v27 = vsel %vm1101_vm15, %v1559_v17, %v1098_v25 }
 0x6a3   : > { %v1107_v28 = vsel %vm1104_vm1, %v1106_v26, %v1102_v27 }
 0x6a4   : > { %v1109_v30 = vmul.f32 1.0614054, %v1107_v28 }
 0x6a6   : > { %v1110_v31 = vadd.f32 -1.4531521, %v1109_v30 }
 0x6a8   : > { %v1111_v33 = vmul.f32 %v1110_v31, %v1107_v28 }
 0x6aa   : > { %v1112_v34 = vadd.f32 1.4214138, %v1111_v33 }
 0x6ac   : > { %v1113_v36 = vmul.f32 %v1112_v34, %v1107_v28 }
 0x6ae   : > { %v1114_v37 = vadd.f32 -0.28449672, %v1113_v36 }
 0x6b0   : > { %v1115_v38 = vmul.f32 %v1114_v37, %v1107_v28 }
 0x6b2   : > { %v1116_v39 = vadd.f32 0.2548296, %v1115_v38 }
 0x6b4   : > { %v1117_v40 = vmul.f32 %v1116_v39, %v1107_v28 }
 0x6b6   : > { %v1122_v43 = vmul.f32 %v1561_v42, %v1117_v40 }
 0x6b8   : > { %v1123_v44 = vsub.f32 1.0, %v1122_v43 }
 0x6ba   : > { %v1125_v45 = vsub.f32 0.0, %v1123_v44 }
 0x6bc   : > { %v1126_v46 = vsel %vm1124_vm2, %v1123_v44, %v1125_v45 }
 0x6bd   : > { %v1127_v48 = vadd.f32 1.0, %v1126_v46 }
 0x6bf   : > { %v1128_v49 = vmul.f32 %v1127_v48, %v1089_v47 }
 0x6c1   : > { %v1129_v50 = vpack.c.bf16 %v1128_v49, %v1128_v49 }
 0x6c3   : > { %1398 = vmatmul.msk.bf16.vlgmr.msrb.gmra.mxu1 %vm1162_vm3, %v1129_v50 }
 0x740   : > { %v1175_v51 = vpop.f32.mrf.mxu1 }
 0x741   : > { %v1179_v52 = vadd.f32 %v1175_v51, %v2044_v41 }
 0x743   : > { %v1184_v53 = vadd.f32 %v1527_v0, %v1179_v52 }
 0x745   : > { %1185 = vst.msk [vmem:[%s510_s23] sm:$0xff] %vm523_vm0, %v1184_v53 }
 0x746   : > { %1709 = shalt.err (!%p1706_p9)
}
 0x747   : > { %1433 = dma.vmem_to_hbm [thread:$0]  (%p1897_p4), %s1201_s14, 128, %s1203_s16, %s1187_s28  }
 0x748   : > { %v1177_v41 = vpop.f32.mrf.mxu1 }
 0x749 PF: > { %s2160_s15 = sld [smem:[#allocation20_spill]] }
 0x74a   : > { %s2161_s27 = sld [smem:[#allocation17_spill]] }
 0x74f   : > { %p1460_p10 = scmp.ge.s32.totalorder %s2160_s15, 2 }
 0x750   : > { %s1214_s30 = sand.u32 1, %s2161_s27  }
 0x751   : > { %p1449_p11 = pnand %p1460_p10, %p1904_p8  ;;  %s1215_s20 = scalar_lea.sflag [#allocation6], %s1214_s30 }
 0x753   : > { %p1450_p12 = pneg %p1449_p11 }
 0x755   : > { %1747 = dma.done.wait (%p1450_p12), %s1215_s20, 128  }
 0x756   : > { %1749 = vsyncadd (%p1450_p12), %s1215_s20, 4294967168  ;;  %s29_s30 = sadd.s32 1, %s2160_s15   ;;  %s2163_s21 = sld [smem:[#allocation18_spill]] }
 0x757   : > { %p26_p13 = scmp.ge.s32.totalorder %s29_s30, 4   ;;  %s2164_s27 = sld [smem:[#allocation24_spill]] }
 0x758   : > { %s2165_s28 = sld [smem:[#allocation19_spill]]  ;;  %s2167_s25 = smov %s1756_s26 }
 0x759   : > { %s2166_s29 = sld [smem:[#allocation21_spill]]  ;;  %28 = sbr.rel (!%p26_p13) target bundleno = 11 (0xb), region = 141 }
 0x75c   : > { %s2168_s26 = smov %s2163_s21 }
 0x75e   :  { %1221 = vsyncpa [#allocation5], 1 }
 0x75f   :  { %1223 = vsyncpa [#allocation5 + $0x1], 1 }
 0x760   :  { %1224 = vsyncpa [#allocation8], 1 }
 0x761   :  { %1225 = vsyncpa [#allocation11], 1 }
 0x762   :  { %1226 = vsyncpa [#allocation6], 1 }
 0x763   :  { %1228 = vsyncpa [#allocation6 + $0x1], 1 }

</bundles_post_ra>
